<compile_context>
chip_gen: v6e
topology: v6e:2x2x1
jax: 0.10.0
libtpu: 0.0.40
codegen_flags: <defaults>
</compile_context>

<pallas_src>
import jax
import jax.numpy as jnp
from jax.experimental import pallas as pl
from jax.experimental.pallas import tpu as pltpu


def concat_kernel(a_ref, b_ref, o_ref):
    # a_ref, b_ref: (TM, F) tiles of the two live inputs (x2, x3)
    # o_ref: (TM, 4F) output tile = [a | b | a | b] along the feature axis.
    # Build the whole row in registers, then one unmasked full-block store.
    # The concatenate lowers to XLU lane rotates + VPU selects, which sit in
    # slots that are otherwise idle here; this avoids four narrow masked vst's.
    a = a_ref[...]
    b = b_ref[...]
    o_ref[...] = jnp.concatenate([a, b, a, b], axis=1)


def _round_up(x, m):
    return ((x + m - 1) // m) * m


def _sublane_multiple(dtype):
    """Native second-minor tile for the dtype: 8 (f32), 16 (bf16), 32 (i8/fp8)."""
    itemsize = jnp.dtype(dtype).itemsize
    return {4: 8, 2: 16, 1: 32}.get(itemsize, 8)


def _choose_row_tile(N, F, dtype):
    """Largest row tile whose *padded* double-buffered footprint fits VMEM (v7x-safe)."""
    itemsize = jnp.dtype(dtype).itemsize
    sub = _sublane_multiple(dtype)
    # Real VMEM footprint per row of a block: last dim pads to a 128-lane
    # multiple (F=16 -> 128, 4F=64 -> 128).  Double-buffered pipeline holds
    # 2 copies of (2 input tiles + 1 output tile).
    lanes_in = _round_up(F, 128)
    lanes_out = _round_up(4 * F, 128)
    bytes_per_row = 2 * (2 * lanes_in + lanes_out) * itemsize
    budget_bytes = 24 * 1024 * 1024  # headroom under v7x's 32 MiB scoped VMEM
    tm = budget_bytes // bytes_per_row
    tm = min(tm, 8192, N)            # 8192 rows ~ 12 MiB padded here; diminishing returns past that
    if tm >= sub:
        tm = (tm // sub) * sub       # dtype-native sublane multiple
    else:
        tm = N                       # tiny N: full-extent block is always legal
    return max(tm, 1)


# Below this many rows the whole call is pallas_call launch overhead; plain XLA
# concatenate is strictly faster (feedback item: tiny-harness regime).
_MIN_PALLAS_ROWS = 64


def model_forward(x1, x2, x3, x4, x5, x6, x7, x8, x9, x10, x11):
    # Only x2 and x3 contribute to the returned value (everything else in the
    # original forward is dead code); the live double-concat runs in Pallas.
    N, F = x2.shape
    assert x3.shape == (N, F)

    if N < _MIN_PALLAS_ROWS:
        # Launch-overhead regime: let XLA do it.
        return jnp.concatenate([x2, x3, x2, x3], axis=1)

    dtype = x2.dtype
    itemsize = jnp.dtype(dtype).itemsize
    tm = _choose_row_tile(N, F, dtype)

    out = pl.pallas_call(
        concat_kernel,
        out_shape=jax.ShapeDtypeStruct((N, 4 * F), dtype),
        grid=(pl.cdiv(N, tm),),
        in_specs=[
            pl.BlockSpec((tm, F), lambda i: (i, 0)),
            pl.BlockSpec((tm, F), lambda i: (i, 0)),
        ],
        out_specs=pl.BlockSpec((tm, 4 * F), lambda i: (i, 0)),
        compiler_params=pltpu.CompilerParams(
            dimension_semantics=("parallel",),
        ),
        cost_estimate=pl.CostEstimate(
            flops=0,
            transcendentals=0,
            bytes_accessed=N * (2 * F + 4 * F) * itemsize,
        ),
    )(x2, x3)
    return out


if __name__ == "__main__":
    # Small but Pallas-meaningful stand-in for the fuzzer's huge row count.
    N, F = 1024, 16
    key = jax.random.PRNGKey(0)
    keys = jax.random.split(key, 11)
    xs = [jax.random.normal(k, (N, F), dtype=jnp.float32) for k in keys]

    out = model_forward(*xs)
    out = jax.block_until_ready(out)

    # Reference check (pure JAX)
    x2, x3 = xs[1], xs[2]
    ref = jnp.concatenate([x2, x3, x2, x3], axis=1)
    assert out.shape == (N, 4 * F), out.shape
    assert jnp.allclose(out, ref), "mismatch vs reference"

    print("KERNEL_OK")
</pallas_src>

<mosaic_0001>
module attributes {stable_mosaic.version = 11 : i64} {
  func.func @concat_kernel(%arg0: i32, %arg1: memref<1024x16xf32, #tpu.memory_space<vmem>>, %arg2: memref<1024x16xf32, #tpu.memory_space<vmem>>, %arg3: memref<1024x64xf32, #tpu.memory_space<vmem>>) attributes {dimension_semantics = [#tpu.dimension_semantics<parallel>], iteration_bounds = array<i64: 1>, scalar_prefetch = 0 : i64, scratch_operands = 0 : i64, tpu.core_type = #tpu.core_type<tc>, window_params = [{transform_indices = @transform_0, window_bounds = array<i64: 1024, 16>}, {transform_indices = @transform_1, window_bounds = array<i64: 1024, 16>}, {transform_indices = @transform_2, window_bounds = array<i64: 1024, 64>}]} {
    %c0 = arith.constant 0 : index
    %c0_0 = arith.constant 0 : index
    %0 = vector.load %arg1[%c0, %c0_0] : memref<1024x16xf32, #tpu.memory_space<vmem>>, vector<1024x16xf32>
    %c0_1 = arith.constant 0 : index
    %c0_2 = arith.constant 0 : index
    %1 = vector.load %arg2[%c0_1, %c0_2] : memref<1024x16xf32, #tpu.memory_space<vmem>>, vector<1024x16xf32>
    %2 = tpu.concatenate %0, %1, %0, %1 in 1 : vector<1024x16xf32>, vector<1024x16xf32>, vector<1024x16xf32>, vector<1024x16xf32> -> vector<1024x64xf32>
    %c0_3 = arith.constant 0 : index
    %c0_4 = arith.constant 0 : index
    %3 = vector.load %arg3[%c0_3, %c0_4] : memref<1024x64xf32, #tpu.memory_space<vmem>>, vector<1024x64xf32>
    tpu.vector_store %arg3[%c0_3, %c0_4], %2 {strides = array<i32>} : memref<1024x64xf32, #tpu.memory_space<vmem>>, vector<1024x64xf32>,
    return
  }
  func.func @transform_0(%arg0: i32) -> (i32, i32) {
    %c0_i32 = arith.constant 0 : i32
    %c0_i32_0 = arith.constant 0 : i32
    return %arg0, %c0_i32 : i32, i32
  }
  func.func @transform_1(%arg0: i32) -> (i32, i32) {
    %c0_i32 = arith.constant 0 : i32
    %c0_i32_0 = arith.constant 0 : i32
    return %arg0, %c0_i32 : i32, i32
  }
  func.func @transform_2(%arg0: i32) -> (i32, i32) {
    %c0_i32 = arith.constant 0 : i32
    %c0_i32_0 = arith.constant 0 : i32
    return %arg0, %c0_i32 : i32, i32
  }
}

</mosaic_0001>

<bundles_post_ra>
// kernel: tpu_custom_call.1
= control target key start
LH: loop header
LB: loop body
LE: loop exit
PB: predicated region body
PF: predicated region fallthrough
CT: control target
= control target key end

     0   :  { %s2450_s13 = smov 16   ;;  %s2451_s27 = smov 32   ;;  %vm1675_vm0 = vcmask 130048   ;;  %vm1804_vm1 = vcmask 261120   ;;  %vm1933_vm2 = vcmask 392192   ;;  %vm2062_vm3 = vcmask 523264   ;;  %s6056_s1 = inlined_call_operand.vmem [shape: f32[1024,16], index: 1, kind: input, shape index: {}]   ;;  %s6057_s0 = inlined_call_operand.vmem [shape: f32[1024,16], index: 0, kind: input, shape index: {}]   ;;  %s6058_s2 = inlined_call_operand.vmem [shape: f32[1024,64], index: 2, kind: output, shape index: {}]  }
   0x1   :  { %v141_v0 = vld [vmem:[%s6056_s1 + $0x10] sm:$0xff]  ;;  %v139_v1 = vld [vmem:[%s6056_s1] sm:$0xff]  ;;  %v142_v2 = vld [vmem:[%s6056_s1 + $0x18] sm:$0xff]  ;;  %s2452_s10 = smov 48  }
   0x2   :  { %399 = vrot.lane.b32.xlu1 %v141_v0, %s2450_s13  ;;  %395 = vrot.lane.b32.xlu0 %v139_v1, %s2450_s13  ;;  %v140_v3 = vld [vmem:[%s6056_s1 + $0x8] sm:$0xff]  ;;  %v143_v5 = vld [vmem:[%s6056_s1 + $0x20] sm:$0xff] }
   0x3   :  { %v144_v4 = vld [vmem:[%s6056_s1 + $0x28] sm:$0xff]  ;;  %v146_v6 = vld [vmem:[%s6056_s1 + $0x38] sm:$0xff]  ;;  %v145_v7 = vld [vmem:[%s6056_s1 + $0x30] sm:$0xff] }
   0x4   :  { %v148_v8 = vld [vmem:[%s6056_s1 + $0x48] sm:$0xff]  ;;  %v147_v9 = vld [vmem:[%s6056_s1 + $0x40] sm:$0xff]  ;;  %v150_v10 = vld [vmem:[%s6056_s1 + $0x58] sm:$0xff] }
   0x5   :  { %v149_v11 = vld [vmem:[%s6056_s1 + $0x50] sm:$0xff]  ;;  %v152_v12 = vld [vmem:[%s6056_s1 + $0x68] sm:$0xff]  ;;  %v151_v13 = vld [vmem:[%s6056_s1 + $0x60] sm:$0xff] }
   0x6   :  { %401 = vrot.lane.b32.xlu1 %v142_v2, %s2450_s13  ;;  %397 = vrot.lane.b32.xlu0 %v140_v3, %s2450_s13  ;;  %v154_v14 = vld [vmem:[%s6056_s1 + $0x78] sm:$0xff]  ;;  %v153_v15 = vld [vmem:[%s6056_s1 + $0x70] sm:$0xff] }
   0x7   :  { %v156_v16 = vld [vmem:[%s6056_s1 + $0x88] sm:$0xff]  ;;  %v155_v17 = vld [vmem:[%s6056_s1 + $0x80] sm:$0xff]  ;;  %v158_v18 = vld [vmem:[%s6056_s1 + $0x98] sm:$0xff] }
   0x8   :  { %v157_v19 = vld [vmem:[%s6056_s1 + $0x90] sm:$0xff]  ;;  %v160_v20 = vld [vmem:[%s6056_s1 + $0xa8] sm:$0xff]  ;;  %v159_v21 = vld [vmem:[%s6056_s1 + $0xa0] sm:$0xff] }
   0x9   :  { %v162_v22 = vld [vmem:[%s6056_s1 + $0xb8] sm:$0xff]  ;;  %v161_v23 = vld [vmem:[%s6056_s1 + $0xb0] sm:$0xff]  ;;  %v164_v24 = vld [vmem:[%s6056_s1 + $0xc8] sm:$0xff] }
   0xa   :  { %405 = vrot.lane.b32.xlu1 %v144_v4, %s2450_s13  ;;  %403 = vrot.lane.b32.xlu0 %v143_v5, %s2450_s13  ;;  %v163_v25 = vld [vmem:[%s6056_s1 + $0xc0] sm:$0xff]  ;;  %v166_v26 = vld [vmem:[%s6056_s1 + $0xd8] sm:$0xff] }
   0xb   :  { %v165_v27 = vld [vmem:[%s6056_s1 + $0xd0] sm:$0xff]  ;;  %v168_v28 = vld [vmem:[%s6056_s1 + $0xe8] sm:$0xff]  ;;  %v167_v29 = vld [vmem:[%s6056_s1 + $0xe0] sm:$0xff] }
   0xc   :  { %v170_v30 = vld [vmem:[%s6056_s1 + $0xf8] sm:$0xff]  ;;  %v169_v31 = vld [vmem:[%s6056_s1 + $0xf0] sm:$0xff]  ;;  %v172_v32 = vld [vmem:[%s6056_s1 + $0x108] sm:$0xff] }
   0xd   :  { %v171_v33 = vld [vmem:[%s6056_s1 + $0x100] sm:$0xff]  ;;  %v174_v34 = vld [vmem:[%s6056_s1 + $0x118] sm:$0xff]  ;;  %v173_v35 = vld [vmem:[%s6056_s1 + $0x110] sm:$0xff] }
   0xe   :  { %409 = vrot.lane.b32.xlu1 %v146_v6, %s2450_s13  ;;  %407 = vrot.lane.b32.xlu0 %v145_v7, %s2450_s13  ;;  %v176_v36 = vld [vmem:[%s6056_s1 + $0x128] sm:$0xff]  ;;  %v175_v37 = vld [vmem:[%s6056_s1 + $0x120] sm:$0xff] }
   0xf   :  { %v178_v38 = vld [vmem:[%s6056_s1 + $0x138] sm:$0xff]  ;;  %v177_v39 = vld [vmem:[%s6056_s1 + $0x130] sm:$0xff]  ;;  %v180_v40 = vld [vmem:[%s6056_s1 + $0x148] sm:$0xff] }
  0x10   :  { %v179_v41 = vld [vmem:[%s6056_s1 + $0x140] sm:$0xff]  ;;  %v182_v42 = vld [vmem:[%s6056_s1 + $0x158] sm:$0xff]  ;;  %v181_v43 = vld [vmem:[%s6056_s1 + $0x150] sm:$0xff] }
  0x11   :  { %v184_v44 = vld [vmem:[%s6056_s1 + $0x168] sm:$0xff]  ;;  %v183_v45 = vld [vmem:[%s6056_s1 + $0x160] sm:$0xff]  ;;  %v186_v46 = vld [vmem:[%s6056_s1 + $0x178] sm:$0xff] }
  0x12   :  { %413 = vrot.lane.b32.xlu1 %v148_v8, %s2450_s13  ;;  %411 = vrot.lane.b32.xlu0 %v147_v9, %s2450_s13  ;;  %v185_v47 = vld [vmem:[%s6056_s1 + $0x170] sm:$0xff]  ;;  %v188_v48 = vld [vmem:[%s6056_s1 + $0x188] sm:$0xff] }
  0x13   :  { %v187_v49 = vld [vmem:[%s6056_s1 + $0x180] sm:$0xff]  ;;  %v190_v50 = vld [vmem:[%s6056_s1 + $0x198] sm:$0xff]  ;;  %v189_v51 = vld [vmem:[%s6056_s1 + $0x190] sm:$0xff] }
  0x14   :  { %v192_v52 = vld [vmem:[%s6056_s1 + $0x1a8] sm:$0xff]  ;;  %v191_v53 = vld [vmem:[%s6056_s1 + $0x1a0] sm:$0xff]  ;;  %v194_v54 = vld [vmem:[%s6056_s1 + $0x1b8] sm:$0xff] }
  0x15   :  { %v193_v55 = vld [vmem:[%s6056_s1 + $0x1b0] sm:$0xff]  ;;  %v196_v56 = vld [vmem:[%s6056_s1 + $0x1c8] sm:$0xff]  ;;  %v195_v57 = vld [vmem:[%s6056_s1 + $0x1c0] sm:$0xff] }
  0x16   :  { %417 = vrot.lane.b32.xlu1 %v150_v10, %s2450_s13  ;;  %415 = vrot.lane.b32.xlu0 %v149_v11, %s2450_s13  ;;  %v198_v58 = vld [vmem:[%s6056_s1 + $0x1d8] sm:$0xff]  ;;  %v197_v59 = vld [vmem:[%s6056_s1 + $0x1d0] sm:$0xff] }
  0x17   :  { %v200_v62 = vld [vmem:[%s6056_s1 + $0x1e8] sm:$0xff]  ;;  %v199_v63 = vld [vmem:[%s6056_s1 + $0x1e0] sm:$0xff]  ;;  %v202_v2 = vld [vmem:[%s6056_s1 + $0x1f8] sm:$0xff] }
  0x18   :  { %v201_v3 = vld [vmem:[%s6056_s1 + $0x1f0] sm:$0xff]  ;;  %v204_v6 = vld [vmem:[%s6056_s1 + $0x208] sm:$0xff]  ;;  %v203_v7 = vld [vmem:[%s6056_s1 + $0x200] sm:$0xff] }
  0x19   :  { %v206_v10 = vld [vmem:[%s6056_s1 + $0x218] sm:$0xff]  ;;  %v205_v11 = vld [vmem:[%s6056_s1 + $0x210] sm:$0xff] }
  0x1a   :  { %421 = vrot.lane.b32.xlu1 %v152_v12, %s2450_s13  ;;  %419 = vrot.lane.b32.xlu0 %v151_v13, %s2450_s13 }
  0x1e   :  { %425 = vrot.lane.b32.xlu1 %v154_v14, %s2450_s13  ;;  %423 = vrot.lane.b32.xlu0 %v153_v15, %s2450_s13  ;;  %v208_v14 = vld [vmem:[%s6056_s1 + $0x228] sm:$0xff]  ;;  %v207_v15 = vld [vmem:[%s6056_s1 + $0x220] sm:$0xff] }
  0x22   :  { %429 = vrot.lane.b32.xlu1 %v156_v16, %s2450_s13  ;;  %427 = vrot.lane.b32.xlu0 %v155_v17, %s2450_s13 }
  0x26   :  { %433 = vrot.lane.b32.xlu1 %v158_v18, %s2450_s13  ;;  %431 = vrot.lane.b32.xlu0 %v157_v19, %s2450_s13  ;;  %v210_v18 = vld [vmem:[%s6056_s1 + $0x238] sm:$0xff]  ;;  %v209_v19 = vld [vmem:[%s6056_s1 + $0x230] sm:$0xff] }
  0x2a   :  { %437 = vrot.lane.b32.xlu1 %v160_v20, %s2450_s13  ;;  %435 = vrot.lane.b32.xlu0 %v159_v21, %s2450_s13 }
  0x2e   :  { %441 = vrot.lane.b32.xlu1 %v162_v22, %s2450_s13  ;;  %439 = vrot.lane.b32.xlu0 %v161_v23, %s2450_s13  ;;  %v212_v22 = vld [vmem:[%s6056_s1 + $0x248] sm:$0xff]  ;;  %v211_v23 = vld [vmem:[%s6056_s1 + $0x240] sm:$0xff] }
  0x32   :  { %445 = vrot.lane.b32.xlu1 %v164_v24, %s2450_s13  ;;  %443 = vrot.lane.b32.xlu0 %v163_v25, %s2450_s13 }
  0x36   :  { %449 = vrot.lane.b32.xlu1 %v166_v26, %s2450_s13  ;;  %447 = vrot.lane.b32.xlu0 %v165_v27, %s2450_s13  ;;  %v214_v26 = vld [vmem:[%s6056_s1 + $0x258] sm:$0xff]  ;;  %v213_v27 = vld [vmem:[%s6056_s1 + $0x250] sm:$0xff] }
  0x3a   :  { %453 = vrot.lane.b32.xlu1 %v168_v28, %s2450_s13  ;;  %451 = vrot.lane.b32.xlu0 %v167_v29, %s2450_s13 }
  0x3e   :  { %457 = vrot.lane.b32.xlu1 %v170_v30, %s2450_s13  ;;  %455 = vrot.lane.b32.xlu0 %v169_v31, %s2450_s13  ;;  %v216_v30 = vld [vmem:[%s6056_s1 + $0x268] sm:$0xff]  ;;  %v215_v31 = vld [vmem:[%s6056_s1 + $0x260] sm:$0xff] }
  0x42   :  { %461 = vrot.lane.b32.xlu1 %v172_v32, %s2450_s13  ;;  %459 = vrot.lane.b32.xlu0 %v171_v33, %s2450_s13 }
  0x46   :  { %465 = vrot.lane.b32.xlu1 %v174_v34, %s2450_s13  ;;  %463 = vrot.lane.b32.xlu0 %v173_v35, %s2450_s13  ;;  %v218_v34 = vld [vmem:[%s6056_s1 + $0x278] sm:$0xff]  ;;  %v217_v35 = vld [vmem:[%s6056_s1 + $0x270] sm:$0xff] }
  0x4a   :  { %469 = vrot.lane.b32.xlu1 %v176_v36, %s2450_s13  ;;  %467 = vrot.lane.b32.xlu0 %v175_v37, %s2450_s13 }
  0x4e   :  { %473 = vrot.lane.b32.xlu1 %v178_v38, %s2450_s13  ;;  %471 = vrot.lane.b32.xlu0 %v177_v39, %s2450_s13  ;;  %v220_v38 = vld [vmem:[%s6056_s1 + $0x288] sm:$0xff]  ;;  %v219_v39 = vld [vmem:[%s6056_s1 + $0x280] sm:$0xff] }
  0x52   :  { %477 = vrot.lane.b32.xlu1 %v180_v40, %s2450_s13  ;;  %475 = vrot.lane.b32.xlu0 %v179_v41, %s2450_s13 }
  0x56   :  { %481 = vrot.lane.b32.xlu1 %v182_v42, %s2450_s13  ;;  %479 = vrot.lane.b32.xlu0 %v181_v43, %s2450_s13  ;;  %v222_v42 = vld [vmem:[%s6056_s1 + $0x298] sm:$0xff]  ;;  %v221_v43 = vld [vmem:[%s6056_s1 + $0x290] sm:$0xff] }
  0x5a   :  { %485 = vrot.lane.b32.xlu1 %v184_v44, %s2450_s13  ;;  %483 = vrot.lane.b32.xlu0 %v183_v45, %s2450_s13 }
  0x5e   :  { %489 = vrot.lane.b32.xlu1 %v186_v46, %s2450_s13  ;;  %487 = vrot.lane.b32.xlu0 %v185_v47, %s2450_s13  ;;  %v224_v46 = vld [vmem:[%s6056_s1 + $0x2a8] sm:$0xff]  ;;  %v223_v47 = vld [vmem:[%s6056_s1 + $0x2a0] sm:$0xff] }
  0x62   :  { %493 = vrot.lane.b32.xlu1 %v188_v48, %s2450_s13  ;;  %491 = vrot.lane.b32.xlu0 %v187_v49, %s2450_s13 }
  0x66   :  { %497 = vrot.lane.b32.xlu1 %v190_v50, %s2450_s13  ;;  %495 = vrot.lane.b32.xlu0 %v189_v51, %s2450_s13  ;;  %v226_v50 = vld [vmem:[%s6056_s1 + $0x2b8] sm:$0xff]  ;;  %v225_v51 = vld [vmem:[%s6056_s1 + $0x2b0] sm:$0xff] }
  0x6a   :  { %501 = vrot.lane.b32.xlu1 %v192_v52, %s2450_s13  ;;  %499 = vrot.lane.b32.xlu0 %v191_v53, %s2450_s13 }
  0x6e   :  { %505 = vrot.lane.b32.xlu1 %v194_v54, %s2450_s13  ;;  %503 = vrot.lane.b32.xlu0 %v193_v55, %s2450_s13  ;;  %v228_v54 = vld [vmem:[%s6056_s1 + $0x2c8] sm:$0xff]  ;;  %v227_v55 = vld [vmem:[%s6056_s1 + $0x2c0] sm:$0xff] }
  0x72   :  { %509 = vrot.lane.b32.xlu1 %v196_v56, %s2450_s13  ;;  %507 = vrot.lane.b32.xlu0 %v195_v57, %s2450_s13 }
  0x74   :  { %v2706_v60 = vpop.permute.xlu1 %399  ;;  %v2708_v61 = vpop.permute.xlu0 %395 }
  0x76   :  { %513 = vrot.lane.b32.xlu1 %v198_v58, %s2450_s13  ;;  %511 = vrot.lane.b32.xlu0 %v197_v59, %s2450_s13  ;;  %v230_v58 = vld [vmem:[%s6056_s1 + $0x2d8] sm:$0xff]  ;;  %v229_v59 = vld [vmem:[%s6056_s1 + $0x2d0] sm:$0xff] }
  0x78   :  { %v2718_v0 = vpop.permute.xlu1 %401  ;;  %v2720_v1 = vpop.permute.xlu0 %397 }
  0x7a   :  { %517 = vrot.lane.b32.xlu1 %v200_v62, %s2450_s13  ;;  %515 = vrot.lane.b32.xlu0 %v199_v63, %s2450_s13 }
  0x7c   :  { %v2730_v4 = vpop.permute.xlu1 %405  ;;  %v2732_v5 = vpop.permute.xlu0 %403 }
  0x7e   :  { %521 = vrot.lane.b32.xlu1 %v202_v2, %s2450_s13  ;;  %519 = vrot.lane.b32.xlu0 %v201_v3, %s2450_s13  ;;  %v232_v2 = vld [vmem:[%s6056_s1 + $0x2e8] sm:$0xff]  ;;  %v231_v3 = vld [vmem:[%s6056_s1 + $0x2e0] sm:$0xff] }
  0x80   :  { %v2742_v8 = vpop.permute.xlu1 %409  ;;  %v2744_v9 = vpop.permute.xlu0 %407 }
  0x82   :  { %525 = vrot.lane.b32.xlu1 %v204_v6, %s2450_s13  ;;  %523 = vrot.lane.b32.xlu0 %v203_v7, %s2450_s13 }
  0x84   :  { %v2754_v12 = vpop.permute.xlu1 %413  ;;  %v2756_v13 = vpop.permute.xlu0 %411 }
  0x86   :  { %529 = vrot.lane.b32.xlu1 %v206_v10, %s2450_s13  ;;  %527 = vrot.lane.b32.xlu0 %v205_v11, %s2450_s13  ;;  %v234_v10 = vld [vmem:[%s6056_s1 + $0x2f8] sm:$0xff]  ;;  %v233_v11 = vld [vmem:[%s6056_s1 + $0x2f0] sm:$0xff] }
  0x88   :  { %v2766_v16 = vpop.permute.xlu1 %417  ;;  %v2768_v17 = vpop.permute.xlu0 %415 }
  0x8a   :  { %533 = vrot.lane.b32.xlu1 %v208_v14, %s2450_s13  ;;  %531 = vrot.lane.b32.xlu0 %v207_v15, %s2450_s13 }
  0x8c   :  { %v2778_v20 = vpop.permute.xlu1 %421  ;;  %v2780_v21 = vpop.permute.xlu0 %419 }
  0x8e   :  { %537 = vrot.lane.b32.xlu1 %v210_v18, %s2450_s13  ;;  %535 = vrot.lane.b32.xlu0 %v209_v19, %s2450_s13  ;;  %v236_v18 = vld [vmem:[%s6056_s1 + $0x308] sm:$0xff]  ;;  %v235_v19 = vld [vmem:[%s6056_s1 + $0x300] sm:$0xff] }
  0x90   :  { %v2790_v24 = vpop.permute.xlu1 %425  ;;  %v2792_v25 = vpop.permute.xlu0 %423 }
  0x92   :  { %541 = vrot.lane.b32.xlu1 %v212_v22, %s2450_s13  ;;  %539 = vrot.lane.b32.xlu0 %v211_v23, %s2450_s13 }
  0x94   :  { %v2802_v28 = vpop.permute.xlu1 %429  ;;  %v2804_v29 = vpop.permute.xlu0 %427 }
  0x96   :  { %545 = vrot.lane.b32.xlu1 %v214_v26, %s2450_s13  ;;  %543 = vrot.lane.b32.xlu0 %v213_v27, %s2450_s13  ;;  %v238_v26 = vld [vmem:[%s6056_s1 + $0x318] sm:$0xff]  ;;  %v237_v27 = vld [vmem:[%s6056_s1 + $0x310] sm:$0xff] }
  0x98   :  { %v2814_v32 = vpop.permute.xlu1 %433  ;;  %v2816_v33 = vpop.permute.xlu0 %431 }
  0x9a   :  { %549 = vrot.lane.b32.xlu1 %v216_v30, %s2450_s13  ;;  %547 = vrot.lane.b32.xlu0 %v215_v31, %s2450_s13 }
  0x9c   :  { %v2826_v36 = vpop.permute.xlu1 %437  ;;  %v2828_v37 = vpop.permute.xlu0 %435 }
  0x9e   :  { %553 = vrot.lane.b32.xlu1 %v218_v34, %s2450_s13  ;;  %551 = vrot.lane.b32.xlu0 %v217_v35, %s2450_s13  ;;  %v240_v34 = vld [vmem:[%s6056_s1 + $0x328] sm:$0xff]  ;;  %v239_v35 = vld [vmem:[%s6056_s1 + $0x320] sm:$0xff] }
  0xa0   :  { %v2838_v40 = vpop.permute.xlu1 %441  ;;  %v2840_v41 = vpop.permute.xlu0 %439 }
  0xa2   :  { %557 = vrot.lane.b32.xlu1 %v220_v38, %s2450_s13  ;;  %555 = vrot.lane.b32.xlu0 %v219_v39, %s2450_s13 }
  0xa4   :  { %v2850_v44 = vpop.permute.xlu1 %445  ;;  %v2852_v45 = vpop.permute.xlu0 %443 }
  0xa6   :  { %561 = vrot.lane.b32.xlu1 %v222_v42, %s2450_s13  ;;  %559 = vrot.lane.b32.xlu0 %v221_v43, %s2450_s13  ;;  %v242_v42 = vld [vmem:[%s6056_s1 + $0x338] sm:$0xff]  ;;  %v241_v43 = vld [vmem:[%s6056_s1 + $0x330] sm:$0xff] }
  0xa8   :  { %v2862_v48 = vpop.permute.xlu1 %449  ;;  %v2864_v49 = vpop.permute.xlu0 %447 }
  0xa9   :  { %6059 = vst [vmem:[#allocation2_spill] sm:$0xff] %v2862_v48  ;;  %6060 = vst [vmem:[#allocation3_spill] sm:$0xff] %v2864_v49 }
  0xaa   :  { %565 = vrot.lane.b32.xlu1 %v224_v46, %s2450_s13  ;;  %563 = vrot.lane.b32.xlu0 %v223_v47, %s2450_s13 }
  0xac   :  { %v2874_v52 = vpop.permute.xlu1 %453  ;;  %v2876_v53 = vpop.permute.xlu0 %451 }
  0xad   :  { %6061 = vst [vmem:[#allocation4_spill] sm:$0xff] %v2874_v52  ;;  %6062 = vst [vmem:[#allocation5_spill] sm:$0xff] %v2876_v53  ;;  %v95_v52 = vld [vmem:[%s6057_s0 + $0x2a0] sm:$0xff] }
  0xae   :  { %569 = vrot.lane.b32.xlu1 %v226_v50, %s2450_s13  ;;  %567 = vrot.lane.b32.xlu0 %v225_v51, %s2450_s13  ;;  %v244_v50 = vld [vmem:[%s6056_s1 + $0x348] sm:$0xff]  ;;  %v243_v51 = vld [vmem:[%s6056_s1 + $0x340] sm:$0xff] }
  0xb0   :  { %v2886_v56 = vpop.permute.xlu1 %457  ;;  %v2888_v57 = vpop.permute.xlu0 %455 }
  0xb1   :  { %6063 = vst [vmem:[#allocation6_spill] sm:$0xff] %v2886_v56  ;;  %6064 = vst [vmem:[#allocation7_spill] sm:$0xff] %v2888_v57  ;;  %v93_v56 = vld [vmem:[%s6057_s0 + $0x290] sm:$0xff] }
  0xb2   :  { %573 = vrot.lane.b32.xlu1 %v228_v54, %s2450_s13  ;;  %571 = vrot.lane.b32.xlu0 %v227_v55, %s2450_s13 }
  0xb4   :  { %v2898_v62 = vpop.permute.xlu1 %461  ;;  %v2900_v63 = vpop.permute.xlu0 %459 }
  0xb5   :  { %6065 = vst [vmem:[#allocation8_spill] sm:$0xff] %v2898_v62  ;;  %6066 = vst [vmem:[#allocation9_spill] sm:$0xff] %v2900_v63  ;;  %v91_v62 = vld [vmem:[%s6057_s0 + $0x280] sm:$0xff] }
  0xb6   :  { %577 = vrot.lane.b32.xlu1 %v230_v58, %s2450_s13  ;;  %575 = vrot.lane.b32.xlu0 %v229_v59, %s2450_s13  ;;  %v246_v58 = vld [vmem:[%s6056_s1 + $0x358] sm:$0xff]  ;;  %v245_v59 = vld [vmem:[%s6056_s1 + $0x350] sm:$0xff] }
  0xb8   :  { %v2910_v6 = vpop.permute.xlu1 %465  ;;  %v2912_v7 = vpop.permute.xlu0 %463 }
  0xb9   :  { %6067 = vst [vmem:[#allocation10_spill] sm:$0xff] %v2910_v6  ;;  %6068 = vst [vmem:[#allocation11_spill] sm:$0xff] %v2912_v7  ;;  %v89_v6 = vld [vmem:[%s6057_s0 + $0x270] sm:$0xff] }
  0xba   :  { %581 = vrot.lane.b32.xlu1 %v232_v2, %s2450_s13  ;;  %579 = vrot.lane.b32.xlu0 %v231_v3, %s2450_s13 }
  0xbc   :  { %v2922_v14 = vpop.permute.xlu1 %469  ;;  %v2924_v15 = vpop.permute.xlu0 %467 }
  0xbd   :  { %6069 = vst [vmem:[#allocation12_spill] sm:$0xff] %v2922_v14  ;;  %6070 = vst [vmem:[#allocation13_spill] sm:$0xff] %v2924_v15  ;;  %v87_v14 = vld [vmem:[%s6057_s0 + $0x260] sm:$0xff] }
  0xbe   :  { %585 = vrot.lane.b32.xlu1 %v234_v10, %s2450_s13  ;;  %583 = vrot.lane.b32.xlu0 %v233_v11, %s2450_s13  ;;  %v248_v10 = vld [vmem:[%s6056_s1 + $0x368] sm:$0xff]  ;;  %v247_v11 = vld [vmem:[%s6056_s1 + $0x360] sm:$0xff] }
  0xc0   :  { %v2934_v22 = vpop.permute.xlu1 %473  ;;  %v2936_v23 = vpop.permute.xlu0 %471 }
  0xc1   :  { %6071 = vst [vmem:[#allocation14_spill] sm:$0xff] %v2934_v22  ;;  %6072 = vst [vmem:[#allocation15_spill] sm:$0xff] %v2936_v23  ;;  %v85_v22 = vld [vmem:[%s6057_s0 + $0x250] sm:$0xff] }
  0xc2   :  { %589 = vrot.lane.b32.xlu1 %v236_v18, %s2450_s13  ;;  %587 = vrot.lane.b32.xlu0 %v235_v19, %s2450_s13 }
  0xc4   :  { %v2946_v30 = vpop.permute.xlu1 %477  ;;  %v2948_v31 = vpop.permute.xlu0 %475 }
  0xc5   :  { %6073 = vst [vmem:[#allocation16_spill] sm:$0xff] %v2946_v30  ;;  %6074 = vst [vmem:[#allocation17_spill] sm:$0xff] %v2948_v31  ;;  %v83_v30 = vld [vmem:[%s6057_s0 + $0x240] sm:$0xff] }
  0xc6   :  { %593 = vrot.lane.b32.xlu1 %v238_v26, %s2450_s13  ;;  %591 = vrot.lane.b32.xlu0 %v237_v27, %s2450_s13  ;;  %v250_v26 = vld [vmem:[%s6056_s1 + $0x378] sm:$0xff]  ;;  %v249_v27 = vld [vmem:[%s6056_s1 + $0x370] sm:$0xff] }
  0xc8   :  { %v2958_v38 = vpop.permute.xlu1 %481  ;;  %v2960_v39 = vpop.permute.xlu0 %479 }
  0xc9   :  { %6075 = vst [vmem:[#allocation18_spill] sm:$0xff] %v2958_v38  ;;  %6076 = vst [vmem:[#allocation19_spill] sm:$0xff] %v2960_v39  ;;  %v81_v38 = vld [vmem:[%s6057_s0 + $0x230] sm:$0xff] }
  0xca   :  { %597 = vrot.lane.b32.xlu1 %v240_v34, %s2450_s13  ;;  %595 = vrot.lane.b32.xlu0 %v239_v35, %s2450_s13 }
  0xcc   :  { %v2970_v46 = vpop.permute.xlu1 %485  ;;  %v2972_v47 = vpop.permute.xlu0 %483 }
  0xcd   :  { %6077 = vst [vmem:[#allocation20_spill] sm:$0xff] %v2970_v46  ;;  %6078 = vst [vmem:[#allocation21_spill] sm:$0xff] %v2972_v47  ;;  %v79_v46 = vld [vmem:[%s6057_s0 + $0x220] sm:$0xff] }
  0xce   :  { %601 = vrot.lane.b32.xlu1 %v242_v42, %s2450_s13  ;;  %599 = vrot.lane.b32.xlu0 %v241_v43, %s2450_s13  ;;  %v252_v42 = vld [vmem:[%s6056_s1 + $0x388] sm:$0xff]  ;;  %v251_v43 = vld [vmem:[%s6056_s1 + $0x380] sm:$0xff] }
  0xd0   :  { %v2982_v54 = vpop.permute.xlu1 %489  ;;  %v2984_v55 = vpop.permute.xlu0 %487 }
  0xd1   :  { %6079 = vst [vmem:[#allocation22_spill] sm:$0xff] %v2982_v54  ;;  %6080 = vst [vmem:[#allocation23_spill] sm:$0xff] %v2984_v55  ;;  %v77_v54 = vld [vmem:[%s6057_s0 + $0x210] sm:$0xff] }
  0xd2   :  { %605 = vrot.lane.b32.xlu1 %v244_v50, %s2450_s13  ;;  %603 = vrot.lane.b32.xlu0 %v243_v51, %s2450_s13 }
  0xd4   :  { %v2994_v2 = vpop.permute.xlu1 %493  ;;  %v2996_v3 = vpop.permute.xlu0 %491 }
  0xd5   :  { %6081 = vst [vmem:[#allocation24_spill] sm:$0xff] %v2994_v2  ;;  %6082 = vst [vmem:[#allocation25_spill] sm:$0xff] %v2996_v3  ;;  %v75_v2 = vld [vmem:[%s6057_s0 + $0x200] sm:$0xff] }
  0xd6   :  { %609 = vrot.lane.b32.xlu1 %v246_v58, %s2450_s13  ;;  %607 = vrot.lane.b32.xlu0 %v245_v59, %s2450_s13  ;;  %v254_v58 = vld [vmem:[%s6056_s1 + $0x398] sm:$0xff]  ;;  %v253_v59 = vld [vmem:[%s6056_s1 + $0x390] sm:$0xff] }
  0xd8   :  { %v3006_v18 = vpop.permute.xlu1 %497  ;;  %v3008_v19 = vpop.permute.xlu0 %495 }
  0xd9   :  { %6083 = vst [vmem:[#allocation26_spill] sm:$0xff] %v3006_v18  ;;  %6084 = vst [vmem:[#allocation27_spill] sm:$0xff] %v3008_v19  ;;  %v73_v18 = vld [vmem:[%s6057_s0 + $0x1f0] sm:$0xff] }
  0xda   :  { %613 = vrot.lane.b32.xlu1 %v248_v10, %s2450_s13  ;;  %611 = vrot.lane.b32.xlu0 %v247_v11, %s2450_s13 }
  0xdc   :  { %v3018_v34 = vpop.permute.xlu1 %501  ;;  %v3020_v35 = vpop.permute.xlu0 %499 }
  0xdd   :  { %6085 = vst [vmem:[#allocation28_spill] sm:$0xff] %v3018_v34  ;;  %6086 = vst [vmem:[#allocation29_spill] sm:$0xff] %v3020_v35  ;;  %v71_v34 = vld [vmem:[%s6057_s0 + $0x1e0] sm:$0xff] }
  0xde   :  { %617 = vrot.lane.b32.xlu1 %v250_v26, %s2450_s13  ;;  %615 = vrot.lane.b32.xlu0 %v249_v27, %s2450_s13  ;;  %v256_v26 = vld [vmem:[%s6056_s1 + $0x3a8] sm:$0xff]  ;;  %v255_v27 = vld [vmem:[%s6056_s1 + $0x3a0] sm:$0xff] }
  0xe0   :  { %v3030_v50 = vpop.permute.xlu1 %505  ;;  %v3032_v51 = vpop.permute.xlu0 %503 }
  0xe1   :  { %6087 = vst [vmem:[#allocation30_spill] sm:$0xff] %v3030_v50  ;;  %6088 = vst [vmem:[#allocation31_spill] sm:$0xff] %v3032_v51 }
  0xe2   :  { %621 = vrot.lane.b32.xlu1 %v252_v42, %s2450_s13  ;;  %619 = vrot.lane.b32.xlu0 %v251_v43, %s2450_s13 }
  0xe4   :  { %v3042_v10 = vpop.permute.xlu1 %509  ;;  %v3044_v11 = vpop.permute.xlu0 %507 }
  0xe5   :  { %6089 = vst [vmem:[#allocation32_spill] sm:$0xff] %v3042_v10  ;;  %6090 = vst [vmem:[#allocation33_spill] sm:$0xff] %v3044_v11 }
  0xe6   :  { %625 = vrot.lane.b32.xlu1 %v254_v58, %s2450_s13  ;;  %623 = vrot.lane.b32.xlu0 %v253_v59, %s2450_s13  ;;  %v258_v58 = vld [vmem:[%s6056_s1 + $0x3b8] sm:$0xff]  ;;  %v257_v59 = vld [vmem:[%s6056_s1 + $0x3b0] sm:$0xff] }
  0xe8   :  { %v3054_v42 = vpop.permute.xlu1 %513  ;;  %v3056_v43 = vpop.permute.xlu0 %511 }
  0xe9   :  { %6091 = vst [vmem:[#allocation34_spill] sm:$0xff] %v3054_v42  ;;  %6092 = vst [vmem:[#allocation35_spill] sm:$0xff] %v3056_v43 }
  0xea   :  { %629 = vrot.lane.b32.xlu1 %v256_v26, %s2450_s13  ;;  %627 = vrot.lane.b32.xlu0 %v255_v27, %s2450_s13  ;;  %v260_v26 = vld [vmem:[%s6056_s1 + $0x3c8] sm:$0xff]  ;;  %v259_v27 = vld [vmem:[%s6056_s1 + $0x3c0] sm:$0xff] }
  0xec   :  { %v3066_v11 = vpop.permute.xlu1 %517  ;;  %v3068_v10 = vpop.permute.xlu0 %515 }
  0xed   :  { %6093 = vst [vmem:[#allocation36_spill] sm:$0xff] %v3066_v11  ;;  %6094 = vst [vmem:[#allocation37_spill] sm:$0xff] %v3068_v10 }
  0xee   :  { %633 = vrot.lane.b32.xlu1 %v258_v58, %s2450_s13  ;;  %631 = vrot.lane.b32.xlu0 %v257_v59, %s2450_s13  ;;  %v262_v58 = vld [vmem:[%s6056_s1 + $0x3d8] sm:$0xff]  ;;  %v261_v59 = vld [vmem:[%s6056_s1 + $0x3d0] sm:$0xff] }
  0xf0   :  { %v3078_v43 = vpop.permute.xlu1 %521  ;;  %v3080_v42 = vpop.permute.xlu0 %519 }
  0xf1   :  { %6095 = vst [vmem:[#allocation38_spill] sm:$0xff] %v3078_v43  ;;  %6096 = vst [vmem:[#allocation39_spill] sm:$0xff] %v3080_v42 }
  0xf2   :  { %637 = vrot.lane.b32.xlu1 %v260_v26, %s2450_s13  ;;  %635 = vrot.lane.b32.xlu0 %v259_v27, %s2450_s13  ;;  %v264_v26 = vld [vmem:[%s6056_s1 + $0x3e8] sm:$0xff]  ;;  %v263_v27 = vld [vmem:[%s6056_s1 + $0x3e0] sm:$0xff] }
  0xf4   :  { %v3090_v10 = vpop.permute.xlu1 %525  ;;  %v3092_v11 = vpop.permute.xlu0 %523 }
  0xf5   :  { %6097 = vst [vmem:[#allocation40_spill] sm:$0xff] %v3090_v10  ;;  %6098 = vst [vmem:[#allocation41_spill] sm:$0xff] %v3092_v11 }
  0xf6   :  { %641 = vrot.lane.b32.xlu1 %v262_v58, %s2450_s13  ;;  %639 = vrot.lane.b32.xlu0 %v261_v59, %s2450_s13  ;;  %v266_v58 = vld [vmem:[%s6056_s1 + $0x3f8] sm:$0xff]  ;;  %v265_v59 = vld [vmem:[%s6056_s1 + $0x3f0] sm:$0xff] }
  0xf8   :  { %v3102_v42 = vpop.permute.xlu1 %529  ;;  %v3104_v43 = vpop.permute.xlu0 %527 }
  0xf9   :  { %6099 = vst [vmem:[#allocation42_spill] sm:$0xff] %v3102_v42  ;;  %6100 = vst [vmem:[#allocation43_spill] sm:$0xff] %v3104_v43  ;;  %v3132_v42 = vld [vmem:[%s6057_s0 + $0x8] sm:$0xff] }
  0xfa   :  { %645 = vrot.lane.b32.xlu1 %v264_v26, %s2450_s13  ;;  %643 = vrot.lane.b32.xlu0 %v263_v27, %s2450_s13  ;;  %v3127_v27 = vld [vmem:[%s6057_s0] sm:$0xff] }
  0xfc   :  { %v3114_v11 = vpop.permute.xlu1 %533  ;;  %v3116_v10 = vpop.permute.xlu0 %531 }
  0xfd   :  { %6101 = vst [vmem:[#allocation44_spill] sm:$0xff] %v3114_v11  ;;  %6102 = vst [vmem:[#allocation45_spill] sm:$0xff] %v3116_v10  ;;  %v15_v11 = vld [vmem:[%s6057_s0 + $0x20] sm:$0xff] }
  0xfe   :  { %649 = vrot.lane.b32.xlu1 %v266_v58, %s2450_s13  ;;  %647 = vrot.lane.b32.xlu0 %v265_v59, %s2450_s13 }
 0x100   :  { %v3120_v43 = vpop.permute.xlu1 %537  ;;  %v3122_v26 = vpop.permute.xlu0 %535 }
 0x101   :  { %6103 = vst [vmem:[#allocation46_spill] sm:$0xff] %v3120_v43  ;;  %6104 = vst [vmem:[#allocation47_spill] sm:$0xff] %v3122_v26  ;;  %v3145_v26 = vld [vmem:[%s6057_s0 + $0x10] sm:$0xff]  ;;  %v3150_v43 = vld [vmem:[%s6057_s0 + $0x18] sm:$0xff] }
 0x102   :  { %909 = vrot.lane.b32.xlu1 %v3132_v42, %s2451_s27  ;;  %907 = vrot.lane.b32.xlu0 %v3127_v27, %s2451_s27 }
 0x104   :  { %v3138_v58 = vpop.permute.xlu1 %541  ;;  %v3140_v59 = vpop.permute.xlu0 %539 }
 0x105   :  { %6105 = vst [vmem:[#allocation48_spill] sm:$0xff] %v3138_v58  ;;  %6106 = vst [vmem:[#allocation49_spill] sm:$0xff] %v3140_v59  ;;  %v16_v59 = vld [vmem:[%s6057_s0 + $0x28] sm:$0xff] }
 0x106   :  { %913 = vrot.lane.b32.xlu1 %v3150_v43, %s2451_s27  ;;  %911 = vrot.lane.b32.xlu0 %v3145_v26, %s2451_s27 }
 0x108   :  { %v3156_v10 = vpop.permute.xlu1 %545  ;;  %v3158_v58 = vpop.permute.xlu0 %543 }
 0x109   :  { %6107 = vst [vmem:[#allocation50_spill] sm:$0xff] %v3156_v10  ;;  %6108 = vst [vmem:[#allocation51_spill] sm:$0xff] %v3158_v58  ;;  %v18_v58 = vld [vmem:[%s6057_s0 + $0x38] sm:$0xff]  ;;  %v17_v10 = vld [vmem:[%s6057_s0 + $0x30] sm:$0xff] }
 0x10a   :  { %917 = vrot.lane.b32.xlu1 %v16_v59, %s2451_s27  ;;  %915 = vrot.lane.b32.xlu0 %v15_v11, %s2451_s27  ;;  %v20_v11 = vld [vmem:[%s6057_s0 + $0x48] sm:$0xff] }
 0x10c   :  { %v3168_v51 = vpop.permute.xlu1 %549  ;;  %v3170_v50 = vpop.permute.xlu0 %547 }
 0x10d   :  { %6109 = vst [vmem:[#allocation52_spill] sm:$0xff] %v3168_v51  ;;  %6110 = vst [vmem:[#allocation53_spill] sm:$0xff] %v3170_v50  ;;  %v19_v50 = vld [vmem:[%s6057_s0 + $0x40] sm:$0xff] }
 0x10e   :  { %921 = vrot.lane.b32.xlu1 %v18_v58, %s2451_s27  ;;  %919 = vrot.lane.b32.xlu0 %v17_v10, %s2451_s27  ;;  %v22_v10 = vld [vmem:[%s6057_s0 + $0x58] sm:$0xff] }
 0x110   :  { %v3180_v35 = vpop.permute.xlu1 %553  ;;  %v3182_v59 = vpop.permute.xlu0 %551 }
 0x111   :  { %6111 = vst [vmem:[#allocation54_spill] sm:$0xff] %v3180_v35  ;;  %6112 = vst [vmem:[#allocation55_spill] sm:$0xff] %v3182_v59  ;;  %v21_v59 = vld [vmem:[%s6057_s0 + $0x50] sm:$0xff] }
 0x112   :  { %925 = vrot.lane.b32.xlu1 %v20_v11, %s2451_s27  ;;  %923 = vrot.lane.b32.xlu0 %v19_v50, %s2451_s27  ;;  %v24_v50 = vld [vmem:[%s6057_s0 + $0x68] sm:$0xff] }
 0x114   :  { %v3192_v51 = vpop.permute.xlu1 %557  ;;  %v3194_v58 = vpop.permute.xlu0 %555 }
 0x115   :  { %6113 = vst [vmem:[#allocation56_spill] sm:$0xff] %v3192_v51  ;;  %6114 = vst [vmem:[#allocation57_spill] sm:$0xff] %v3194_v58  ;;  %v23_v58 = vld [vmem:[%s6057_s0 + $0x60] sm:$0xff] }
 0x116   :  { %929 = vrot.lane.b32.xlu1 %v22_v10, %s2451_s27  ;;  %927 = vrot.lane.b32.xlu0 %v21_v59, %s2451_s27  ;;  %v26_v59 = vld [vmem:[%s6057_s0 + $0x78] sm:$0xff] }
 0x118   :  { %v3204_v35 = vpop.permute.xlu1 %561  ;;  %v3206_v11 = vpop.permute.xlu0 %559 }
 0x119   :  { %6115 = vst [vmem:[#allocation58_spill] sm:$0xff] %v3204_v35  ;;  %6116 = vst [vmem:[#allocation59_spill] sm:$0xff] %v3206_v11  ;;  %v25_v11 = vld [vmem:[%s6057_s0 + $0x70] sm:$0xff] }
 0x11a   :  { %933 = vrot.lane.b32.xlu1 %v24_v50, %s2451_s27  ;;  %931 = vrot.lane.b32.xlu0 %v23_v58, %s2451_s27  ;;  %v28_v58 = vld [vmem:[%s6057_s0 + $0x88] sm:$0xff] }
 0x11c   :  { %v3216_v51 = vpop.permute.xlu1 %565  ;;  %v3218_v10 = vpop.permute.xlu0 %563 }
 0x11d   :  { %6117 = vst [vmem:[#allocation60_spill] sm:$0xff] %v3216_v51  ;;  %6118 = vst [vmem:[#allocation61_spill] sm:$0xff] %v3218_v10  ;;  %v27_v10 = vld [vmem:[%s6057_s0 + $0x80] sm:$0xff] }
 0x11e   :  { %937 = vrot.lane.b32.xlu1 %v26_v59, %s2451_s27  ;;  %935 = vrot.lane.b32.xlu0 %v25_v11, %s2451_s27  ;;  %v30_v11 = vld [vmem:[%s6057_s0 + $0x98] sm:$0xff] }
 0x120   :  { %v3228_v35 = vpop.permute.xlu1 %569  ;;  %v3230_v50 = vpop.permute.xlu0 %567 }
 0x121   :  { %6119 = vst [vmem:[#allocation62_spill] sm:$0xff] %v3228_v35  ;;  %6120 = vst [vmem:[#allocation63_spill] sm:$0xff] %v3230_v50  ;;  %v29_v50 = vld [vmem:[%s6057_s0 + $0x90] sm:$0xff] }
 0x122   :  { %941 = vrot.lane.b32.xlu1 %v28_v58, %s2451_s27  ;;  %939 = vrot.lane.b32.xlu0 %v27_v10, %s2451_s27  ;;  %v32_v10 = vld [vmem:[%s6057_s0 + $0xa8] sm:$0xff] }
 0x124   :  { %v3240_v51 = vpop.permute.xlu1 %573  ;;  %v3242_v59 = vpop.permute.xlu0 %571 }
 0x125   :  { %6121 = vst [vmem:[#allocation64_spill] sm:$0xff] %v3240_v51  ;;  %6122 = vst [vmem:[#allocation65_spill] sm:$0xff] %v3242_v59  ;;  %v31_v59 = vld [vmem:[%s6057_s0 + $0xa0] sm:$0xff] }
 0x126   :  { %945 = vrot.lane.b32.xlu1 %v30_v11, %s2451_s27  ;;  %943 = vrot.lane.b32.xlu0 %v29_v50, %s2451_s27  ;;  %v34_v50 = vld [vmem:[%s6057_s0 + $0xb8] sm:$0xff] }
 0x128   :  { %v3252_v35 = vpop.permute.xlu1 %577  ;;  %v3254_v58 = vpop.permute.xlu0 %575 }
 0x129   :  { %6123 = vst [vmem:[#allocation66_spill] sm:$0xff] %v3252_v35  ;;  %6124 = vst [vmem:[#allocation67_spill] sm:$0xff] %v3254_v58  ;;  %v33_v58 = vld [vmem:[%s6057_s0 + $0xb0] sm:$0xff] }
 0x12a   :  { %949 = vrot.lane.b32.xlu1 %v32_v10, %s2451_s27  ;;  %947 = vrot.lane.b32.xlu0 %v31_v59, %s2451_s27  ;;  %v36_v59 = vld [vmem:[%s6057_s0 + $0xc8] sm:$0xff] }
 0x12c   :  { %v3264_v51 = vpop.permute.xlu1 %581  ;;  %v3266_v11 = vpop.permute.xlu0 %579 }
 0x12d   :  { %6125 = vst [vmem:[#allocation68_spill] sm:$0xff] %v3264_v51  ;;  %6126 = vst [vmem:[#allocation69_spill] sm:$0xff] %v3266_v11  ;;  %v35_v11 = vld [vmem:[%s6057_s0 + $0xc0] sm:$0xff] }
 0x12e   :  { %953 = vrot.lane.b32.xlu1 %v34_v50, %s2451_s27  ;;  %951 = vrot.lane.b32.xlu0 %v33_v58, %s2451_s27  ;;  %v38_v58 = vld [vmem:[%s6057_s0 + $0xd8] sm:$0xff] }
 0x130   :  { %v3276_v35 = vpop.permute.xlu1 %585  ;;  %v3278_v10 = vpop.permute.xlu0 %583 }
 0x131   :  { %6127 = vst [vmem:[#allocation70_spill] sm:$0xff] %v3276_v35  ;;  %6128 = vst [vmem:[#allocation71_spill] sm:$0xff] %v3278_v10  ;;  %v37_v10 = vld [vmem:[%s6057_s0 + $0xd0] sm:$0xff] }
 0x132   :  { %957 = vrot.lane.b32.xlu1 %v36_v59, %s2451_s27  ;;  %955 = vrot.lane.b32.xlu0 %v35_v11, %s2451_s27  ;;  %v40_v11 = vld [vmem:[%s6057_s0 + $0xe8] sm:$0xff] }
 0x134   :  { %v3288_v51 = vpop.permute.xlu1 %589  ;;  %v3290_v50 = vpop.permute.xlu0 %587 }
 0x135   :  { %6129 = vst [vmem:[#allocation72_spill] sm:$0xff] %v3288_v51  ;;  %6130 = vst [vmem:[#allocation73_spill] sm:$0xff] %v3290_v50  ;;  %v39_v50 = vld [vmem:[%s6057_s0 + $0xe0] sm:$0xff] }
 0x136   :  { %961 = vrot.lane.b32.xlu1 %v38_v58, %s2451_s27  ;;  %959 = vrot.lane.b32.xlu0 %v37_v10, %s2451_s27  ;;  %v42_v10 = vld [vmem:[%s6057_s0 + $0xf8] sm:$0xff] }
 0x138   :  { %v3300_v35 = vpop.permute.xlu1 %593  ;;  %v3302_v59 = vpop.permute.xlu0 %591 }
 0x139   :  { %6131 = vst [vmem:[#allocation74_spill] sm:$0xff] %v3300_v35  ;;  %6132 = vst [vmem:[#allocation75_spill] sm:$0xff] %v3302_v59  ;;  %v41_v59 = vld [vmem:[%s6057_s0 + $0xf0] sm:$0xff] }
 0x13a   :  { %965 = vrot.lane.b32.xlu1 %v40_v11, %s2451_s27  ;;  %963 = vrot.lane.b32.xlu0 %v39_v50, %s2451_s27  ;;  %v44_v50 = vld [vmem:[%s6057_s0 + $0x108] sm:$0xff] }
 0x13c   :  { %v3312_v51 = vpop.permute.xlu1 %597  ;;  %v3314_v58 = vpop.permute.xlu0 %595 }
 0x13d   :  { %6133 = vst [vmem:[#allocation76_spill] sm:$0xff] %v3312_v51  ;;  %6134 = vst [vmem:[#allocation77_spill] sm:$0xff] %v3314_v58  ;;  %v43_v58 = vld [vmem:[%s6057_s0 + $0x100] sm:$0xff] }
 0x13e   :  { %969 = vrot.lane.b32.xlu1 %v42_v10, %s2451_s27  ;;  %967 = vrot.lane.b32.xlu0 %v41_v59, %s2451_s27  ;;  %v46_v59 = vld [vmem:[%s6057_s0 + $0x118] sm:$0xff] }
 0x140   :  { %v3324_v35 = vpop.permute.xlu1 %601  ;;  %v3326_v11 = vpop.permute.xlu0 %599 }
 0x141   :  { %6135 = vst [vmem:[#allocation78_spill] sm:$0xff] %v3324_v35  ;;  %6136 = vst [vmem:[#allocation79_spill] sm:$0xff] %v3326_v11  ;;  %v45_v11 = vld [vmem:[%s6057_s0 + $0x110] sm:$0xff] }
 0x142   :  { %973 = vrot.lane.b32.xlu1 %v44_v50, %s2451_s27  ;;  %971 = vrot.lane.b32.xlu0 %v43_v58, %s2451_s27  ;;  %v48_v58 = vld [vmem:[%s6057_s0 + $0x128] sm:$0xff] }
 0x144   :  { %v3336_v51 = vpop.permute.xlu1 %605  ;;  %v3338_v10 = vpop.permute.xlu0 %603 }
 0x145   :  { %6137 = vst [vmem:[#allocation80_spill] sm:$0xff] %v3336_v51  ;;  %6138 = vst [vmem:[#allocation81_spill] sm:$0xff] %v3338_v10  ;;  %v47_v10 = vld [vmem:[%s6057_s0 + $0x120] sm:$0xff] }
 0x146   :  { %977 = vrot.lane.b32.xlu1 %v46_v59, %s2451_s27  ;;  %975 = vrot.lane.b32.xlu0 %v45_v11, %s2451_s27  ;;  %v50_v11 = vld [vmem:[%s6057_s0 + $0x138] sm:$0xff] }
 0x148   :  { %v3348_v35 = vpop.permute.xlu1 %609  ;;  %v3350_v50 = vpop.permute.xlu0 %607 }
 0x149   :  { %6139 = vst [vmem:[#allocation82_spill] sm:$0xff] %v3348_v35  ;;  %6140 = vst [vmem:[#allocation83_spill] sm:$0xff] %v3350_v50  ;;  %v49_v50 = vld [vmem:[%s6057_s0 + $0x130] sm:$0xff] }
 0x14a   :  { %981 = vrot.lane.b32.xlu1 %v48_v58, %s2451_s27  ;;  %979 = vrot.lane.b32.xlu0 %v47_v10, %s2451_s27  ;;  %v52_v10 = vld [vmem:[%s6057_s0 + $0x148] sm:$0xff] }
 0x14c   :  { %v3360_v51 = vpop.permute.xlu1 %613  ;;  %v3362_v59 = vpop.permute.xlu0 %611 }
 0x14d   :  { %6141 = vst [vmem:[#allocation84_spill] sm:$0xff] %v3360_v51  ;;  %6142 = vst [vmem:[#allocation85_spill] sm:$0xff] %v3362_v59  ;;  %v51_v59 = vld [vmem:[%s6057_s0 + $0x140] sm:$0xff] }
 0x14e   :  { %985 = vrot.lane.b32.xlu1 %v50_v11, %s2451_s27  ;;  %983 = vrot.lane.b32.xlu0 %v49_v50, %s2451_s27  ;;  %v54_v50 = vld [vmem:[%s6057_s0 + $0x158] sm:$0xff] }
 0x150   :  { %v3372_v35 = vpop.permute.xlu1 %617  ;;  %v3374_v58 = vpop.permute.xlu0 %615 }
 0x151   :  { %6143 = vst [vmem:[#allocation86_spill] sm:$0xff] %v3372_v35  ;;  %6144 = vst [vmem:[#allocation87_spill] sm:$0xff] %v3374_v58  ;;  %v53_v58 = vld [vmem:[%s6057_s0 + $0x150] sm:$0xff] }
 0x152   :  { %989 = vrot.lane.b32.xlu1 %v52_v10, %s2451_s27  ;;  %987 = vrot.lane.b32.xlu0 %v51_v59, %s2451_s27  ;;  %v56_v59 = vld [vmem:[%s6057_s0 + $0x168] sm:$0xff] }
 0x154   :  { %v3384_v51 = vpop.permute.xlu1 %621  ;;  %v3386_v11 = vpop.permute.xlu0 %619 }
 0x155   :  { %6145 = vst [vmem:[#allocation88_spill] sm:$0xff] %v3384_v51  ;;  %6146 = vst [vmem:[#allocation89_spill] sm:$0xff] %v3386_v11  ;;  %v55_v11 = vld [vmem:[%s6057_s0 + $0x160] sm:$0xff] }
 0x156   :  { %993 = vrot.lane.b32.xlu1 %v54_v50, %s2451_s27  ;;  %991 = vrot.lane.b32.xlu0 %v53_v58, %s2451_s27  ;;  %v58_v58 = vld [vmem:[%s6057_s0 + $0x178] sm:$0xff] }
 0x158   :  { %v3396_v35 = vpop.permute.xlu1 %625  ;;  %v3398_v10 = vpop.permute.xlu0 %623 }
 0x159   :  { %6147 = vst [vmem:[#allocation90_spill] sm:$0xff] %v3396_v35  ;;  %6148 = vst [vmem:[#allocation91_spill] sm:$0xff] %v3398_v10  ;;  %v57_v10 = vld [vmem:[%s6057_s0 + $0x170] sm:$0xff] }
 0x15a   :  { %997 = vrot.lane.b32.xlu1 %v56_v59, %s2451_s27  ;;  %995 = vrot.lane.b32.xlu0 %v55_v11, %s2451_s27  ;;  %v60_v11 = vld [vmem:[%s6057_s0 + $0x188] sm:$0xff] }
 0x15c   :  { %v3408_v51 = vpop.permute.xlu1 %629  ;;  %v3410_v50 = vpop.permute.xlu0 %627 }
 0x15d   :  { %6149 = vst [vmem:[#allocation92_spill] sm:$0xff] %v3408_v51  ;;  %6150 = vst [vmem:[#allocation93_spill] sm:$0xff] %v3410_v50  ;;  %v59_v50 = vld [vmem:[%s6057_s0 + $0x180] sm:$0xff] }
 0x15e   :  { %1001 = vrot.lane.b32.xlu1 %v58_v58, %s2451_s27  ;;  %999 = vrot.lane.b32.xlu0 %v57_v10, %s2451_s27  ;;  %v62_v10 = vld [vmem:[%s6057_s0 + $0x198] sm:$0xff] }
 0x160   :  { %v3420_v35 = vpop.permute.xlu1 %633  ;;  %v3422_v59 = vpop.permute.xlu0 %631 }
 0x161   :  { %6151 = vst [vmem:[#allocation94_spill] sm:$0xff] %v3420_v35  ;;  %6152 = vst [vmem:[#allocation95_spill] sm:$0xff] %v3422_v59  ;;  %v61_v59 = vld [vmem:[%s6057_s0 + $0x190] sm:$0xff] }
 0x162   :  { %1005 = vrot.lane.b32.xlu1 %v60_v11, %s2451_s27  ;;  %1003 = vrot.lane.b32.xlu0 %v59_v50, %s2451_s27  ;;  %v64_v50 = vld [vmem:[%s6057_s0 + $0x1a8] sm:$0xff] }
 0x164   :  { %v3432_v51 = vpop.permute.xlu1 %637  ;;  %v3434_v58 = vpop.permute.xlu0 %635 }
 0x165   :  { %6153 = vst [vmem:[#allocation96_spill] sm:$0xff] %v3432_v51  ;;  %6154 = vst [vmem:[#allocation97_spill] sm:$0xff] %v3434_v58  ;;  %v63_v58 = vld [vmem:[%s6057_s0 + $0x1a0] sm:$0xff] }
 0x166   :  { %1009 = vrot.lane.b32.xlu1 %v62_v10, %s2451_s27  ;;  %1007 = vrot.lane.b32.xlu0 %v61_v59, %s2451_s27  ;;  %v66_v59 = vld [vmem:[%s6057_s0 + $0x1b8] sm:$0xff] }
 0x168   :  { %v3444_v35 = vpop.permute.xlu1 %641  ;;  %v3446_v11 = vpop.permute.xlu0 %639 }
 0x169   :  { %6155 = vst [vmem:[#allocation98_spill] sm:$0xff] %v3444_v35  ;;  %6156 = vst [vmem:[#allocation99_spill] sm:$0xff] %v3446_v11  ;;  %v65_v11 = vld [vmem:[%s6057_s0 + $0x1b0] sm:$0xff] }
 0x16a   :  { %1013 = vrot.lane.b32.xlu1 %v64_v50, %s2451_s27  ;;  %1011 = vrot.lane.b32.xlu0 %v63_v58, %s2451_s27  ;;  %v68_v58 = vld [vmem:[%s6057_s0 + $0x1c8] sm:$0xff] }
 0x16c   :  { %v3456_v51 = vpop.permute.xlu1 %645  ;;  %v3458_v10 = vpop.permute.xlu0 %643 }
 0x16d   :  { %6157 = vst [vmem:[#allocation100_spill] sm:$0xff] %v3456_v51  ;;  %6158 = vst [vmem:[#allocation101_spill] sm:$0xff] %v3458_v10  ;;  %v67_v10 = vld [vmem:[%s6057_s0 + $0x1c0] sm:$0xff] }
 0x16e   :  { %1017 = vrot.lane.b32.xlu1 %v66_v59, %s2451_s27  ;;  %1015 = vrot.lane.b32.xlu0 %v65_v11, %s2451_s27  ;;  %v70_v11 = vld [vmem:[%s6057_s0 + $0x1d8] sm:$0xff] }
 0x170   :  { %v3468_v35 = vpop.permute.xlu1 %649  ;;  %v3470_v50 = vpop.permute.xlu0 %647 }
 0x171   :  { %6159 = vst [vmem:[#allocation102_spill] sm:$0xff] %v3468_v35  ;;  %6160 = vst [vmem:[#allocation103_spill] sm:$0xff] %v3470_v50  ;;  %v69_v50 = vld [vmem:[%s6057_s0 + $0x1d0] sm:$0xff] }
 0x172   :  { %1021 = vrot.lane.b32.xlu1 %v68_v58, %s2451_s27  ;;  %1019 = vrot.lane.b32.xlu0 %v67_v10, %s2451_s27  ;;  %v72_v10 = vld [vmem:[%s6057_s0 + $0x1e8] sm:$0xff] }
 0x174   :  { %v3480_v51 = vpop.permute.xlu1 %909  ;;  %v3482_v59 = vpop.permute.xlu0 %907 }
 0x176   :  { %1025 = vrot.lane.b32.xlu1 %v70_v11, %s2451_s27  ;;  %1023 = vrot.lane.b32.xlu0 %v69_v50, %s2451_s27  ;;  %v74_v50 = vld [vmem:[%s6057_s0 + $0x1f8] sm:$0xff] }
 0x178   :  { %v3492_v35 = vpop.permute.xlu1 %913  ;;  %v3494_v58 = vpop.permute.xlu0 %911 }
 0x17a   :  { %1029 = vrot.lane.b32.xlu1 %v72_v10, %s2451_s27  ;;  %1027 = vrot.lane.b32.xlu0 %v71_v34, %s2451_s27  ;;  %v76_v34 = vld [vmem:[%s6057_s0 + $0x208] sm:$0xff] }
 0x17c   :  { %v3504_v19 = vpop.permute.xlu1 %917  ;;  %v3506_v11 = vpop.permute.xlu0 %915 }
 0x17e   :  { %1033 = vrot.lane.b32.xlu1 %v74_v50, %s2451_s27  ;;  %1031 = vrot.lane.b32.xlu0 %v73_v18, %s2451_s27  ;;  %v78_v18 = vld [vmem:[%s6057_s0 + $0x218] sm:$0xff] }
 0x180   :  { %v3516_v3 = vpop.permute.xlu1 %921  ;;  %v3518_v10 = vpop.permute.xlu0 %919 }
 0x182   :  { %1037 = vrot.lane.b32.xlu1 %v76_v34, %s2451_s27  ;;  %1035 = vrot.lane.b32.xlu0 %v75_v2, %s2451_s27  ;;  %v80_v2 = vld [vmem:[%s6057_s0 + $0x228] sm:$0xff] }
 0x184   :  { %v3528_v55 = vpop.permute.xlu1 %925  ;;  %v3530_v50 = vpop.permute.xlu0 %923 }
 0x186   :  { %1041 = vrot.lane.b32.xlu1 %v78_v18, %s2451_s27  ;;  %1039 = vrot.lane.b32.xlu0 %v77_v54, %s2451_s27  ;;  %v82_v54 = vld [vmem:[%s6057_s0 + $0x238] sm:$0xff] }
 0x188   :  { %v3540_v47 = vpop.permute.xlu1 %929  ;;  %v3542_v34 = vpop.permute.xlu0 %927 }
 0x18a   :  { %1045 = vrot.lane.b32.xlu1 %v80_v2, %s2451_s27  ;;  %1043 = vrot.lane.b32.xlu0 %v79_v46, %s2451_s27  ;;  %v84_v46 = vld [vmem:[%s6057_s0 + $0x248] sm:$0xff] }
 0x18c   :  { %v3552_v39 = vpop.permute.xlu1 %933  ;;  %v3554_v18 = vpop.permute.xlu0 %931 }
 0x18e   :  { %1049 = vrot.lane.b32.xlu1 %v82_v54, %s2451_s27  ;;  %1047 = vrot.lane.b32.xlu0 %v81_v38, %s2451_s27  ;;  %v86_v38 = vld [vmem:[%s6057_s0 + $0x258] sm:$0xff] }
 0x190   :  { %v3564_v31 = vpop.permute.xlu1 %937  ;;  %v3566_v2 = vpop.permute.xlu0 %935 }
 0x192   :  { %1053 = vrot.lane.b32.xlu1 %v84_v46, %s2451_s27  ;;  %1051 = vrot.lane.b32.xlu0 %v83_v30, %s2451_s27  ;;  %v88_v30 = vld [vmem:[%s6057_s0 + $0x268] sm:$0xff] }
 0x194   :  { %v3576_v23 = vpop.permute.xlu1 %941  ;;  %v3578_v54 = vpop.permute.xlu0 %939 }
 0x196   :  { %1057 = vrot.lane.b32.xlu1 %v86_v38, %s2451_s27  ;;  %1055 = vrot.lane.b32.xlu0 %v85_v22, %s2451_s27  ;;  %v90_v22 = vld [vmem:[%s6057_s0 + $0x278] sm:$0xff] }
 0x198   :  { %v3588_v15 = vpop.permute.xlu1 %945  ;;  %v3590_v46 = vpop.permute.xlu0 %943 }
 0x19a   :  { %1061 = vrot.lane.b32.xlu1 %v88_v30, %s2451_s27  ;;  %1059 = vrot.lane.b32.xlu0 %v87_v14, %s2451_s27  ;;  %v92_v14 = vld [vmem:[%s6057_s0 + $0x288] sm:$0xff] }
 0x19c   :  { %v3600_v7 = vpop.permute.xlu1 %949  ;;  %v3602_v38 = vpop.permute.xlu0 %947 }
 0x19e   :  { %1065 = vrot.lane.b32.xlu1 %v90_v22, %s2451_s27  ;;  %1063 = vrot.lane.b32.xlu0 %v89_v6, %s2451_s27  ;;  %v94_v6 = vld [vmem:[%s6057_s0 + $0x298] sm:$0xff] }
 0x1a0   :  { %v3612_v63 = vpop.permute.xlu1 %953  ;;  %v3614_v30 = vpop.permute.xlu0 %951 }
 0x1a2   :  { %1069 = vrot.lane.b32.xlu1 %v92_v14, %s2451_s27  ;;  %1067 = vrot.lane.b32.xlu0 %v91_v62, %s2451_s27  ;;  %v96_v62 = vld [vmem:[%s6057_s0 + $0x2a8] sm:$0xff] }
 0x1a4   :  { %v3624_v57 = vpop.permute.xlu1 %957  ;;  %v3626_v22 = vpop.permute.xlu0 %955 }
 0x1a6   :  { %1073 = vrot.lane.b32.xlu1 %v94_v6, %s2451_s27  ;;  %1071 = vrot.lane.b32.xlu0 %v93_v56, %s2451_s27  ;;  %v98_v56 = vld [vmem:[%s6057_s0 + $0x2b8] sm:$0xff] }
 0x1a8   :  { %v3636_v53 = vpop.permute.xlu1 %961  ;;  %v3638_v14 = vpop.permute.xlu0 %959 }
 0x1a9   :  { %6161 = vst [vmem:[#allocation104_spill] sm:$0xff] %v3636_v53  ;;  %6162 = vst [vmem:[#allocation105_spill] sm:$0xff] %v3638_v14  ;;  %v97_v14 = vld [vmem:[%s6057_s0 + $0x2b0] sm:$0xff] }
 0x1aa   :  { %1077 = vrot.lane.b32.xlu1 %v96_v62, %s2451_s27  ;;  %1075 = vrot.lane.b32.xlu0 %v95_v52, %s2451_s27  ;;  %v100_v52 = vld [vmem:[%s6057_s0 + $0x2c8] sm:$0xff] }
 0x1ac   :  { %v3648_v49 = vpop.permute.xlu1 %965  ;;  %v3650_v6 = vpop.permute.xlu0 %963 }
 0x1ad   :  { %6163 = vst [vmem:[#allocation106_spill] sm:$0xff] %v3648_v49  ;;  %6164 = vst [vmem:[#allocation107_spill] sm:$0xff] %v3650_v6  ;;  %v99_v6 = vld [vmem:[%s6057_s0 + $0x2c0] sm:$0xff] }
 0x1ae   :  { %1081 = vrot.lane.b32.xlu1 %v98_v56, %s2451_s27  ;;  %1079 = vrot.lane.b32.xlu0 %v97_v14, %s2451_s27  ;;  %v102_v14 = vld [vmem:[%s6057_s0 + $0x2d8] sm:$0xff] }
 0x1b0   :  { %v3660_v53 = vpop.permute.xlu1 %969  ;;  %v3662_v62 = vpop.permute.xlu0 %967 }
 0x1b1   :  { %6165 = vst [vmem:[#allocation108_spill] sm:$0xff] %v3660_v53  ;;  %6166 = vst [vmem:[#allocation109_spill] sm:$0xff] %v3662_v62  ;;  %v101_v62 = vld [vmem:[%s6057_s0 + $0x2d0] sm:$0xff] }
 0x1b2   :  { %1085 = vrot.lane.b32.xlu1 %v100_v52, %s2451_s27  ;;  %1083 = vrot.lane.b32.xlu0 %v99_v6, %s2451_s27  ;;  %v104_v6 = vld [vmem:[%s6057_s0 + $0x2e8] sm:$0xff] }
 0x1b4   :  { %v3672_v49 = vpop.permute.xlu1 %973  ;;  %v3674_v56 = vpop.permute.xlu0 %971 }
 0x1b5   :  { %6167 = vst [vmem:[#allocation110_spill] sm:$0xff] %v3672_v49  ;;  %6168 = vst [vmem:[#allocation111_spill] sm:$0xff] %v3674_v56  ;;  %v103_v56 = vld [vmem:[%s6057_s0 + $0x2e0] sm:$0xff] }
 0x1b6   :  { %1089 = vrot.lane.b32.xlu1 %v102_v14, %s2451_s27  ;;  %1087 = vrot.lane.b32.xlu0 %v101_v62, %s2451_s27  ;;  %v106_v62 = vld [vmem:[%s6057_s0 + $0x2f8] sm:$0xff] }
 0x1b8   :  { %v3684_v53 = vpop.permute.xlu1 %977  ;;  %v3686_v52 = vpop.permute.xlu0 %975 }
 0x1b9   :  { %6169 = vst [vmem:[#allocation112_spill] sm:$0xff] %v3684_v53  ;;  %6170 = vst [vmem:[#allocation113_spill] sm:$0xff] %v3686_v52  ;;  %v105_v52 = vld [vmem:[%s6057_s0 + $0x2f0] sm:$0xff] }
 0x1ba   :  { %1093 = vrot.lane.b32.xlu1 %v104_v6, %s2451_s27  ;;  %1091 = vrot.lane.b32.xlu0 %v103_v56, %s2451_s27  ;;  %v108_v56 = vld [vmem:[%s6057_s0 + $0x308] sm:$0xff] }
 0x1bc   :  { %v3696_v49 = vpop.permute.xlu1 %981  ;;  %v3698_v14 = vpop.permute.xlu0 %979 }
 0x1bd   :  { %6171 = vst [vmem:[#allocation114_spill] sm:$0xff] %v3696_v49  ;;  %6172 = vst [vmem:[#allocation115_spill] sm:$0xff] %v3698_v14  ;;  %v107_v14 = vld [vmem:[%s6057_s0 + $0x300] sm:$0xff] }
 0x1be   :  { %1097 = vrot.lane.b32.xlu1 %v106_v62, %s2451_s27  ;;  %1095 = vrot.lane.b32.xlu0 %v105_v52, %s2451_s27  ;;  %v110_v52 = vld [vmem:[%s6057_s0 + $0x318] sm:$0xff] }
 0x1c0   :  { %v3708_v53 = vpop.permute.xlu1 %985  ;;  %v3710_v6 = vpop.permute.xlu0 %983 }
 0x1c1   :  { %6173 = vst [vmem:[#allocation116_spill] sm:$0xff] %v3708_v53  ;;  %6174 = vst [vmem:[#allocation117_spill] sm:$0xff] %v3710_v6  ;;  %v109_v6 = vld [vmem:[%s6057_s0 + $0x310] sm:$0xff] }
 0x1c2   :  { %1101 = vrot.lane.b32.xlu1 %v108_v56, %s2451_s27  ;;  %1099 = vrot.lane.b32.xlu0 %v107_v14, %s2451_s27  ;;  %v112_v14 = vld [vmem:[%s6057_s0 + $0x328] sm:$0xff] }
 0x1c4   :  { %v3720_v49 = vpop.permute.xlu1 %989  ;;  %v3722_v62 = vpop.permute.xlu0 %987 }
 0x1c5   :  { %6175 = vst [vmem:[#allocation118_spill] sm:$0xff] %v3720_v49  ;;  %6176 = vst [vmem:[#allocation119_spill] sm:$0xff] %v3722_v62  ;;  %v111_v62 = vld [vmem:[%s6057_s0 + $0x320] sm:$0xff] }
 0x1c6   :  { %1105 = vrot.lane.b32.xlu1 %v110_v52, %s2451_s27  ;;  %1103 = vrot.lane.b32.xlu0 %v109_v6, %s2451_s27  ;;  %v114_v6 = vld [vmem:[%s6057_s0 + $0x338] sm:$0xff] }
 0x1c8   :  { %v3732_v53 = vpop.permute.xlu1 %993  ;;  %v3734_v56 = vpop.permute.xlu0 %991 }
 0x1c9   :  { %6177 = vst [vmem:[#allocation120_spill] sm:$0xff] %v3732_v53  ;;  %6178 = vst [vmem:[#allocation121_spill] sm:$0xff] %v3734_v56  ;;  %v113_v56 = vld [vmem:[%s6057_s0 + $0x330] sm:$0xff] }
 0x1ca   :  { %1109 = vrot.lane.b32.xlu1 %v112_v14, %s2451_s27  ;;  %1107 = vrot.lane.b32.xlu0 %v111_v62, %s2451_s27  ;;  %v116_v62 = vld [vmem:[%s6057_s0 + $0x348] sm:$0xff] }
 0x1cc   :  { %v3744_v49 = vpop.permute.xlu1 %997  ;;  %v3746_v52 = vpop.permute.xlu0 %995 }
 0x1cd   :  { %6179 = vst [vmem:[#allocation122_spill] sm:$0xff] %v3744_v49  ;;  %6180 = vst [vmem:[#allocation123_spill] sm:$0xff] %v3746_v52  ;;  %v115_v52 = vld [vmem:[%s6057_s0 + $0x340] sm:$0xff] }
 0x1ce   :  { %1113 = vrot.lane.b32.xlu1 %v114_v6, %s2451_s27  ;;  %1111 = vrot.lane.b32.xlu0 %v113_v56, %s2451_s27  ;;  %v118_v56 = vld [vmem:[%s6057_s0 + $0x358] sm:$0xff] }
 0x1d0   :  { %v3756_v53 = vpop.permute.xlu1 %1001  ;;  %v3758_v14 = vpop.permute.xlu0 %999 }
 0x1d1   :  { %6181 = vst [vmem:[#allocation124_spill] sm:$0xff] %v3756_v53  ;;  %6182 = vst [vmem:[#allocation125_spill] sm:$0xff] %v3758_v14  ;;  %v117_v14 = vld [vmem:[%s6057_s0 + $0x350] sm:$0xff] }
 0x1d2   :  { %1117 = vrot.lane.b32.xlu1 %v116_v62, %s2451_s27  ;;  %1115 = vrot.lane.b32.xlu0 %v115_v52, %s2451_s27  ;;  %v120_v52 = vld [vmem:[%s6057_s0 + $0x368] sm:$0xff] }
 0x1d4   :  { %v3768_v49 = vpop.permute.xlu1 %1005  ;;  %v3770_v6 = vpop.permute.xlu0 %1003 }
 0x1d5   :  { %6183 = vst [vmem:[#allocation126_spill] sm:$0xff] %v3768_v49  ;;  %6184 = vst [vmem:[#allocation127_spill] sm:$0xff] %v3770_v6  ;;  %v119_v6 = vld [vmem:[%s6057_s0 + $0x360] sm:$0xff] }
 0x1d6   :  { %1121 = vrot.lane.b32.xlu1 %v118_v56, %s2451_s27  ;;  %1119 = vrot.lane.b32.xlu0 %v117_v14, %s2451_s27  ;;  %v122_v14 = vld [vmem:[%s6057_s0 + $0x378] sm:$0xff] }
 0x1d8   :  { %v3780_v53 = vpop.permute.xlu1 %1009  ;;  %v3782_v62 = vpop.permute.xlu0 %1007 }
 0x1d9   :  { %6185 = vst [vmem:[#allocation128_spill] sm:$0xff] %v3780_v53  ;;  %6186 = vst [vmem:[#allocation129_spill] sm:$0xff] %v3782_v62  ;;  %v121_v62 = vld [vmem:[%s6057_s0 + $0x370] sm:$0xff] }
 0x1da   :  { %1125 = vrot.lane.b32.xlu1 %v120_v52, %s2451_s27  ;;  %1123 = vrot.lane.b32.xlu0 %v119_v6, %s2451_s27  ;;  %v124_v6 = vld [vmem:[%s6057_s0 + $0x388] sm:$0xff] }
 0x1dc   :  { %v3792_v49 = vpop.permute.xlu1 %1013  ;;  %v3794_v56 = vpop.permute.xlu0 %1011 }
 0x1dd   :  { %6187 = vst [vmem:[#allocation130_spill] sm:$0xff] %v3792_v49  ;;  %6188 = vst [vmem:[#allocation131_spill] sm:$0xff] %v3794_v56  ;;  %v123_v56 = vld [vmem:[%s6057_s0 + $0x380] sm:$0xff] }
 0x1de   :  { %1129 = vrot.lane.b32.xlu1 %v122_v14, %s2451_s27  ;;  %1127 = vrot.lane.b32.xlu0 %v121_v62, %s2451_s27  ;;  %v126_v62 = vld [vmem:[%s6057_s0 + $0x398] sm:$0xff] }
 0x1e0   :  { %v3804_v53 = vpop.permute.xlu1 %1017  ;;  %v3806_v52 = vpop.permute.xlu0 %1015 }
 0x1e1   :  { %6189 = vst [vmem:[#allocation132_spill] sm:$0xff] %v3804_v53  ;;  %6190 = vst [vmem:[#allocation133_spill] sm:$0xff] %v3806_v52  ;;  %v125_v52 = vld [vmem:[%s6057_s0 + $0x390] sm:$0xff] }
 0x1e2   :  { %1133 = vrot.lane.b32.xlu1 %v124_v6, %s2451_s27  ;;  %1131 = vrot.lane.b32.xlu0 %v123_v56, %s2451_s27  ;;  %v128_v56 = vld [vmem:[%s6057_s0 + $0x3a8] sm:$0xff] }
 0x1e4   :  { %v3816_v49 = vpop.permute.xlu1 %1021  ;;  %v3818_v14 = vpop.permute.xlu0 %1019 }
 0x1e5   :  { %6191 = vst [vmem:[#allocation134_spill] sm:$0xff] %v3816_v49  ;;  %6192 = vst [vmem:[#allocation135_spill] sm:$0xff] %v3818_v14  ;;  %v127_v14 = vld [vmem:[%s6057_s0 + $0x3a0] sm:$0xff] }
 0x1e6   :  { %1137 = vrot.lane.b32.xlu1 %v126_v62, %s2451_s27  ;;  %1135 = vrot.lane.b32.xlu0 %v125_v52, %s2451_s27  ;;  %v130_v52 = vld [vmem:[%s6057_s0 + $0x3b8] sm:$0xff] }
 0x1e8   :  { %v3828_v53 = vpop.permute.xlu1 %1025  ;;  %v3830_v6 = vpop.permute.xlu0 %1023 }
 0x1e9   :  { %6193 = vst [vmem:[#allocation136_spill] sm:$0xff] %v3828_v53  ;;  %6194 = vst [vmem:[#allocation137_spill] sm:$0xff] %v3830_v6  ;;  %v129_v6 = vld [vmem:[%s6057_s0 + $0x3b0] sm:$0xff] }
 0x1ea   :  { %1141 = vrot.lane.b32.xlu1 %v128_v56, %s2451_s27  ;;  %1139 = vrot.lane.b32.xlu0 %v127_v14, %s2451_s27  ;;  %v132_v14 = vld [vmem:[%s6057_s0 + $0x3c8] sm:$0xff] }
 0x1ec   :  { %v3840_v49 = vpop.permute.xlu1 %1029  ;;  %v3842_v62 = vpop.permute.xlu0 %1027 }
 0x1ed   :  { %6195 = vst [vmem:[#allocation138_spill] sm:$0xff] %v3840_v49  ;;  %6196 = vst [vmem:[#allocation139_spill] sm:$0xff] %v3842_v62  ;;  %v131_v62 = vld [vmem:[%s6057_s0 + $0x3c0] sm:$0xff] }
 0x1ee   :  { %1145 = vrot.lane.b32.xlu1 %v130_v52, %s2451_s27  ;;  %1143 = vrot.lane.b32.xlu0 %v129_v6, %s2451_s27  ;;  %v134_v6 = vld [vmem:[%s6057_s0 + $0x3d8] sm:$0xff] }
 0x1f0   :  { %v3852_v53 = vpop.permute.xlu1 %1033  ;;  %v3854_v56 = vpop.permute.xlu0 %1031 }
 0x1f1   :  { %6197 = vst [vmem:[#allocation140_spill] sm:$0xff] %v3852_v53  ;;  %6198 = vst [vmem:[#allocation141_spill] sm:$0xff] %v3854_v56  ;;  %v133_v56 = vld [vmem:[%s6057_s0 + $0x3d0] sm:$0xff] }
 0x1f2   :  { %1149 = vrot.lane.b32.xlu1 %v132_v14, %s2451_s27  ;;  %1147 = vrot.lane.b32.xlu0 %v131_v62, %s2451_s27  ;;  %v136_v62 = vld [vmem:[%s6057_s0 + $0x3e8] sm:$0xff] }
 0x1f4   :  { %v3864_v49 = vpop.permute.xlu1 %1037  ;;  %v3866_v52 = vpop.permute.xlu0 %1035 }
 0x1f5   :  { %6199 = vst [vmem:[#allocation142_spill] sm:$0xff] %v3864_v49  ;;  %6200 = vst [vmem:[#allocation143_spill] sm:$0xff] %v3866_v52  ;;  %v135_v52 = vld [vmem:[%s6057_s0 + $0x3e0] sm:$0xff] }
 0x1f6   :  { %1153 = vrot.lane.b32.xlu1 %v134_v6, %s2451_s27  ;;  %1151 = vrot.lane.b32.xlu0 %v133_v56, %s2451_s27  ;;  %v138_v56 = vld [vmem:[%s6057_s0 + $0x3f8] sm:$0xff] }
 0x1f8   :  { %v3876_v53 = vpop.permute.xlu1 %1041  ;;  %v3878_v14 = vpop.permute.xlu0 %1039 }
 0x1f9   :  { %6201 = vst [vmem:[#allocation144_spill] sm:$0xff] %v3876_v53  ;;  %6202 = vst [vmem:[#allocation145_spill] sm:$0xff] %v3878_v14  ;;  %v137_v14 = vld [vmem:[%s6057_s0 + $0x3f0] sm:$0xff] }
 0x1fa   :  { %1157 = vrot.lane.b32.xlu1 %v136_v62, %s2451_s27  ;;  %1155 = vrot.lane.b32.xlu0 %v135_v52, %s2451_s27  ;;  %v2198_v52 = vld [vmem:[%s6056_s1 + $0x8] sm:$0xff] }
 0x1fc   :  { %v3888_v49 = vpop.permute.xlu1 %1045  ;;  %v3890_v6 = vpop.permute.xlu0 %1043 }
 0x1fd   :  { %6203 = vst [vmem:[#allocation146_spill] sm:$0xff] %v3888_v49  ;;  %6204 = vst [vmem:[#allocation147_spill] sm:$0xff] %v3890_v6  ;;  %v2199_v6 = vld [vmem:[%s6056_s1] sm:$0xff] }
 0x1fe   :  { %1161 = vrot.lane.b32.xlu1 %v138_v56, %s2451_s27  ;;  %1159 = vrot.lane.b32.xlu0 %v137_v14, %s2451_s27 }
 0x200   :  { %v3900_v53 = vpop.permute.xlu1 %1049  ;;  %v3902_v62 = vpop.permute.xlu0 %1047 }
 0x201   :  { %6205 = vst [vmem:[#allocation148_spill] sm:$0xff] %v3900_v53  ;;  %6206 = vst [vmem:[#allocation149_spill] sm:$0xff] %v3902_v62  ;;  %v2200_v62 = vld [vmem:[%s6056_s1 + $0x18] sm:$0xff] }
 0x202   :  { %1293 = vrot.lane.b32.xlu1 %v2198_v52, %s2452_s10  ;;  %1291 = vrot.lane.b32.xlu0 %v2199_v6, %s2452_s10  ;;  %v2201_v52 = vld [vmem:[%s6056_s1 + $0x10] sm:$0xff]  ;;  %v2202_v6 = vld [vmem:[%s6056_s1 + $0x28] sm:$0xff] }
 0x204   :  { %v3912_v56 = vpop.permute.xlu1 %1053  ;;  %v3914_v14 = vpop.permute.xlu0 %1051 }
 0x205   :  { %6207 = vst [vmem:[#allocation150_spill] sm:$0xff] %v3912_v56  ;;  %6208 = vst [vmem:[#allocation151_spill] sm:$0xff] %v3914_v14 }
 0x206   :  { %1297 = vrot.lane.b32.xlu1 %v2200_v62, %s2452_s10  ;;  %1295 = vrot.lane.b32.xlu0 %v2201_v52, %s2452_s10  ;;  %v2203_v62 = vld [vmem:[%s6056_s1 + $0x20] sm:$0xff]  ;;  %v2204_v52 = vld [vmem:[%s6056_s1 + $0x38] sm:$0xff] }
 0x208   :  { %v3924_v53 = vpop.permute.xlu1 %1057  ;;  %v3926_v49 = vpop.permute.xlu0 %1055 }
 0x209   :  { %6209 = vst [vmem:[#allocation152_spill] sm:$0xff] %v3924_v53  ;;  %6210 = vst [vmem:[#allocation153_spill] sm:$0xff] %v3926_v49 }
 0x20a   :  { %1301 = vrot.lane.b32.xlu1 %v2202_v6, %s2452_s10  ;;  %1299 = vrot.lane.b32.xlu0 %v2203_v62, %s2452_s10  ;;  %v2205_v6 = vld [vmem:[%s6056_s1 + $0x30] sm:$0xff]  ;;  %v2206_v62 = vld [vmem:[%s6056_s1 + $0x48] sm:$0xff] }
 0x20c   :  { %v3936_v14 = vpop.permute.xlu1 %1061  ;;  %v3938_v56 = vpop.permute.xlu0 %1059 }
 0x20d   :  { %6211 = vst [vmem:[#allocation154_spill] sm:$0xff] %v3936_v14  ;;  %6212 = vst [vmem:[#allocation155_spill] sm:$0xff] %v3938_v56 }
 0x20e   :  { %1305 = vrot.lane.b32.xlu1 %v2204_v52, %s2452_s10  ;;  %1303 = vrot.lane.b32.xlu0 %v2205_v6, %s2452_s10  ;;  %v2207_v52 = vld [vmem:[%s6056_s1 + $0x40] sm:$0xff]  ;;  %v2208_v6 = vld [vmem:[%s6056_s1 + $0x58] sm:$0xff] }
 0x210   :  { %v3948_v49 = vpop.permute.xlu1 %1065  ;;  %v3950_v53 = vpop.permute.xlu0 %1063 }
 0x211   :  { %6213 = vst [vmem:[#allocation156_spill] sm:$0xff] %v3948_v49  ;;  %6214 = vst [vmem:[#allocation157_spill] sm:$0xff] %v3950_v53 }
 0x212   :  { %1309 = vrot.lane.b32.xlu1 %v2206_v62, %s2452_s10  ;;  %1307 = vrot.lane.b32.xlu0 %v2207_v52, %s2452_s10  ;;  %v2209_v62 = vld [vmem:[%s6056_s1 + $0x50] sm:$0xff]  ;;  %v2210_v52 = vld [vmem:[%s6056_s1 + $0x68] sm:$0xff] }
 0x214   :  { %v3960_v56 = vpop.permute.xlu1 %1069  ;;  %v3962_v14 = vpop.permute.xlu0 %1067 }
 0x215   :  { %6215 = vst [vmem:[#allocation158_spill] sm:$0xff] %v3960_v56  ;;  %6216 = vst [vmem:[#allocation159_spill] sm:$0xff] %v3962_v14 }
 0x216   :  { %1313 = vrot.lane.b32.xlu1 %v2208_v6, %s2452_s10  ;;  %1311 = vrot.lane.b32.xlu0 %v2209_v62, %s2452_s10  ;;  %v2211_v6 = vld [vmem:[%s6056_s1 + $0x60] sm:$0xff]  ;;  %v2212_v62 = vld [vmem:[%s6056_s1 + $0x78] sm:$0xff] }
 0x218   :  { %v3972_v53 = vpop.permute.xlu1 %1073  ;;  %v3974_v49 = vpop.permute.xlu0 %1071 }
 0x219   :  { %6217 = vst [vmem:[#allocation160_spill] sm:$0xff] %v3972_v53  ;;  %6218 = vst [vmem:[#allocation161_spill] sm:$0xff] %v3974_v49 }
 0x21a   :  { %1317 = vrot.lane.b32.xlu1 %v2210_v52, %s2452_s10  ;;  %1315 = vrot.lane.b32.xlu0 %v2211_v6, %s2452_s10  ;;  %v2213_v52 = vld [vmem:[%s6056_s1 + $0x70] sm:$0xff]  ;;  %v2214_v6 = vld [vmem:[%s6056_s1 + $0x88] sm:$0xff] }
 0x21c   :  { %v3984_v14 = vpop.permute.xlu1 %1077  ;;  %v3986_v56 = vpop.permute.xlu0 %1075 }
 0x21d   :  { %6219 = vst [vmem:[#allocation162_spill] sm:$0xff] %v3984_v14  ;;  %6220 = vst [vmem:[#allocation163_spill] sm:$0xff] %v3986_v56 }
 0x21e   :  { %1321 = vrot.lane.b32.xlu1 %v2212_v62, %s2452_s10  ;;  %1319 = vrot.lane.b32.xlu0 %v2213_v52, %s2452_s10  ;;  %v2215_v62 = vld [vmem:[%s6056_s1 + $0x80] sm:$0xff]  ;;  %v2216_v52 = vld [vmem:[%s6056_s1 + $0x98] sm:$0xff] }
 0x220   :  { %v3996_v49 = vpop.permute.xlu1 %1081  ;;  %v3998_v53 = vpop.permute.xlu0 %1079 }
 0x221   :  { %6221 = vst [vmem:[#allocation164_spill] sm:$0xff] %v3996_v49  ;;  %6222 = vst [vmem:[#allocation165_spill] sm:$0xff] %v3998_v53 }
 0x222   :  { %1325 = vrot.lane.b32.xlu1 %v2214_v6, %s2452_s10  ;;  %1323 = vrot.lane.b32.xlu0 %v2215_v62, %s2452_s10  ;;  %v2217_v6 = vld [vmem:[%s6056_s1 + $0x90] sm:$0xff]  ;;  %v2218_v62 = vld [vmem:[%s6056_s1 + $0xa8] sm:$0xff] }
 0x224   :  { %v4008_v56 = vpop.permute.xlu1 %1085  ;;  %v4010_v14 = vpop.permute.xlu0 %1083 }
 0x225   :  { %6223 = vst [vmem:[#allocation166_spill] sm:$0xff] %v4008_v56  ;;  %6224 = vst [vmem:[#allocation167_spill] sm:$0xff] %v4010_v14 }
 0x226   :  { %1329 = vrot.lane.b32.xlu1 %v2216_v52, %s2452_s10  ;;  %1327 = vrot.lane.b32.xlu0 %v2217_v6, %s2452_s10  ;;  %v2219_v52 = vld [vmem:[%s6056_s1 + $0xa0] sm:$0xff]  ;;  %v2220_v6 = vld [vmem:[%s6056_s1 + $0xb8] sm:$0xff] }
 0x228   :  { %v4020_v53 = vpop.permute.xlu1 %1089  ;;  %v4022_v49 = vpop.permute.xlu0 %1087 }
 0x229   :  { %6225 = vst [vmem:[#allocation168_spill] sm:$0xff] %v4020_v53  ;;  %6226 = vst [vmem:[#allocation169_spill] sm:$0xff] %v4022_v49 }
 0x22a   :  { %1333 = vrot.lane.b32.xlu1 %v2218_v62, %s2452_s10  ;;  %1331 = vrot.lane.b32.xlu0 %v2219_v52, %s2452_s10  ;;  %v2221_v62 = vld [vmem:[%s6056_s1 + $0xb0] sm:$0xff]  ;;  %v2222_v52 = vld [vmem:[%s6056_s1 + $0xc8] sm:$0xff] }
 0x22c   :  { %v4032_v14 = vpop.permute.xlu1 %1093  ;;  %v4034_v56 = vpop.permute.xlu0 %1091 }
 0x22d   :  { %6227 = vst [vmem:[#allocation170_spill] sm:$0xff] %v4032_v14  ;;  %6228 = vst [vmem:[#allocation171_spill] sm:$0xff] %v4034_v56 }
 0x22e   :  { %1337 = vrot.lane.b32.xlu1 %v2220_v6, %s2452_s10  ;;  %1335 = vrot.lane.b32.xlu0 %v2221_v62, %s2452_s10  ;;  %v2223_v6 = vld [vmem:[%s6056_s1 + $0xc0] sm:$0xff]  ;;  %v2224_v62 = vld [vmem:[%s6056_s1 + $0xd8] sm:$0xff] }
 0x230   :  { %v4044_v49 = vpop.permute.xlu1 %1097  ;;  %v4046_v53 = vpop.permute.xlu0 %1095 }
 0x231   :  { %6229 = vst [vmem:[#allocation172_spill] sm:$0xff] %v4044_v49  ;;  %6230 = vst [vmem:[#allocation173_spill] sm:$0xff] %v4046_v53 }
 0x232   :  { %1341 = vrot.lane.b32.xlu1 %v2222_v52, %s2452_s10  ;;  %1339 = vrot.lane.b32.xlu0 %v2223_v6, %s2452_s10  ;;  %v2225_v52 = vld [vmem:[%s6056_s1 + $0xd0] sm:$0xff]  ;;  %v2226_v6 = vld [vmem:[%s6056_s1 + $0xe8] sm:$0xff] }
 0x234   :  { %v4056_v56 = vpop.permute.xlu1 %1101  ;;  %v4058_v14 = vpop.permute.xlu0 %1099 }
 0x235   :  { %6231 = vst [vmem:[#allocation174_spill] sm:$0xff] %v4056_v56  ;;  %6232 = vst [vmem:[#allocation175_spill] sm:$0xff] %v4058_v14 }
 0x236   :  { %1345 = vrot.lane.b32.xlu1 %v2224_v62, %s2452_s10  ;;  %1343 = vrot.lane.b32.xlu0 %v2225_v52, %s2452_s10  ;;  %v2227_v62 = vld [vmem:[%s6056_s1 + $0xe0] sm:$0xff]  ;;  %v2228_v52 = vld [vmem:[%s6056_s1 + $0xf8] sm:$0xff] }
 0x238   :  { %v4068_v53 = vpop.permute.xlu1 %1105  ;;  %v4070_v49 = vpop.permute.xlu0 %1103 }
 0x239   :  { %6233 = vst [vmem:[#allocation176_spill] sm:$0xff] %v4068_v53  ;;  %6234 = vst [vmem:[#allocation177_spill] sm:$0xff] %v4070_v49 }
 0x23a   :  { %1349 = vrot.lane.b32.xlu1 %v2226_v6, %s2452_s10  ;;  %1347 = vrot.lane.b32.xlu0 %v2227_v62, %s2452_s10  ;;  %v2229_v6 = vld [vmem:[%s6056_s1 + $0xf0] sm:$0xff]  ;;  %v2230_v62 = vld [vmem:[%s6056_s1 + $0x108] sm:$0xff] }
 0x23c   :  { %v4080_v14 = vpop.permute.xlu1 %1109  ;;  %v4082_v56 = vpop.permute.xlu0 %1107 }
 0x23d   :  { %6235 = vst [vmem:[#allocation178_spill] sm:$0xff] %v4080_v14  ;;  %6236 = vst [vmem:[#allocation179_spill] sm:$0xff] %v4082_v56 }
 0x23e   :  { %1353 = vrot.lane.b32.xlu1 %v2228_v52, %s2452_s10  ;;  %1351 = vrot.lane.b32.xlu0 %v2229_v6, %s2452_s10  ;;  %v2231_v52 = vld [vmem:[%s6056_s1 + $0x100] sm:$0xff]  ;;  %v2232_v6 = vld [vmem:[%s6056_s1 + $0x118] sm:$0xff] }
 0x240   :  { %v4092_v49 = vpop.permute.xlu1 %1113  ;;  %v4094_v53 = vpop.permute.xlu0 %1111 }
 0x241   :  { %6237 = vst [vmem:[#allocation180_spill] sm:$0xff] %v4092_v49  ;;  %6238 = vst [vmem:[#allocation181_spill] sm:$0xff] %v4094_v53 }
 0x242   :  { %1357 = vrot.lane.b32.xlu1 %v2230_v62, %s2452_s10  ;;  %1355 = vrot.lane.b32.xlu0 %v2231_v52, %s2452_s10  ;;  %v2233_v62 = vld [vmem:[%s6056_s1 + $0x110] sm:$0xff]  ;;  %v2234_v52 = vld [vmem:[%s6056_s1 + $0x128] sm:$0xff] }
 0x244   :  { %v4104_v56 = vpop.permute.xlu1 %1117  ;;  %v4106_v14 = vpop.permute.xlu0 %1115 }
 0x245   :  { %6239 = vst [vmem:[#allocation182_spill] sm:$0xff] %v4104_v56  ;;  %6240 = vst [vmem:[#allocation183_spill] sm:$0xff] %v4106_v14 }
 0x246   :  { %1361 = vrot.lane.b32.xlu1 %v2232_v6, %s2452_s10  ;;  %1359 = vrot.lane.b32.xlu0 %v2233_v62, %s2452_s10  ;;  %v2235_v6 = vld [vmem:[%s6056_s1 + $0x120] sm:$0xff]  ;;  %v2236_v62 = vld [vmem:[%s6056_s1 + $0x138] sm:$0xff] }
 0x248   :  { %v4116_v53 = vpop.permute.xlu1 %1121  ;;  %v4118_v49 = vpop.permute.xlu0 %1119 }
 0x249   :  { %6241 = vst [vmem:[#allocation184_spill] sm:$0xff] %v4116_v53  ;;  %6242 = vst [vmem:[#allocation185_spill] sm:$0xff] %v4118_v49 }
 0x24a   :  { %1365 = vrot.lane.b32.xlu1 %v2234_v52, %s2452_s10  ;;  %1363 = vrot.lane.b32.xlu0 %v2235_v6, %s2452_s10  ;;  %v2237_v52 = vld [vmem:[%s6056_s1 + $0x130] sm:$0xff]  ;;  %v2238_v6 = vld [vmem:[%s6056_s1 + $0x148] sm:$0xff] }
 0x24c   :  { %v4128_v14 = vpop.permute.xlu1 %1125  ;;  %v4130_v56 = vpop.permute.xlu0 %1123 }
 0x24d   :  { %6243 = vst [vmem:[#allocation186_spill] sm:$0xff] %v4128_v14  ;;  %6244 = vst [vmem:[#allocation187_spill] sm:$0xff] %v4130_v56 }
 0x24e   :  { %1369 = vrot.lane.b32.xlu1 %v2236_v62, %s2452_s10  ;;  %1367 = vrot.lane.b32.xlu0 %v2237_v52, %s2452_s10  ;;  %v2239_v62 = vld [vmem:[%s6056_s1 + $0x140] sm:$0xff]  ;;  %v2240_v52 = vld [vmem:[%s6056_s1 + $0x158] sm:$0xff] }
 0x250   :  { %v4140_v49 = vpop.permute.xlu1 %1129  ;;  %v4142_v53 = vpop.permute.xlu0 %1127 }
 0x251   :  { %6245 = vst [vmem:[#allocation188_spill] sm:$0xff] %v4140_v49  ;;  %6246 = vst [vmem:[#allocation189_spill] sm:$0xff] %v4142_v53 }
 0x252   :  { %1373 = vrot.lane.b32.xlu1 %v2238_v6, %s2452_s10  ;;  %1371 = vrot.lane.b32.xlu0 %v2239_v62, %s2452_s10  ;;  %v2241_v6 = vld [vmem:[%s6056_s1 + $0x150] sm:$0xff]  ;;  %v2242_v62 = vld [vmem:[%s6056_s1 + $0x168] sm:$0xff] }
 0x254   :  { %v4152_v56 = vpop.permute.xlu1 %1133  ;;  %v4154_v14 = vpop.permute.xlu0 %1131 }
 0x255   :  { %6247 = vst [vmem:[#allocation190_spill] sm:$0xff] %v4152_v56  ;;  %6248 = vst [vmem:[#allocation191_spill] sm:$0xff] %v4154_v14 }
 0x256   :  { %1377 = vrot.lane.b32.xlu1 %v2240_v52, %s2452_s10  ;;  %1375 = vrot.lane.b32.xlu0 %v2241_v6, %s2452_s10  ;;  %v2243_v52 = vld [vmem:[%s6056_s1 + $0x160] sm:$0xff]  ;;  %v2244_v6 = vld [vmem:[%s6056_s1 + $0x178] sm:$0xff] }
 0x258   :  { %v4164_v53 = vpop.permute.xlu1 %1137  ;;  %v4166_v49 = vpop.permute.xlu0 %1135 }
 0x259   :  { %6249 = vst [vmem:[#allocation192_spill] sm:$0xff] %v4164_v53  ;;  %6250 = vst [vmem:[#allocation193_spill] sm:$0xff] %v4166_v49 }
 0x25a   :  { %1381 = vrot.lane.b32.xlu1 %v2242_v62, %s2452_s10  ;;  %1379 = vrot.lane.b32.xlu0 %v2243_v52, %s2452_s10  ;;  %v2245_v62 = vld [vmem:[%s6056_s1 + $0x170] sm:$0xff]  ;;  %v2246_v52 = vld [vmem:[%s6056_s1 + $0x188] sm:$0xff] }
 0x25c   :  { %v4176_v14 = vpop.permute.xlu1 %1141  ;;  %v4178_v56 = vpop.permute.xlu0 %1139 }
 0x25d   :  { %6251 = vst [vmem:[#allocation194_spill] sm:$0xff] %v4176_v14  ;;  %6252 = vst [vmem:[#allocation195_spill] sm:$0xff] %v4178_v56 }
 0x25e   :  { %1385 = vrot.lane.b32.xlu1 %v2244_v6, %s2452_s10  ;;  %1383 = vrot.lane.b32.xlu0 %v2245_v62, %s2452_s10  ;;  %v2247_v6 = vld [vmem:[%s6056_s1 + $0x180] sm:$0xff]  ;;  %v2248_v62 = vld [vmem:[%s6056_s1 + $0x198] sm:$0xff] }
 0x260   :  { %v4188_v49 = vpop.permute.xlu1 %1145  ;;  %v4190_v53 = vpop.permute.xlu0 %1143 }
 0x261   :  { %6253 = vst [vmem:[#allocation196_spill] sm:$0xff] %v4188_v49  ;;  %6254 = vst [vmem:[#allocation197_spill] sm:$0xff] %v4190_v53 }
 0x262   :  { %1389 = vrot.lane.b32.xlu1 %v2246_v52, %s2452_s10  ;;  %1387 = vrot.lane.b32.xlu0 %v2247_v6, %s2452_s10  ;;  %v2249_v52 = vld [vmem:[%s6056_s1 + $0x190] sm:$0xff]  ;;  %v2250_v6 = vld [vmem:[%s6056_s1 + $0x1a8] sm:$0xff] }
 0x264   :  { %v4200_v56 = vpop.permute.xlu1 %1149  ;;  %v4202_v14 = vpop.permute.xlu0 %1147 }
 0x265   :  { %6255 = vst [vmem:[#allocation198_spill] sm:$0xff] %v4200_v56  ;;  %6256 = vst [vmem:[#allocation199_spill] sm:$0xff] %v4202_v14 }
 0x266   :  { %1393 = vrot.lane.b32.xlu1 %v2248_v62, %s2452_s10  ;;  %1391 = vrot.lane.b32.xlu0 %v2249_v52, %s2452_s10  ;;  %v2251_v62 = vld [vmem:[%s6056_s1 + $0x1a0] sm:$0xff]  ;;  %v2252_v52 = vld [vmem:[%s6056_s1 + $0x1b8] sm:$0xff] }
 0x268   :  { %v4212_v53 = vpop.permute.xlu1 %1153  ;;  %v4214_v49 = vpop.permute.xlu0 %1151 }
 0x269   :  { %6257 = vst [vmem:[#allocation200_spill] sm:$0xff] %v4212_v53  ;;  %6258 = vst [vmem:[#allocation201_spill] sm:$0xff] %v4214_v49 }
 0x26a   :  { %1397 = vrot.lane.b32.xlu1 %v2250_v6, %s2452_s10  ;;  %1395 = vrot.lane.b32.xlu0 %v2251_v62, %s2452_s10  ;;  %v2253_v6 = vld [vmem:[%s6056_s1 + $0x1b0] sm:$0xff] }
 0x26c   :  { %v4224_v14 = vpop.permute.xlu1 %1157  ;;  %v4226_v56 = vpop.permute.xlu0 %1155 }
 0x26d   :  { %6259 = vst [vmem:[#allocation202_spill] sm:$0xff] %v4224_v14  ;;  %6260 = vst [vmem:[#allocation203_spill] sm:$0xff] %v4226_v56  ;;  %v2254_v56 = vld [vmem:[%s6056_s1 + $0x1c8] sm:$0xff] }
 0x26e   :  { %1401 = vrot.lane.b32.xlu1 %v2252_v52, %s2452_s10  ;;  %1399 = vrot.lane.b32.xlu0 %v2253_v6, %s2452_s10  ;;  %v2255_v52 = vld [vmem:[%s6056_s1 + $0x1c0] sm:$0xff]  ;;  %v1676_v6 = vsel %vm1675_vm0, %v3127_v27, %v2708_v61  ;;  %v2256_v61 = vld [vmem:[%s6056_s1 + $0x1d8] sm:$0xff] }
 0x270   :  { %v4236_v49 = vpop.permute.xlu1 %1161  ;;  %v4238_v62 = vpop.permute.xlu0 %1159 }
 0x271   :  { %6261 = vst [vmem:[#allocation204_spill] sm:$0xff] %v4236_v49  ;;  %6262 = vst [vmem:[#allocation205_spill] sm:$0xff] %v4238_v62  ;;  %v1677_v62 = vsel %vm1675_vm0, %v3132_v42, %v2720_v1  ;;  %v2257_v1 = vld [vmem:[%s6056_s1 + $0x1d0] sm:$0xff] }
 0x272   :  { %1405 = vrot.lane.b32.xlu1 %v2254_v56, %s2452_s10  ;;  %1403 = vrot.lane.b32.xlu0 %v2255_v52, %s2452_s10  ;;  %v1806_v49 = vsel %vm1804_vm1, %v1677_v62, %v3480_v51  ;;  %v1805_v56 = vsel %vm1804_vm1, %v1676_v6, %v3482_v59 }
 0x274   :  { %v1294_v14 = vpop.permute.xlu1 %1293  ;;  %v1292_v53 = vpop.permute.xlu0 %1291 }
 0x275   :  { %v1935_v52 = vsel %vm1933_vm2, %v1806_v49, %v1294_v14  ;;  %v1934_v48 = vsel %vm1933_vm2, %v1805_v56, %v1292_v53  ;;  %v1678_v49 = vsel %vm1675_vm0, %v3145_v26, %v2706_v60  ;;  %v2258_v60 = vld [vmem:[%s6056_s1 + $0x1e8] sm:$0xff]  ;;  %v2261_v26 = vld [vmem:[%s6057_s0 + $0x20] sm:$0xff] }
 0x276   :  { %2064 = vst.msk [vmem:[%s6058_s2 + $0x8] sm:$0xff] %vm2062_vm3, %v1935_v52  ;;  %2063 = vst.msk [vmem:[%s6058_s2] sm:$0xff] %vm2062_vm3, %v1934_v48  ;;  %1409 = vrot.lane.b32.xlu1 %v2256_v61, %s2452_s10  ;;  %1407 = vrot.lane.b32.xlu0 %v2257_v1, %s2452_s10  ;;  %v1679_v48 = vsel %vm1675_vm0, %v3150_v43, %v2718_v0  ;;  %v1807_v51 = vsel %vm1804_vm1, %v1678_v49, %v3494_v58 }
 0x277   :  { %v1808_v53 = vsel %vm1804_vm1, %v1679_v48, %v3492_v35  ;;  %v2259_v0 = vld [vmem:[%s6056_s1 + $0x1e0] sm:$0xff]  ;;  %v2260_v35 = vld [vmem:[%s6057_s0 + $0x28] sm:$0xff]  ;;  %v1680_v58 = vsel %vm1675_vm0, %v2261_v26, %v2732_v5  ;;  %v2263_v5 = vld [vmem:[%s6056_s1 + $0x1f0] sm:$0xff] }
 0x278   :  { %v1298_v42 = vpop.permute.xlu1 %1297  ;;  %v1296_v27 = vpop.permute.xlu0 %1295  ;;  %v1681_v43 = vsel %vm1675_vm0, %v2260_v35, %v2730_v4  ;;  %v1809_v6 = vsel %vm1804_vm1, %v1680_v58, %v3506_v11  ;;  %v2262_v4 = vld [vmem:[%s6056_s1 + $0x1f8] sm:$0xff]  ;;  %v2265_v49 = vld [vmem:[%s6057_s0 + $0x30] sm:$0xff] }
 0x279   :  { %v1937_v59 = vsel %vm1933_vm2, %v1808_v53, %v1298_v42  ;;  %v1936_v14 = vsel %vm1933_vm2, %v1807_v51, %v1296_v27  ;;  %v1810_v62 = vsel %vm1804_vm1, %v1681_v43, %v3504_v19  ;;  %v2264_v19 = vld [vmem:[%s6057_s0 + $0x38] sm:$0xff]  ;;  %v1682_v48 = vsel %vm1675_vm0, %v2265_v49, %v2744_v9  ;;  %v2267_v9 = vld [vmem:[%s6056_s1 + $0x200] sm:$0xff] }
 0x27a   :  { %2066 = vst.msk [vmem:[%s6058_s2 + $0x18] sm:$0xff] %vm2062_vm3, %v1937_v59  ;;  %2065 = vst.msk [vmem:[%s6058_s2 + $0x10] sm:$0xff] %vm2062_vm3, %v1936_v14  ;;  %1413 = vrot.lane.b32.xlu1 %v2258_v60, %s2452_s10  ;;  %1411 = vrot.lane.b32.xlu0 %v2259_v0, %s2452_s10  ;;  %v1683_v11 = vsel %vm1675_vm0, %v2264_v19, %v2742_v8  ;;  %v1811_v51 = vsel %vm1804_vm1, %v1682_v48, %v3518_v10 }
 0x27b   :  { %v1812_v53 = vsel %vm1804_vm1, %v1683_v11, %v3516_v3  ;;  %v2266_v8 = vld [vmem:[%s6056_s1 + $0x208] sm:$0xff]  ;;  %v2269_v60 = vld [vmem:[%s6057_s0 + $0x40] sm:$0xff] }
 0x27c   :  { %v1302_v56 = vpop.permute.xlu1 %1301  ;;  %v1300_v52 = vpop.permute.xlu0 %1299  ;;  %v2268_v3 = vld [vmem:[%s6057_s0 + $0x48] sm:$0xff]  ;;  %v1684_v0 = vsel %vm1675_vm0, %v2269_v60, %v2756_v13  ;;  %v2271_v13 = vld [vmem:[%s6056_s1 + $0x210] sm:$0xff]  ;;  %v2277_v49 = vld [vmem:[%s6057_s0 + $0x60] sm:$0xff] }
 0x27d   :  { %v1939_v61 = vsel %vm1933_vm2, %v1810_v62, %v1302_v56  ;;  %v1938_v1 = vsel %vm1933_vm2, %v1809_v6, %v1300_v52  ;;  %v1685_v10 = vsel %vm1675_vm0, %v2268_v3, %v2754_v12  ;;  %v1813_v43 = vsel %vm1804_vm1, %v1684_v0, %v3530_v50  ;;  %v2270_v12 = vld [vmem:[%s6056_s1 + $0x218] sm:$0xff]  ;;  %v2273_v56 = vld [vmem:[%s6057_s0 + $0x50] sm:$0xff] }
 0x27e   :  { %2068 = vst.msk [vmem:[%s6058_s2 + $0x28] sm:$0xff] %vm2062_vm3, %v1939_v61  ;;  %2067 = vst.msk [vmem:[%s6058_s2 + $0x20] sm:$0xff] %vm2062_vm3, %v1938_v1  ;;  %1417 = vrot.lane.b32.xlu1 %v2262_v4, %s2452_s10  ;;  %1415 = vrot.lane.b32.xlu0 %v2263_v5, %s2452_s10  ;;  %v1814_v35 = vsel %vm1804_vm1, %v1685_v10, %v3528_v55  ;;  %v1686_v52 = vsel %vm1675_vm0, %v2273_v56, %v2768_v17 }
 0x27f   :  { %v2272_v55 = vld [vmem:[%s6057_s0 + $0x58] sm:$0xff]  ;;  %v1815_v1 = vsel %vm1804_vm1, %v1686_v52, %v3542_v34  ;;  %v2275_v17 = vld [vmem:[%s6056_s1 + $0x220] sm:$0xff]  ;;  %v1688_v48 = vsel %vm1675_vm0, %v2277_v49, %v2780_v21  ;;  %v2279_v21 = vld [vmem:[%s6056_s1 + $0x230] sm:$0xff] }
 0x280   :  { %v1306_v42 = vpop.permute.xlu1 %1305  ;;  %v1304_v27 = vpop.permute.xlu0 %1303  ;;  %v1687_v50 = vsel %vm1675_vm0, %v2272_v55, %v2766_v16  ;;  %v2274_v16 = vld [vmem:[%s6056_s1 + $0x228] sm:$0xff]  ;;  %v2289_v56 = vld [vmem:[%s6057_s0 + $0x90] sm:$0xff] }
 0x281   :  { %v1941_v59 = vsel %vm1933_vm2, %v1812_v53, %v1306_v42  ;;  %v1940_v14 = vsel %vm1933_vm2, %v1811_v51, %v1304_v27  ;;  %v1816_v61 = vsel %vm1804_vm1, %v1687_v50, %v3540_v47  ;;  %v2276_v47 = vld [vmem:[%s6057_s0 + $0x68] sm:$0xff]  ;;  %v1817_v51 = vsel %vm1804_vm1, %v1688_v48, %v3554_v18 }
 0x282   :  { %2070 = vst.msk [vmem:[%s6058_s2 + $0x38] sm:$0xff] %vm2062_vm3, %v1941_v59  ;;  %2069 = vst.msk [vmem:[%s6058_s2 + $0x30] sm:$0xff] %vm2062_vm3, %v1940_v14  ;;  %1421 = vrot.lane.b32.xlu1 %v2266_v8, %s2452_s10  ;;  %1419 = vrot.lane.b32.xlu0 %v2267_v9, %s2452_s10  ;;  %v1689_v34 = vsel %vm1675_vm0, %v2276_v47, %v2778_v20  ;;  %v1694_v52 = vsel %vm1675_vm0, %v2289_v56, %v2816_v33 }
 0x283   :  { %v1818_v53 = vsel %vm1804_vm1, %v1689_v34, %v3552_v39  ;;  %v2278_v20 = vld [vmem:[%s6056_s1 + $0x238] sm:$0xff]  ;;  %v2281_v8 = vld [vmem:[%s6057_s0 + $0x70] sm:$0xff]  ;;  %v2291_v33 = vld [vmem:[%s6056_s1 + $0x260] sm:$0xff] }
 0x284   :  { %v1310_v26 = vpop.permute.xlu1 %1309  ;;  %v1308_v58 = vpop.permute.xlu0 %1307  ;;  %v2280_v39 = vld [vmem:[%s6057_s0 + $0x78] sm:$0xff]  ;;  %v1690_v9 = vsel %vm1675_vm0, %v2281_v8, %v2792_v25  ;;  %v2283_v25 = vld [vmem:[%s6056_s1 + $0x240] sm:$0xff] }
 0x285   :  { %v1943_v62 = vsel %vm1933_vm2, %v1814_v35, %v1310_v26  ;;  %v1942_v6 = vsel %vm1933_vm2, %v1813_v43, %v1308_v58  ;;  %v1691_v18 = vsel %vm1675_vm0, %v2280_v39, %v2790_v24  ;;  %v1819_v10 = vsel %vm1804_vm1, %v1690_v9, %v3566_v2  ;;  %v2282_v24 = vld [vmem:[%s6056_s1 + $0x248] sm:$0xff]  ;;  %v2285_v26 = vld [vmem:[%s6057_s0 + $0x80] sm:$0xff] }
 0x286   :  { %2072 = vst.msk [vmem:[%s6058_s2 + $0x48] sm:$0xff] %vm2062_vm3, %v1943_v62  ;;  %2071 = vst.msk [vmem:[%s6058_s2 + $0x40] sm:$0xff] %vm2062_vm3, %v1942_v6  ;;  %1425 = vrot.lane.b32.xlu1 %v2270_v12, %s2452_s10  ;;  %1423 = vrot.lane.b32.xlu0 %v2271_v13, %s2452_s10  ;;  %v1820_v3 = vsel %vm1804_vm1, %v1691_v18, %v3564_v31  ;;  %v1692_v58 = vsel %vm1675_vm0, %v2285_v26, %v2804_v29  ;;  %v6265_v26 = vld [vmem:[#allocation104_spill] sm:$0xff] }
 0x287   :  { %v2284_v31 = vld [vmem:[%s6057_s0 + $0x88] sm:$0xff]  ;;  %v1821_v6 = vsel %vm1804_vm1, %v1692_v58, %v3578_v54  ;;  %v2287_v29 = vld [vmem:[%s6056_s1 + $0x250] sm:$0xff]  ;;  %v2301_v8 = vld [vmem:[%s6057_s0 + $0xc0] sm:$0xff] }
 0x288   :  { %v1314_v4 = vpop.permute.xlu1 %1313  ;;  %v1312_v5 = vpop.permute.xlu0 %1311  ;;  %v1693_v2 = vsel %vm1675_vm0, %v2284_v31, %v2802_v28  ;;  %v2286_v28 = vld [vmem:[%s6056_s1 + $0x258] sm:$0xff]  ;;  %v1700_v9 = vsel %vm1675_vm0, %v2301_v8, %v2852_v45  ;;  %v2303_v45 = vld [vmem:[%s6056_s1 + $0x290] sm:$0xff]  ;;  %v6264_v31 = vld [vmem:[#allocation3_spill] sm:$0xff] }
 0x289   :  { %v1945_v19 = vsel %vm1933_vm2, %v1816_v61, %v1314_v4  ;;  %v1944_v11 = vsel %vm1933_vm2, %v1815_v1, %v1312_v5  ;;  %v1822_v62 = vsel %vm1804_vm1, %v1693_v2, %v3576_v23  ;;  %v2288_v23 = vld [vmem:[%s6057_s0 + $0x98] sm:$0xff]  ;;  %v1823_v1 = vsel %vm1804_vm1, %v1694_v52, %v3590_v46  ;;  %v2309_v52 = vld [vmem:[%s6057_s0 + $0xe0] sm:$0xff] }
 0x28a   :  { %2074 = vst.msk [vmem:[%s6058_s2 + $0x58] sm:$0xff] %vm2062_vm3, %v1945_v19  ;;  %2073 = vst.msk [vmem:[%s6058_s2 + $0x50] sm:$0xff] %vm2062_vm3, %v1944_v11  ;;  %1429 = vrot.lane.b32.xlu1 %v2274_v16, %s2452_s10  ;;  %1427 = vrot.lane.b32.xlu0 %v2275_v17, %s2452_s10  ;;  %v1695_v54 = vsel %vm1675_vm0, %v2288_v23, %v2814_v32  ;;  %v6277_v8 = vld [vmem:[#allocation110_spill] sm:$0xff] }
 0x28b   :  { %v1824_v61 = vsel %vm1804_vm1, %v1695_v54, %v3588_v15  ;;  %v2290_v32 = vld [vmem:[%s6056_s1 + $0x268] sm:$0xff]  ;;  %v2293_v16 = vld [vmem:[%s6057_s0 + $0xa0] sm:$0xff]  ;;  %v6267_v54 = vld [vmem:[#allocation4_spill] sm:$0xff] }
 0x28c   :  { %v1318_v42 = vpop.permute.xlu1 %1317  ;;  %v1316_v27 = vpop.permute.xlu0 %1315  ;;  %v2292_v15 = vld [vmem:[%s6057_s0 + $0xa8] sm:$0xff]  ;;  %v1696_v17 = vsel %vm1675_vm0, %v2293_v16, %v2828_v37  ;;  %v2295_v37 = vld [vmem:[%s6056_s1 + $0x270] sm:$0xff]  ;;  %v2310_v16 = vld [vmem:[%s6056_s1 + $0x2b8] sm:$0xff] }
 0x28d   :  { %v1947_v59 = vsel %vm1933_vm2, %v1818_v53, %v1318_v42  ;;  %v1946_v14 = vsel %vm1933_vm2, %v1817_v51, %v1316_v27  ;;  %v1697_v46 = vsel %vm1675_vm0, %v2292_v15, %v2826_v36  ;;  %v1825_v34 = vsel %vm1804_vm1, %v1696_v17, %v3602_v38  ;;  %v2294_v36 = vld [vmem:[%s6056_s1 + $0x278] sm:$0xff]  ;;  %v2297_v42 = vld [vmem:[%s6057_s0 + $0xb0] sm:$0xff]  ;;  %v2308_v23 = vld [vmem:[%s6057_s0 + $0xe8] sm:$0xff] }
 0x28e   :  { %2076 = vst.msk [vmem:[%s6058_s2 + $0x68] sm:$0xff] %vm2062_vm3, %v1947_v59  ;;  %2075 = vst.msk [vmem:[%s6058_s2 + $0x60] sm:$0xff] %vm2062_vm3, %v1946_v14  ;;  %1433 = vrot.lane.b32.xlu1 %v2278_v20, %s2452_s10  ;;  %1431 = vrot.lane.b32.xlu0 %v2279_v21, %s2452_s10  ;;  %v1826_v47 = vsel %vm1804_vm1, %v1697_v46, %v3600_v7  ;;  %v1698_v27 = vsel %vm1675_vm0, %v2297_v42, %v2840_v41 }
 0x28f   :  { %v2296_v7 = vld [vmem:[%s6057_s0 + $0xb8] sm:$0xff]  ;;  %v1827_v14 = vsel %vm1804_vm1, %v1698_v27, %v3614_v30  ;;  %v2299_v41 = vld [vmem:[%s6056_s1 + $0x280] sm:$0xff]  ;;  %v1705_v56 = vsel %vm1675_vm0, %v2308_v23, %v6267_v54  ;;  %v2311_v17 = vld [vmem:[%s6056_s1 + $0x2b0] sm:$0xff] }
 0x290   :  { %v1322_v60 = vpop.permute.xlu1 %1321  ;;  %v1320_v0 = vpop.permute.xlu0 %1319  ;;  %v1699_v38 = vsel %vm1675_vm0, %v2296_v7, %v2838_v40  ;;  %v2298_v40 = vld [vmem:[%s6056_s1 + $0x288] sm:$0xff]  ;;  %v6274_v7 = vld [vmem:[#allocation109_spill] sm:$0xff]  ;;  %v6283_v54 = vld [vmem:[#allocation12_spill] sm:$0xff] }
 0x291   :  { %v1949_v35 = vsel %vm1933_vm2, %v1820_v3, %v1322_v60  ;;  %v1948_v43 = vsel %vm1933_vm2, %v1819_v10, %v1320_v0  ;;  %v1828_v59 = vsel %vm1804_vm1, %v1699_v38, %v3612_v63  ;;  %v2300_v63 = vld [vmem:[%s6057_s0 + $0xc8] sm:$0xff]  ;;  %v1829_v10 = vsel %vm1804_vm1, %v1700_v9, %v3626_v22  ;;  %v6263_v22 = vld [vmem:[#allocation2_spill] sm:$0xff] }
 0x292   :  { %2078 = vst.msk [vmem:[%s6058_s2 + $0x78] sm:$0xff] %vm2062_vm3, %v1949_v35  ;;  %2077 = vst.msk [vmem:[%s6058_s2 + $0x70] sm:$0xff] %vm2062_vm3, %v1948_v43  ;;  %1437 = vrot.lane.b32.xlu1 %v2282_v24, %s2452_s10  ;;  %1435 = vrot.lane.b32.xlu0 %v2283_v25, %s2452_s10  ;;  %v1701_v30 = vsel %vm1675_vm0, %v2300_v63, %v2850_v44  ;;  %v6276_v63 = vld [vmem:[#allocation9_spill] sm:$0xff] }
 0x293   :  { %v1830_v3 = vsel %vm1804_vm1, %v1701_v30, %v3624_v57  ;;  %v2302_v44 = vld [vmem:[%s6056_s1 + $0x298] sm:$0xff]  ;;  %v2305_v25 = vld [vmem:[%s6057_s0 + $0xd0] sm:$0xff]  ;;  %v2324_v23 = vld [vmem:[%s6057_s0 + $0x128] sm:$0xff] }
 0x294   :  { %v1326_v12 = vpop.permute.xlu1 %1325  ;;  %v1324_v13 = vpop.permute.xlu0 %1323  ;;  %v2304_v57 = vld [vmem:[%s6057_s0 + $0xd8] sm:$0xff]  ;;  %v1702_v2 = vsel %vm1675_vm0, %v2305_v25, %v6264_v31  ;;  %v2321_v25 = vld [vmem:[%s6057_s0 + $0x110] sm:$0xff]  ;;  %v6280_v31 = vld [vmem:[#allocation11_spill] sm:$0xff] }
 0x295   :  { %v1951_v55 = vsel %vm1933_vm2, %v1822_v62, %v1326_v12  ;;  %v1950_v50 = vsel %vm1933_vm2, %v1821_v6, %v1324_v13  ;;  %v1703_v24 = vsel %vm1675_vm0, %v2304_v57, %v6263_v22  ;;  %v6266_v62 = vld [vmem:[#allocation105_spill] sm:$0xff]  ;;  %v6279_v22 = vld [vmem:[#allocation10_spill] sm:$0xff] }
 0x296   :  { %2080 = vst.msk [vmem:[%s6058_s2 + $0x88] sm:$0xff] %vm2062_vm3, %v1951_v55  ;;  %2079 = vst.msk [vmem:[%s6058_s2 + $0x80] sm:$0xff] %vm2062_vm3, %v1950_v50  ;;  %1441 = vrot.lane.b32.xlu1 %v2286_v28, %s2452_s10  ;;  %1439 = vrot.lane.b32.xlu0 %v2287_v29, %s2452_s10  ;;  %v1832_v58 = vsel %vm1804_vm1, %v1703_v24, %v6265_v26  ;;  %v1831_v6 = vsel %vm1804_vm1, %v1702_v2, %v6266_v62  ;;  %v6281_v26 = vld [vmem:[#allocation112_spill] sm:$0xff]  ;;  %v6282_v62 = vld [vmem:[#allocation113_spill] sm:$0xff] }
 0x297   :  { %v2306_v28 = vld [vmem:[%s6056_s1 + $0x2a8] sm:$0xff]  ;;  %v2307_v29 = vld [vmem:[%s6056_s1 + $0x2a0] sm:$0xff]  ;;  %v2320_v57 = vld [vmem:[%s6057_s0 + $0x118] sm:$0xff]  ;;  %v1710_v2 = vsel %vm1675_vm0, %v2321_v25, %v6280_v31 }
 0x298   :  { %v1330_v4 = vpop.permute.xlu1 %1329  ;;  %v1328_v5 = vpop.permute.xlu0 %1327  ;;  %v1711_v24 = vsel %vm1675_vm0, %v2320_v57, %v6279_v22  ;;  %v2336_v57 = vld [vmem:[%s6057_s0 + $0x158] sm:$0xff]  ;;  %v6295_v22 = vld [vmem:[#allocation18_spill] sm:$0xff]  ;;  %v2337_v25 = vld [vmem:[%s6057_s0 + $0x150] sm:$0xff] }
 0x299   :  { %v1953_v19 = vsel %vm1933_vm2, %v1824_v61, %v1330_v4  ;;  %v1952_v11 = vsel %vm1933_vm2, %v1823_v1, %v1328_v5  ;;  %v6268_v61 = vld [vmem:[#allocation5_spill] sm:$0xff]  ;;  %v6269_v4 = vld [vmem:[#allocation106_spill] sm:$0xff]  ;;  %v6296_v31 = vld [vmem:[#allocation19_spill] sm:$0xff] }
 0x29a   :  { %2082 = vst.msk [vmem:[%s6058_s2 + $0x98] sm:$0xff] %vm2062_vm3, %v1953_v19  ;;  %2081 = vst.msk [vmem:[%s6058_s2 + $0x90] sm:$0xff] %vm2062_vm3, %v1952_v11  ;;  %1445 = vrot.lane.b32.xlu1 %v2290_v32, %s2452_s10  ;;  %1443 = vrot.lane.b32.xlu0 %v2291_v33, %s2452_s10  ;;  %v1704_v1 = vsel %vm1675_vm0, %v2309_v52, %v6268_v61  ;;  %v1834_v5 = vsel %vm1804_vm1, %v1705_v56, %v6269_v4  ;;  %v6270_v19 = vld [vmem:[#allocation107_spill] sm:$0xff]  ;;  %v6284_v61 = vld [vmem:[#allocation13_spill] sm:$0xff] }
 0x29b   :  { %v1833_v11 = vsel %vm1804_vm1, %v1704_v1, %v6270_v19  ;;  %v1713_v56 = vsel %vm1675_vm0, %v2324_v23, %v6283_v54  ;;  %v2325_v52 = vld [vmem:[%s6057_s0 + $0x120] sm:$0xff]  ;;  %v6286_v19 = vld [vmem:[#allocation115_spill] sm:$0xff]  ;;  %v6299_v54 = vld [vmem:[#allocation20_spill] sm:$0xff] }
 0x29c   :  { %v1334_v49 = vpop.permute.xlu1 %1333  ;;  %v1332_v48 = vpop.permute.xlu0 %1331  ;;  %v1712_v1 = vsel %vm1675_vm0, %v2325_v52, %v6284_v61  ;;  %v6285_v4 = vld [vmem:[#allocation114_spill] sm:$0xff]  ;;  %v2340_v23 = vld [vmem:[%s6057_s0 + $0x168] sm:$0xff]  ;;  %v6300_v61 = vld [vmem:[#allocation21_spill] sm:$0xff] }
 0x29d   :  { %v1955_v53 = vsel %vm1933_vm2, %v1826_v47, %v1334_v49  ;;  %v1954_v51 = vsel %vm1933_vm2, %v1825_v34, %v1332_v48  ;;  %v2312_v47 = vld [vmem:[%s6057_s0 + $0xf8] sm:$0xff]  ;;  %v6271_v34 = vld [vmem:[#allocation6_spill] sm:$0xff]  ;;  %v2313_v48 = vld [vmem:[%s6057_s0 + $0xf0] sm:$0xff] }
 0x29e   :  { %2084 = vst.msk [vmem:[%s6058_s2 + $0xa8] sm:$0xff] %vm2062_vm3, %v1955_v53  ;;  %2083 = vst.msk [vmem:[%s6058_s2 + $0xa0] sm:$0xff] %vm2062_vm3, %v1954_v51  ;;  %1449 = vrot.lane.b32.xlu1 %v2294_v36, %s2452_s10  ;;  %1447 = vrot.lane.b32.xlu0 %v2295_v37, %s2452_s10  ;;  %v1707_v49 = vsel %vm1675_vm0, %v2312_v47, %v6271_v34  ;;  %v6272_v53 = vld [vmem:[#allocation7_spill] sm:$0xff]  ;;  %v6273_v36 = vld [vmem:[#allocation108_spill] sm:$0xff] }
 0x29f   :  { %v1706_v51 = vsel %vm1675_vm0, %v2313_v48, %v6272_v53  ;;  %v1836_v37 = vsel %vm1804_vm1, %v1707_v49, %v6273_v36  ;;  %v2328_v47 = vld [vmem:[%s6057_s0 + $0x138] sm:$0xff]  ;;  %v6287_v34 = vld [vmem:[#allocation14_spill] sm:$0xff]  ;;  %v2329_v48 = vld [vmem:[%s6057_s0 + $0x130] sm:$0xff] }
 0x2a0   :  { %v1338_v20 = vpop.permute.xlu1 %1337  ;;  %v1336_v21 = vpop.permute.xlu0 %1335  ;;  %v1835_v38 = vsel %vm1804_vm1, %v1706_v51, %v6274_v7  ;;  %v1715_v49 = vsel %vm1675_vm0, %v2328_v47, %v6287_v34  ;;  %v6288_v53 = vld [vmem:[#allocation15_spill] sm:$0xff]  ;;  %v6289_v36 = vld [vmem:[#allocation116_spill] sm:$0xff]  ;;  %v6290_v7 = vld [vmem:[#allocation117_spill] sm:$0xff] }
 0x2a1   :  { %v1957_v39 = vsel %vm1933_vm2, %v1828_v59, %v1338_v20  ;;  %v1956_v18 = vsel %vm1933_vm2, %v1827_v14, %v1336_v21  ;;  %v2314_v20 = vld [vmem:[%s6056_s1 + $0x2c8] sm:$0xff]  ;;  %v2315_v21 = vld [vmem:[%s6056_s1 + $0x2c0] sm:$0xff]  ;;  %v1714_v51 = vsel %vm1675_vm0, %v2329_v48, %v6288_v53  ;;  %v2344_v47 = vld [vmem:[%s6057_s0 + $0x178] sm:$0xff] }
 0x2a2   :  { %2086 = vst.msk [vmem:[%s6058_s2 + $0xb8] sm:$0xff] %vm2062_vm3, %v1957_v39  ;;  %2085 = vst.msk [vmem:[%s6058_s2 + $0xb0] sm:$0xff] %vm2062_vm3, %v1956_v18  ;;  %1453 = vrot.lane.b32.xlu1 %v2298_v40, %s2452_s10  ;;  %1451 = vrot.lane.b32.xlu0 %v2299_v41, %s2452_s10  ;;  %v6275_v18 = vld [vmem:[#allocation8_spill] sm:$0xff]  ;;  %v6303_v34 = vld [vmem:[#allocation22_spill] sm:$0xff] }
 0x2a3   :  { %v2316_v39 = vld [vmem:[%s6057_s0 + $0x108] sm:$0xff]  ;;  %v2317_v41 = vld [vmem:[%s6057_s0 + $0x100] sm:$0xff]  ;;  %v2345_v48 = vld [vmem:[%s6057_s0 + $0x170] sm:$0xff] }
 0x2a4   :  { %v1342_v60 = vpop.permute.xlu1 %1341  ;;  %v1340_v0 = vpop.permute.xlu0 %1339  ;;  %v1709_v40 = vsel %vm1675_vm0, %v2316_v39, %v6275_v18  ;;  %v1708_v30 = vsel %vm1675_vm0, %v2317_v41, %v6276_v63  ;;  %v2332_v39 = vld [vmem:[%s6057_s0 + $0x148] sm:$0xff]  ;;  %v6291_v18 = vld [vmem:[#allocation16_spill] sm:$0xff]  ;;  %v2333_v41 = vld [vmem:[%s6057_s0 + $0x140] sm:$0xff] }
 0x2a5   :  { %v1959_v35 = vsel %vm1933_vm2, %v1830_v3, %v1342_v60  ;;  %v1958_v43 = vsel %vm1933_vm2, %v1829_v10, %v1340_v0  ;;  %v1838_v9 = vsel %vm1804_vm1, %v1709_v40, %v6277_v8  ;;  %v6278_v3 = vld [vmem:[#allocation111_spill] sm:$0xff]  ;;  %v1717_v40 = vsel %vm1675_vm0, %v2332_v39, %v6291_v18  ;;  %v6292_v63 = vld [vmem:[#allocation17_spill] sm:$0xff]  ;;  %v6293_v8 = vld [vmem:[#allocation118_spill] sm:$0xff] }
 0x2a6   :  { %2088 = vst.msk [vmem:[%s6058_s2 + $0xc8] sm:$0xff] %vm2062_vm3, %v1959_v35  ;;  %2087 = vst.msk [vmem:[%s6058_s2 + $0xc0] sm:$0xff] %vm2062_vm3, %v1958_v43  ;;  %1457 = vrot.lane.b32.xlu1 %v2302_v44, %s2452_s10  ;;  %1455 = vrot.lane.b32.xlu0 %v2303_v45, %s2452_s10  ;;  %v1837_v10 = vsel %vm1804_vm1, %v1708_v30, %v6278_v3  ;;  %v1716_v30 = vsel %vm1675_vm0, %v2333_v41, %v6292_v63  ;;  %v6294_v3 = vld [vmem:[#allocation119_spill] sm:$0xff]  ;;  %v6307_v18 = vld [vmem:[#allocation24_spill] sm:$0xff] }
 0x2a7   :  { %v2318_v44 = vld [vmem:[%s6056_s1 + $0x2d8] sm:$0xff]  ;;  %v2319_v45 = vld [vmem:[%s6056_s1 + $0x2d0] sm:$0xff]  ;;  %v2341_v52 = vld [vmem:[%s6057_s0 + $0x160] sm:$0xff] }
 0x2a8   :  { %v1346_v12 = vpop.permute.xlu1 %1345  ;;  %v1344_v13 = vpop.permute.xlu0 %1343  ;;  %v6304_v53 = vld [vmem:[#allocation23_spill] sm:$0xff]  ;;  %v2349_v41 = vld [vmem:[%s6057_s0 + $0x180] sm:$0xff]  ;;  %v6308_v63 = vld [vmem:[#allocation25_spill] sm:$0xff] }
 0x2a9   :  { %v1961_v55 = vsel %vm1933_vm2, %v1832_v58, %v1346_v12  ;;  %v1960_v50 = vsel %vm1933_vm2, %v1831_v6, %v1344_v13  ;;  %v1840_v58 = vsel %vm1804_vm1, %v1711_v24, %v6281_v26  ;;  %v1839_v6 = vsel %vm1804_vm1, %v1710_v2, %v6282_v62  ;;  %v6297_v26 = vld [vmem:[#allocation120_spill] sm:$0xff]  ;;  %v6298_v62 = vld [vmem:[#allocation121_spill] sm:$0xff]  ;;  %v2348_v39 = vld [vmem:[%s6057_s0 + $0x188] sm:$0xff] }
 0x2aa   :  { %2090 = vst.msk [vmem:[%s6058_s2 + $0xd8] sm:$0xff] %vm2062_vm3, %v1961_v55  ;;  %2089 = vst.msk [vmem:[%s6058_s2 + $0xd0] sm:$0xff] %vm2062_vm3, %v1960_v50  ;;  %1461 = vrot.lane.b32.xlu1 %v2306_v28, %s2452_s10  ;;  %1459 = vrot.lane.b32.xlu0 %v2307_v29, %s2452_s10  ;;  %v1719_v24 = vsel %vm1675_vm0, %v2336_v57, %v6295_v22  ;;  %v1718_v2 = vsel %vm1675_vm0, %v2337_v25, %v6296_v31  ;;  %v6311_v22 = vld [vmem:[#allocation26_spill] sm:$0xff]  ;;  %v6312_v31 = vld [vmem:[#allocation27_spill] sm:$0xff] }
 0x2ab   :  { %v2322_v28 = vld [vmem:[%s6056_s1 + $0x2e8] sm:$0xff]  ;;  %v2323_v29 = vld [vmem:[%s6056_s1 + $0x2e0] sm:$0xff]  ;;  %v2352_v57 = vld [vmem:[%s6057_s0 + $0x198] sm:$0xff] }
 0x2ac   :  { %v1350_v32 = vpop.permute.xlu1 %1349  ;;  %v1348_v33 = vpop.permute.xlu0 %1347  ;;  %v2353_v25 = vld [vmem:[%s6057_s0 + $0x190] sm:$0xff] }
 0x2ad   :  { %v1963_v15 = vsel %vm1933_vm2, %v1834_v5, %v1350_v32  ;;  %v1962_v46 = vsel %vm1933_vm2, %v1833_v11, %v1348_v33  ;;  %v1842_v5 = vsel %vm1804_vm1, %v1713_v56, %v6285_v4  ;;  %v1841_v11 = vsel %vm1804_vm1, %v1712_v1, %v6286_v19  ;;  %v6301_v4 = vld [vmem:[#allocation122_spill] sm:$0xff]  ;;  %v6302_v19 = vld [vmem:[#allocation123_spill] sm:$0xff] }
 0x2ae   :  { %2092 = vst.msk [vmem:[%s6058_s2 + $0xe8] sm:$0xff] %vm2062_vm3, %v1963_v15  ;;  %2091 = vst.msk [vmem:[%s6058_s2 + $0xe0] sm:$0xff] %vm2062_vm3, %v1962_v46  ;;  %1465 = vrot.lane.b32.xlu1 %v2310_v16, %s2452_s10  ;;  %1463 = vrot.lane.b32.xlu0 %v2311_v17, %s2452_s10  ;;  %v1721_v56 = vsel %vm1675_vm0, %v2340_v23, %v6299_v54  ;;  %v1720_v1 = vsel %vm1675_vm0, %v2341_v52, %v6300_v61  ;;  %v6315_v54 = vld [vmem:[#allocation28_spill] sm:$0xff]  ;;  %v6316_v61 = vld [vmem:[#allocation29_spill] sm:$0xff] }
 0x2af   :  { %v2326_v16 = vld [vmem:[%s6056_s1 + $0x2f8] sm:$0xff]  ;;  %v2327_v17 = vld [vmem:[%s6056_s1 + $0x2f0] sm:$0xff]  ;;  %v2356_v23 = vld [vmem:[%s6057_s0 + $0x1a8] sm:$0xff] }
 0x2b0   :  { %v1354_v42 = vpop.permute.xlu1 %1353  ;;  %v1352_v27 = vpop.permute.xlu0 %1351  ;;  %v2357_v52 = vld [vmem:[%s6057_s0 + $0x1a0] sm:$0xff] }
 0x2b1   :  { %v1965_v59 = vsel %vm1933_vm2, %v1836_v37, %v1354_v42  ;;  %v1964_v14 = vsel %vm1933_vm2, %v1835_v38, %v1352_v27  ;;  %v1844_v37 = vsel %vm1804_vm1, %v1715_v49, %v6289_v36  ;;  %v1843_v38 = vsel %vm1804_vm1, %v1714_v51, %v6290_v7  ;;  %v6305_v36 = vld [vmem:[#allocation124_spill] sm:$0xff]  ;;  %v6306_v7 = vld [vmem:[#allocation125_spill] sm:$0xff] }
 0x2b2   :  { %2094 = vst.msk [vmem:[%s6058_s2 + $0xf8] sm:$0xff] %vm2062_vm3, %v1965_v59  ;;  %2093 = vst.msk [vmem:[%s6058_s2 + $0xf0] sm:$0xff] %vm2062_vm3, %v1964_v14  ;;  %1469 = vrot.lane.b32.xlu1 %v2314_v20, %s2452_s10  ;;  %1467 = vrot.lane.b32.xlu0 %v2315_v21, %s2452_s10  ;;  %v1723_v49 = vsel %vm1675_vm0, %v2344_v47, %v6303_v34  ;;  %v1722_v51 = vsel %vm1675_vm0, %v2345_v48, %v6304_v53  ;;  %v6319_v34 = vld [vmem:[#allocation30_spill] sm:$0xff]  ;;  %v6320_v53 = vld [vmem:[#allocation31_spill] sm:$0xff] }
 0x2b3   :  { %v2330_v20 = vld [vmem:[%s6056_s1 + $0x308] sm:$0xff]  ;;  %v2331_v21 = vld [vmem:[%s6056_s1 + $0x300] sm:$0xff]  ;;  %v2360_v47 = vld [vmem:[%s6057_s0 + $0x1b8] sm:$0xff] }
 0x2b4   :  { %v1358_v60 = vpop.permute.xlu1 %1357  ;;  %v1356_v0 = vpop.permute.xlu0 %1355  ;;  %v2361_v48 = vld [vmem:[%s6057_s0 + $0x1b0] sm:$0xff] }
 0x2b5   :  { %v1967_v35 = vsel %vm1933_vm2, %v1838_v9, %v1358_v60  ;;  %v1966_v43 = vsel %vm1933_vm2, %v1837_v10, %v1356_v0  ;;  %v1846_v9 = vsel %vm1804_vm1, %v1717_v40, %v6293_v8  ;;  %v1845_v10 = vsel %vm1804_vm1, %v1716_v30, %v6294_v3  ;;  %v6309_v8 = vld [vmem:[#allocation126_spill] sm:$0xff]  ;;  %v6310_v3 = vld [vmem:[#allocation127_spill] sm:$0xff] }
 0x2b6   :  { %2096 = vst.msk [vmem:[%s6058_s2 + $0x108] sm:$0xff] %vm2062_vm3, %v1967_v35  ;;  %2095 = vst.msk [vmem:[%s6058_s2 + $0x100] sm:$0xff] %vm2062_vm3, %v1966_v43  ;;  %1473 = vrot.lane.b32.xlu1 %v2318_v44, %s2452_s10  ;;  %1471 = vrot.lane.b32.xlu0 %v2319_v45, %s2452_s10  ;;  %v1725_v40 = vsel %vm1675_vm0, %v2348_v39, %v6307_v18  ;;  %v1724_v30 = vsel %vm1675_vm0, %v2349_v41, %v6308_v63  ;;  %v6323_v18 = vld [vmem:[#allocation32_spill] sm:$0xff]  ;;  %v6324_v63 = vld [vmem:[#allocation33_spill] sm:$0xff] }
 0x2b7   :  { %v2334_v44 = vld [vmem:[%s6056_s1 + $0x318] sm:$0xff]  ;;  %v2335_v45 = vld [vmem:[%s6056_s1 + $0x310] sm:$0xff]  ;;  %v2364_v39 = vld [vmem:[%s6057_s0 + $0x1c8] sm:$0xff] }
 0x2b8   :  { %v1362_v12 = vpop.permute.xlu1 %1361  ;;  %v1360_v13 = vpop.permute.xlu0 %1359  ;;  %v2365_v41 = vld [vmem:[%s6057_s0 + $0x1c0] sm:$0xff] }
 0x2b9   :  { %v1969_v55 = vsel %vm1933_vm2, %v1840_v58, %v1362_v12  ;;  %v1968_v50 = vsel %vm1933_vm2, %v1839_v6, %v1360_v13  ;;  %v1848_v58 = vsel %vm1804_vm1, %v1719_v24, %v6297_v26  ;;  %v1847_v6 = vsel %vm1804_vm1, %v1718_v2, %v6298_v62  ;;  %v6313_v26 = vld [vmem:[#allocation128_spill] sm:$0xff]  ;;  %v6314_v62 = vld [vmem:[#allocation129_spill] sm:$0xff] }
 0x2ba   :  { %2098 = vst.msk [vmem:[%s6058_s2 + $0x118] sm:$0xff] %vm2062_vm3, %v1969_v55  ;;  %2097 = vst.msk [vmem:[%s6058_s2 + $0x110] sm:$0xff] %vm2062_vm3, %v1968_v50  ;;  %1477 = vrot.lane.b32.xlu1 %v2322_v28, %s2452_s10  ;;  %1475 = vrot.lane.b32.xlu0 %v2323_v29, %s2452_s10  ;;  %v1727_v24 = vsel %vm1675_vm0, %v2352_v57, %v6311_v22  ;;  %v1726_v2 = vsel %vm1675_vm0, %v2353_v25, %v6312_v31  ;;  %v6327_v22 = vld [vmem:[#allocation34_spill] sm:$0xff]  ;;  %v6328_v31 = vld [vmem:[#allocation35_spill] sm:$0xff] }
 0x2bb   :  { %v2338_v28 = vld [vmem:[%s6056_s1 + $0x328] sm:$0xff]  ;;  %v2339_v29 = vld [vmem:[%s6056_s1 + $0x320] sm:$0xff]  ;;  %v2368_v57 = vld [vmem:[%s6057_s0 + $0x1d8] sm:$0xff] }
 0x2bc   :  { %v1366_v32 = vpop.permute.xlu1 %1365  ;;  %v1364_v33 = vpop.permute.xlu0 %1363  ;;  %v2369_v25 = vld [vmem:[%s6057_s0 + $0x1d0] sm:$0xff] }
 0x2bd   :  { %v1971_v15 = vsel %vm1933_vm2, %v1842_v5, %v1366_v32  ;;  %v1970_v46 = vsel %vm1933_vm2, %v1841_v11, %v1364_v33  ;;  %v1850_v5 = vsel %vm1804_vm1, %v1721_v56, %v6301_v4  ;;  %v1849_v11 = vsel %vm1804_vm1, %v1720_v1, %v6302_v19  ;;  %v6317_v4 = vld [vmem:[#allocation130_spill] sm:$0xff]  ;;  %v6318_v19 = vld [vmem:[#allocation131_spill] sm:$0xff] }
 0x2be   :  { %2100 = vst.msk [vmem:[%s6058_s2 + $0x128] sm:$0xff] %vm2062_vm3, %v1971_v15  ;;  %2099 = vst.msk [vmem:[%s6058_s2 + $0x120] sm:$0xff] %vm2062_vm3, %v1970_v46  ;;  %1481 = vrot.lane.b32.xlu1 %v2326_v16, %s2452_s10  ;;  %1479 = vrot.lane.b32.xlu0 %v2327_v17, %s2452_s10  ;;  %v1729_v56 = vsel %vm1675_vm0, %v2356_v23, %v6315_v54  ;;  %v1728_v1 = vsel %vm1675_vm0, %v2357_v52, %v6316_v61  ;;  %v6331_v54 = vld [vmem:[#allocation36_spill] sm:$0xff]  ;;  %v6332_v61 = vld [vmem:[#allocation37_spill] sm:$0xff] }
 0x2bf   :  { %v2342_v16 = vld [vmem:[%s6056_s1 + $0x338] sm:$0xff]  ;;  %v2343_v17 = vld [vmem:[%s6056_s1 + $0x330] sm:$0xff]  ;;  %v2372_v23 = vld [vmem:[%s6057_s0 + $0x1e8] sm:$0xff] }
 0x2c0   :  { %v1370_v42 = vpop.permute.xlu1 %1369  ;;  %v1368_v27 = vpop.permute.xlu0 %1367  ;;  %v2373_v52 = vld [vmem:[%s6057_s0 + $0x1e0] sm:$0xff] }
 0x2c1   :  { %v1973_v59 = vsel %vm1933_vm2, %v1844_v37, %v1370_v42  ;;  %v1972_v14 = vsel %vm1933_vm2, %v1843_v38, %v1368_v27  ;;  %v1852_v37 = vsel %vm1804_vm1, %v1723_v49, %v6305_v36  ;;  %v1851_v38 = vsel %vm1804_vm1, %v1722_v51, %v6306_v7  ;;  %v6321_v36 = vld [vmem:[#allocation132_spill] sm:$0xff]  ;;  %v6322_v7 = vld [vmem:[#allocation133_spill] sm:$0xff] }
 0x2c2   :  { %2102 = vst.msk [vmem:[%s6058_s2 + $0x138] sm:$0xff] %vm2062_vm3, %v1973_v59  ;;  %2101 = vst.msk [vmem:[%s6058_s2 + $0x130] sm:$0xff] %vm2062_vm3, %v1972_v14  ;;  %1485 = vrot.lane.b32.xlu1 %v2330_v20, %s2452_s10  ;;  %1483 = vrot.lane.b32.xlu0 %v2331_v21, %s2452_s10  ;;  %v1731_v49 = vsel %vm1675_vm0, %v2360_v47, %v6319_v34  ;;  %v1730_v51 = vsel %vm1675_vm0, %v2361_v48, %v6320_v53  ;;  %v6335_v34 = vld [vmem:[#allocation38_spill] sm:$0xff]  ;;  %v6336_v53 = vld [vmem:[#allocation39_spill] sm:$0xff] }
 0x2c3   :  { %v2346_v20 = vld [vmem:[%s6056_s1 + $0x348] sm:$0xff]  ;;  %v2347_v21 = vld [vmem:[%s6056_s1 + $0x340] sm:$0xff]  ;;  %v2376_v47 = vld [vmem:[%s6057_s0 + $0x1f8] sm:$0xff] }
 0x2c4   :  { %v1374_v60 = vpop.permute.xlu1 %1373  ;;  %v1372_v0 = vpop.permute.xlu0 %1371  ;;  %v2377_v48 = vld [vmem:[%s6057_s0 + $0x1f0] sm:$0xff] }
 0x2c5   :  { %v1975_v35 = vsel %vm1933_vm2, %v1846_v9, %v1374_v60  ;;  %v1974_v43 = vsel %vm1933_vm2, %v1845_v10, %v1372_v0  ;;  %v1854_v9 = vsel %vm1804_vm1, %v1725_v40, %v6309_v8  ;;  %v1853_v10 = vsel %vm1804_vm1, %v1724_v30, %v6310_v3  ;;  %v6325_v8 = vld [vmem:[#allocation134_spill] sm:$0xff]  ;;  %v6326_v3 = vld [vmem:[#allocation135_spill] sm:$0xff] }
 0x2c6   :  { %2104 = vst.msk [vmem:[%s6058_s2 + $0x148] sm:$0xff] %vm2062_vm3, %v1975_v35  ;;  %2103 = vst.msk [vmem:[%s6058_s2 + $0x140] sm:$0xff] %vm2062_vm3, %v1974_v43  ;;  %1489 = vrot.lane.b32.xlu1 %v2334_v44, %s2452_s10  ;;  %1487 = vrot.lane.b32.xlu0 %v2335_v45, %s2452_s10  ;;  %v1733_v40 = vsel %vm1675_vm0, %v2364_v39, %v6323_v18  ;;  %v1732_v30 = vsel %vm1675_vm0, %v2365_v41, %v6324_v63  ;;  %v6339_v18 = vld [vmem:[#allocation40_spill] sm:$0xff]  ;;  %v6340_v63 = vld [vmem:[#allocation41_spill] sm:$0xff] }
 0x2c7   :  { %v2350_v44 = vld [vmem:[%s6056_s1 + $0x358] sm:$0xff]  ;;  %v2351_v45 = vld [vmem:[%s6056_s1 + $0x350] sm:$0xff]  ;;  %v2380_v39 = vld [vmem:[%s6057_s0 + $0x208] sm:$0xff] }
 0x2c8   :  { %v1378_v12 = vpop.permute.xlu1 %1377  ;;  %v1376_v13 = vpop.permute.xlu0 %1375  ;;  %v2381_v41 = vld [vmem:[%s6057_s0 + $0x200] sm:$0xff] }
 0x2c9   :  { %v1977_v55 = vsel %vm1933_vm2, %v1848_v58, %v1378_v12  ;;  %v1976_v50 = vsel %vm1933_vm2, %v1847_v6, %v1376_v13  ;;  %v1856_v58 = vsel %vm1804_vm1, %v1727_v24, %v6313_v26  ;;  %v1855_v6 = vsel %vm1804_vm1, %v1726_v2, %v6314_v62  ;;  %v6329_v26 = vld [vmem:[#allocation136_spill] sm:$0xff]  ;;  %v6330_v62 = vld [vmem:[#allocation137_spill] sm:$0xff] }
 0x2ca   :  { %2106 = vst.msk [vmem:[%s6058_s2 + $0x158] sm:$0xff] %vm2062_vm3, %v1977_v55  ;;  %2105 = vst.msk [vmem:[%s6058_s2 + $0x150] sm:$0xff] %vm2062_vm3, %v1976_v50  ;;  %1493 = vrot.lane.b32.xlu1 %v2338_v28, %s2452_s10  ;;  %1491 = vrot.lane.b32.xlu0 %v2339_v29, %s2452_s10  ;;  %v1735_v24 = vsel %vm1675_vm0, %v2368_v57, %v6327_v22  ;;  %v1734_v2 = vsel %vm1675_vm0, %v2369_v25, %v6328_v31  ;;  %v6343_v22 = vld [vmem:[#allocation42_spill] sm:$0xff]  ;;  %v6344_v31 = vld [vmem:[#allocation43_spill] sm:$0xff] }
 0x2cb   :  { %v2354_v28 = vld [vmem:[%s6056_s1 + $0x368] sm:$0xff]  ;;  %v2355_v29 = vld [vmem:[%s6056_s1 + $0x360] sm:$0xff]  ;;  %v2384_v57 = vld [vmem:[%s6057_s0 + $0x218] sm:$0xff] }
 0x2cc   :  { %v1382_v32 = vpop.permute.xlu1 %1381  ;;  %v1380_v33 = vpop.permute.xlu0 %1379  ;;  %v2385_v25 = vld [vmem:[%s6057_s0 + $0x210] sm:$0xff] }
 0x2cd   :  { %v1979_v15 = vsel %vm1933_vm2, %v1850_v5, %v1382_v32  ;;  %v1978_v46 = vsel %vm1933_vm2, %v1849_v11, %v1380_v33  ;;  %v1858_v5 = vsel %vm1804_vm1, %v1729_v56, %v6317_v4  ;;  %v1857_v11 = vsel %vm1804_vm1, %v1728_v1, %v6318_v19  ;;  %v6333_v4 = vld [vmem:[#allocation138_spill] sm:$0xff]  ;;  %v6334_v19 = vld [vmem:[#allocation139_spill] sm:$0xff] }
 0x2ce   :  { %2108 = vst.msk [vmem:[%s6058_s2 + $0x168] sm:$0xff] %vm2062_vm3, %v1979_v15  ;;  %2107 = vst.msk [vmem:[%s6058_s2 + $0x160] sm:$0xff] %vm2062_vm3, %v1978_v46  ;;  %1497 = vrot.lane.b32.xlu1 %v2342_v16, %s2452_s10  ;;  %1495 = vrot.lane.b32.xlu0 %v2343_v17, %s2452_s10  ;;  %v1737_v56 = vsel %vm1675_vm0, %v2372_v23, %v6331_v54  ;;  %v1736_v1 = vsel %vm1675_vm0, %v2373_v52, %v6332_v61  ;;  %v6347_v54 = vld [vmem:[#allocation44_spill] sm:$0xff]  ;;  %v6348_v61 = vld [vmem:[#allocation45_spill] sm:$0xff] }
 0x2cf   :  { %v2358_v16 = vld [vmem:[%s6056_s1 + $0x378] sm:$0xff]  ;;  %v2359_v17 = vld [vmem:[%s6056_s1 + $0x370] sm:$0xff]  ;;  %v2388_v23 = vld [vmem:[%s6057_s0 + $0x228] sm:$0xff] }
 0x2d0   :  { %v1386_v42 = vpop.permute.xlu1 %1385  ;;  %v1384_v27 = vpop.permute.xlu0 %1383  ;;  %v2389_v52 = vld [vmem:[%s6057_s0 + $0x220] sm:$0xff] }
 0x2d1   :  { %v1981_v59 = vsel %vm1933_vm2, %v1852_v37, %v1386_v42  ;;  %v1980_v14 = vsel %vm1933_vm2, %v1851_v38, %v1384_v27  ;;  %v1860_v37 = vsel %vm1804_vm1, %v1731_v49, %v6321_v36  ;;  %v1859_v38 = vsel %vm1804_vm1, %v1730_v51, %v6322_v7  ;;  %v6337_v36 = vld [vmem:[#allocation140_spill] sm:$0xff]  ;;  %v6338_v7 = vld [vmem:[#allocation141_spill] sm:$0xff] }
 0x2d2   :  { %2110 = vst.msk [vmem:[%s6058_s2 + $0x178] sm:$0xff] %vm2062_vm3, %v1981_v59  ;;  %2109 = vst.msk [vmem:[%s6058_s2 + $0x170] sm:$0xff] %vm2062_vm3, %v1980_v14  ;;  %1501 = vrot.lane.b32.xlu1 %v2346_v20, %s2452_s10  ;;  %1499 = vrot.lane.b32.xlu0 %v2347_v21, %s2452_s10  ;;  %v1739_v49 = vsel %vm1675_vm0, %v2376_v47, %v6335_v34  ;;  %v1738_v51 = vsel %vm1675_vm0, %v2377_v48, %v6336_v53  ;;  %v6351_v34 = vld [vmem:[#allocation46_spill] sm:$0xff]  ;;  %v6352_v53 = vld [vmem:[#allocation47_spill] sm:$0xff] }
 0x2d3   :  { %v2362_v20 = vld [vmem:[%s6056_s1 + $0x388] sm:$0xff]  ;;  %v2363_v21 = vld [vmem:[%s6056_s1 + $0x380] sm:$0xff]  ;;  %v2392_v47 = vld [vmem:[%s6057_s0 + $0x238] sm:$0xff] }
 0x2d4   :  { %v1390_v60 = vpop.permute.xlu1 %1389  ;;  %v1388_v0 = vpop.permute.xlu0 %1387  ;;  %v2393_v48 = vld [vmem:[%s6057_s0 + $0x230] sm:$0xff] }
 0x2d5   :  { %v1983_v35 = vsel %vm1933_vm2, %v1854_v9, %v1390_v60  ;;  %v1982_v43 = vsel %vm1933_vm2, %v1853_v10, %v1388_v0  ;;  %v1862_v9 = vsel %vm1804_vm1, %v1733_v40, %v6325_v8  ;;  %v1861_v10 = vsel %vm1804_vm1, %v1732_v30, %v6326_v3  ;;  %v6341_v8 = vld [vmem:[#allocation142_spill] sm:$0xff]  ;;  %v6342_v3 = vld [vmem:[#allocation143_spill] sm:$0xff] }
 0x2d6   :  { %2112 = vst.msk [vmem:[%s6058_s2 + $0x188] sm:$0xff] %vm2062_vm3, %v1983_v35  ;;  %2111 = vst.msk [vmem:[%s6058_s2 + $0x180] sm:$0xff] %vm2062_vm3, %v1982_v43  ;;  %1505 = vrot.lane.b32.xlu1 %v2350_v44, %s2452_s10  ;;  %1503 = vrot.lane.b32.xlu0 %v2351_v45, %s2452_s10  ;;  %v1741_v40 = vsel %vm1675_vm0, %v2380_v39, %v6339_v18  ;;  %v1740_v30 = vsel %vm1675_vm0, %v2381_v41, %v6340_v63  ;;  %v6357_v63 = vld [vmem:[#allocation150_spill] sm:$0xff] }
 0x2d7   :  { %v2366_v44 = vld [vmem:[%s6056_s1 + $0x398] sm:$0xff]  ;;  %v2367_v45 = vld [vmem:[%s6056_s1 + $0x390] sm:$0xff]  ;;  %v2395_v18 = vld [vmem:[%s6057_s0 + $0x240] sm:$0xff] }
 0x2d8   :  { %v1394_v12 = vpop.permute.xlu1 %1393  ;;  %v1392_v13 = vpop.permute.xlu0 %1391 }
 0x2d9   :  { %v1985_v55 = vsel %vm1933_vm2, %v1856_v58, %v1394_v12  ;;  %v1984_v50 = vsel %vm1933_vm2, %v1855_v6, %v1392_v13  ;;  %v1864_v58 = vsel %vm1804_vm1, %v1735_v24, %v6329_v26  ;;  %v1863_v6 = vsel %vm1804_vm1, %v1734_v2, %v6330_v62  ;;  %v6345_v26 = vld [vmem:[#allocation144_spill] sm:$0xff]  ;;  %v6346_v62 = vld [vmem:[#allocation145_spill] sm:$0xff] }
 0x2da   :  { %2114 = vst.msk [vmem:[%s6058_s2 + $0x198] sm:$0xff] %vm2062_vm3, %v1985_v55  ;;  %2113 = vst.msk [vmem:[%s6058_s2 + $0x190] sm:$0xff] %vm2062_vm3, %v1984_v50  ;;  %1509 = vrot.lane.b32.xlu1 %v2354_v28, %s2452_s10  ;;  %1507 = vrot.lane.b32.xlu0 %v2355_v29, %s2452_s10  ;;  %v1743_v24 = vsel %vm1675_vm0, %v2384_v57, %v6343_v22  ;;  %v1742_v2 = vsel %vm1675_vm0, %v2385_v25, %v6344_v31  ;;  %v6360_v57 = vld [vmem:[#allocation51_spill] sm:$0xff]  ;;  %v6362_v31 = vld [vmem:[#allocation153_spill] sm:$0xff] }
 0x2db   :  { %v2370_v28 = vld [vmem:[%s6056_s1 + $0x3a8] sm:$0xff]  ;;  %v2371_v29 = vld [vmem:[%s6056_s1 + $0x3a0] sm:$0xff] }
 0x2dc   :  { %v1398_v32 = vpop.permute.xlu1 %1397  ;;  %v1396_v33 = vpop.permute.xlu0 %1395 }
 0x2dd   :  { %v1987_v15 = vsel %vm1933_vm2, %v1858_v5, %v1398_v32  ;;  %v1986_v46 = vsel %vm1933_vm2, %v1857_v11, %v1396_v33  ;;  %v1866_v5 = vsel %vm1804_vm1, %v1737_v56, %v6333_v4  ;;  %v1865_v11 = vsel %vm1804_vm1, %v1736_v1, %v6334_v19  ;;  %v6349_v4 = vld [vmem:[#allocation146_spill] sm:$0xff]  ;;  %v6350_v19 = vld [vmem:[#allocation147_spill] sm:$0xff] }
 0x2de   :  { %2116 = vst.msk [vmem:[%s6058_s2 + $0x1a8] sm:$0xff] %vm2062_vm3, %v1987_v15  ;;  %2115 = vst.msk [vmem:[%s6058_s2 + $0x1a0] sm:$0xff] %vm2062_vm3, %v1986_v46  ;;  %1513 = vrot.lane.b32.xlu1 %v2358_v16, %s2452_s10  ;;  %1511 = vrot.lane.b32.xlu0 %v2359_v17, %s2452_s10  ;;  %v1745_v56 = vsel %vm1675_vm0, %v2388_v23, %v6347_v54  ;;  %v1744_v1 = vsel %vm1675_vm0, %v2389_v52, %v6348_v61  ;;  %v6365_v23 = vld [vmem:[#allocation154_spill] sm:$0xff] }
 0x2df   :  { %v2374_v16 = vld [vmem:[%s6056_s1 + $0x3b8] sm:$0xff]  ;;  %v2375_v17 = vld [vmem:[%s6056_s1 + $0x3b0] sm:$0xff] }
 0x2e0   :  { %v1402_v42 = vpop.permute.xlu1 %1401  ;;  %v1400_v27 = vpop.permute.xlu0 %1399 }
 0x2e1   :  { %v1989_v59 = vsel %vm1933_vm2, %v1860_v37, %v1402_v42  ;;  %v1988_v14 = vsel %vm1933_vm2, %v1859_v38, %v1400_v27  ;;  %v1868_v37 = vsel %vm1804_vm1, %v1739_v49, %v6337_v36  ;;  %v1867_v38 = vsel %vm1804_vm1, %v1738_v51, %v6338_v7  ;;  %v6353_v36 = vld [vmem:[#allocation148_spill] sm:$0xff]  ;;  %v6354_v7 = vld [vmem:[#allocation149_spill] sm:$0xff] }
 0x2e2   :  { %2118 = vst.msk [vmem:[%s6058_s2 + $0x1b8] sm:$0xff] %vm2062_vm3, %v1989_v59  ;;  %2117 = vst.msk [vmem:[%s6058_s2 + $0x1b0] sm:$0xff] %vm2062_vm3, %v1988_v14  ;;  %1517 = vrot.lane.b32.xlu1 %v2362_v20, %s2452_s10  ;;  %1515 = vrot.lane.b32.xlu0 %v2363_v21, %s2452_s10  ;;  %v1747_v49 = vsel %vm1675_vm0, %v2392_v47, %v6351_v34  ;;  %v1746_v51 = vsel %vm1675_vm0, %v2393_v48, %v6352_v53  ;;  %v6370_v47 = vld [vmem:[#allocation157_spill] sm:$0xff] }
 0x2e3   :  { %v2378_v20 = vld [vmem:[%s6056_s1 + $0x3c8] sm:$0xff]  ;;  %v2379_v21 = vld [vmem:[%s6056_s1 + $0x3c0] sm:$0xff] }
 0x2e4   :  { %v1406_v60 = vpop.permute.xlu1 %1405  ;;  %v1404_v0 = vpop.permute.xlu0 %1403 }
 0x2e5   :  { %v1991_v35 = vsel %vm1933_vm2, %v1862_v9, %v1406_v60  ;;  %v1990_v43 = vsel %vm1933_vm2, %v1861_v10, %v1404_v0  ;;  %v1870_v9 = vsel %vm1804_vm1, %v1741_v40, %v6341_v8  ;;  %v1869_v10 = vsel %vm1804_vm1, %v1740_v30, %v6342_v3  ;;  %v6356_v40 = vld [vmem:[#allocation49_spill] sm:$0xff]  ;;  %v6358_v8 = vld [vmem:[#allocation151_spill] sm:$0xff] }
 0x2e6   :  { %2120 = vst.msk [vmem:[%s6058_s2 + $0x1c8] sm:$0xff] %vm2062_vm3, %v1991_v35  ;;  %2119 = vst.msk [vmem:[%s6058_s2 + $0x1c0] sm:$0xff] %vm2062_vm3, %v1990_v43  ;;  %1521 = vrot.lane.b32.xlu1 %v2366_v44, %s2452_s10  ;;  %1519 = vrot.lane.b32.xlu0 %v2367_v45, %s2452_s10  ;;  %v1748_v41 = vsel %vm1675_vm0, %v2395_v18, %v6356_v40 }
 0x2e7   :  { %v2382_v44 = vld [vmem:[%s6056_s1 + $0x3d8] sm:$0xff]  ;;  %v2383_v45 = vld [vmem:[%s6056_s1 + $0x3d0] sm:$0xff] }
 0x2e8   :  { %v1410_v12 = vpop.permute.xlu1 %1409  ;;  %v1408_v13 = vpop.permute.xlu0 %1407 }
 0x2e9   :  { %v1993_v55 = vsel %vm1933_vm2, %v1864_v58, %v1410_v12  ;;  %v1992_v50 = vsel %vm1933_vm2, %v1863_v6, %v1408_v13  ;;  %v1872_v58 = vsel %vm1804_vm1, %v1743_v24, %v6345_v26  ;;  %v1871_v6 = vsel %vm1804_vm1, %v1742_v2, %v6346_v62  ;;  %v6361_v24 = vld [vmem:[#allocation152_spill] sm:$0xff] }
 0x2ea   :  { %2122 = vst.msk [vmem:[%s6058_s2 + $0x1d8] sm:$0xff] %vm2062_vm3, %v1993_v55  ;;  %2121 = vst.msk [vmem:[%s6058_s2 + $0x1d0] sm:$0xff] %vm2062_vm3, %v1992_v50  ;;  %1525 = vrot.lane.b32.xlu1 %v2370_v28, %s2452_s10  ;;  %1523 = vrot.lane.b32.xlu0 %v2371_v29, %s2452_s10 }
 0x2eb   :  { %v2386_v28 = vld [vmem:[%s6056_s1 + $0x3e8] sm:$0xff]  ;;  %v2387_v29 = vld [vmem:[%s6056_s1 + $0x3e0] sm:$0xff] }
 0x2ec   :  { %v1414_v32 = vpop.permute.xlu1 %1413  ;;  %v1412_v33 = vpop.permute.xlu0 %1411 }
 0x2ed   :  { %v1995_v15 = vsel %vm1933_vm2, %v1866_v5, %v1414_v32  ;;  %v1994_v46 = vsel %vm1933_vm2, %v1865_v11, %v1412_v33  ;;  %v1874_v5 = vsel %vm1804_vm1, %v1745_v56, %v6349_v4  ;;  %v1873_v11 = vsel %vm1804_vm1, %v1744_v1, %v6350_v19  ;;  %v6366_v56 = vld [vmem:[#allocation155_spill] sm:$0xff]  ;;  %v2400_v19 = vld [vmem:[%s6057_s0 + $0x278] sm:$0xff] }
 0x2ee   :  { %2124 = vst.msk [vmem:[%s6058_s2 + $0x1e8] sm:$0xff] %vm2062_vm3, %v1995_v15  ;;  %2123 = vst.msk [vmem:[%s6058_s2 + $0x1e0] sm:$0xff] %vm2062_vm3, %v1994_v46  ;;  %1529 = vrot.lane.b32.xlu1 %v2374_v16, %s2452_s10  ;;  %1527 = vrot.lane.b32.xlu0 %v2375_v17, %s2452_s10 }
 0x2ef   :  { %v2390_v16 = vld [vmem:[%s6056_s1 + $0x3f8] sm:$0xff]  ;;  %v2391_v17 = vld [vmem:[%s6056_s1 + $0x3f0] sm:$0xff] }
 0x2f0   :  { %v1418_v42 = vpop.permute.xlu1 %1417  ;;  %v1416_v27 = vpop.permute.xlu0 %1415 }
 0x2f1   :  { %v1997_v59 = vsel %vm1933_vm2, %v1868_v37, %v1418_v42  ;;  %v1996_v14 = vsel %vm1933_vm2, %v1867_v38, %v1416_v27  ;;  %v1876_v37 = vsel %vm1804_vm1, %v1747_v49, %v6353_v36  ;;  %v1875_v38 = vsel %vm1804_vm1, %v1746_v51, %v6354_v7  ;;  %v2402_v36 = vld [vmem:[%s6057_s0 + $0x288] sm:$0xff] }
 0x2f2   :  { %2126 = vst.msk [vmem:[%s6058_s2 + $0x1f8] sm:$0xff] %vm2062_vm3, %v1997_v59  ;;  %2125 = vst.msk [vmem:[%s6058_s2 + $0x1f0] sm:$0xff] %vm2062_vm3, %v1996_v14  ;;  %1533 = vrot.lane.b32.xlu1 %v2378_v20, %s2452_s10  ;;  %1531 = vrot.lane.b32.xlu0 %v2379_v21, %s2452_s10  ;;  %v6355_v21 = vld [vmem:[#allocation48_spill] sm:$0xff] }
 0x2f3   :  { %v2394_v20 = vld [vmem:[%s6057_s0 + $0x248] sm:$0xff] }
 0x2f4   :  { %v1422_v60 = vpop.permute.xlu1 %1421  ;;  %v1420_v0 = vpop.permute.xlu0 %1419  ;;  %v1749_v39 = vsel %vm1675_vm0, %v2394_v20, %v6355_v21  ;;  %v6374_v20 = vld [vmem:[#allocation159_spill] sm:$0xff] }
 0x2f5   :  { %v1999_v35 = vsel %vm1933_vm2, %v1870_v9, %v1422_v60  ;;  %v1998_v43 = vsel %vm1933_vm2, %v1869_v10, %v1420_v0  ;;  %v1878_v30 = vsel %vm1804_vm1, %v1749_v39, %v6357_v63  ;;  %v1877_v9 = vsel %vm1804_vm1, %v1748_v41, %v6358_v8  ;;  %v2404_v63 = vld [vmem:[%s6057_s0 + $0x298] sm:$0xff] }
 0x2f6   :  { %2128 = vst.msk [vmem:[%s6058_s2 + $0x208] sm:$0xff] %vm2062_vm3, %v1999_v35  ;;  %2127 = vst.msk [vmem:[%s6058_s2 + $0x200] sm:$0xff] %vm2062_vm3, %v1998_v43  ;;  %1537 = vrot.lane.b32.xlu1 %v2382_v44, %s2452_s10  ;;  %1535 = vrot.lane.b32.xlu0 %v2383_v45, %s2452_s10  ;;  %v6359_v43 = vld [vmem:[#allocation50_spill] sm:$0xff] }
 0x2f7   :  { %v2396_v35 = vld [vmem:[%s6057_s0 + $0x258] sm:$0xff]  ;;  %v2397_v45 = vld [vmem:[%s6057_s0 + $0x250] sm:$0xff] }
 0x2f8   :  { %v1426_v12 = vpop.permute.xlu1 %1425  ;;  %v1424_v13 = vpop.permute.xlu0 %1423  ;;  %v1751_v44 = vsel %vm1675_vm0, %v2396_v35, %v6359_v43  ;;  %v1750_v22 = vsel %vm1675_vm0, %v2397_v45, %v6360_v57  ;;  %v6378_v35 = vld [vmem:[#allocation161_spill] sm:$0xff] }
 0x2f9   :  { %v2001_v55 = vsel %vm1933_vm2, %v1872_v58, %v1426_v12  ;;  %v2000_v50 = vsel %vm1933_vm2, %v1871_v6, %v1424_v13  ;;  %v1880_v25 = vsel %vm1804_vm1, %v1751_v44, %v6361_v24  ;;  %v1879_v2 = vsel %vm1804_vm1, %v1750_v22, %v6362_v31  ;;  %v2398_v12 = vld [vmem:[%s6057_s0 + $0x268] sm:$0xff]  ;;  %v6363_v13 = vld [vmem:[#allocation52_spill] sm:$0xff] }
 0x2fa   :  { %2130 = vst.msk [vmem:[%s6058_s2 + $0x218] sm:$0xff] %vm2062_vm3, %v2001_v55  ;;  %2129 = vst.msk [vmem:[%s6058_s2 + $0x210] sm:$0xff] %vm2062_vm3, %v2000_v50  ;;  %1541 = vrot.lane.b32.xlu1 %v2386_v28, %s2452_s10  ;;  %1539 = vrot.lane.b32.xlu0 %v2387_v29, %s2452_s10  ;;  %v1753_v55 = vsel %vm1675_vm0, %v2398_v12, %v6363_v13  ;;  %v6364_v28 = vld [vmem:[#allocation53_spill] sm:$0xff]  ;;  %v6382_v12 = vld [vmem:[#allocation163_spill] sm:$0xff] }
 0x2fb   :  { %v2399_v50 = vld [vmem:[%s6057_s0 + $0x260] sm:$0xff]  ;;  %v1882_v54 = vsel %vm1804_vm1, %v1753_v55, %v6365_v23  ;;  %v2406_v24 = vld [vmem:[%s6057_s0 + $0x2a8] sm:$0xff]  ;;  %v2408_v23 = vld [vmem:[%s6057_s0 + $0x2b8] sm:$0xff] }
 0x2fc   :  { %v1430_v32 = vpop.permute.xlu1 %1429  ;;  %v1428_v33 = vpop.permute.xlu0 %1427  ;;  %v1752_v29 = vsel %vm1675_vm0, %v2399_v50, %v6364_v28 }
 0x2fd   :  { %v2003_v15 = vsel %vm1933_vm2, %v1874_v5, %v1430_v32  ;;  %v2002_v46 = vsel %vm1933_vm2, %v1873_v11, %v1428_v33  ;;  %v1881_v52 = vsel %vm1804_vm1, %v1752_v29, %v6366_v56  ;;  %v6367_v11 = vld [vmem:[#allocation54_spill] sm:$0xff]  ;;  %v2401_v33 = vld [vmem:[%s6057_s0 + $0x270] sm:$0xff] }
 0x2fe   :  { %2132 = vst.msk [vmem:[%s6058_s2 + $0x228] sm:$0xff] %vm2062_vm3, %v2003_v15  ;;  %2131 = vst.msk [vmem:[%s6058_s2 + $0x220] sm:$0xff] %vm2062_vm3, %v2002_v46  ;;  %1545 = vrot.lane.b32.xlu1 %v2390_v16, %s2452_s10  ;;  %1543 = vrot.lane.b32.xlu0 %v2391_v17, %s2452_s10  ;;  %v1755_v32 = vsel %vm1675_vm0, %v2400_v19, %v6367_v11  ;;  %v6368_v15 = vld [vmem:[#allocation55_spill] sm:$0xff]  ;;  %v6369_v16 = vld [vmem:[#allocation156_spill] sm:$0xff] }
 0x2ff   :  { %v1754_v46 = vsel %vm1675_vm0, %v2401_v33, %v6368_v15  ;;  %v1884_v17 = vsel %vm1804_vm1, %v1755_v32, %v6369_v16  ;;  %v6386_v19 = vld [vmem:[#allocation165_spill] sm:$0xff]  ;;  %v2410_v16 = vld [vmem:[%s6057_s0 + $0x2c8] sm:$0xff] }
 0x300   :  { %v1434_v42 = vpop.permute.xlu1 %1433  ;;  %v1432_v27 = vpop.permute.xlu0 %1431  ;;  %v1883_v34 = vsel %vm1804_vm1, %v1754_v46, %v6370_v47 }
 0x301   :  { %v2005_v59 = vsel %vm1933_vm2, %v1876_v37, %v1434_v42  ;;  %v2004_v14 = vsel %vm1933_vm2, %v1875_v38, %v1432_v27  ;;  %v6371_v37 = vld [vmem:[#allocation56_spill] sm:$0xff]  ;;  %v2403_v38 = vld [vmem:[%s6057_s0 + $0x280] sm:$0xff]  ;;  %v6372_v42 = vld [vmem:[#allocation57_spill] sm:$0xff] }
 0x302   :  { %2134 = vst.msk [vmem:[%s6058_s2 + $0x238] sm:$0xff] %vm2062_vm3, %v2005_v59  ;;  %2133 = vst.msk [vmem:[%s6058_s2 + $0x230] sm:$0xff] %vm2062_vm3, %v2004_v14  ;;  %v1757_v7 = vsel %vm1675_vm0, %v2402_v36, %v6371_v37  ;;  %v1756_v27 = vsel %vm1675_vm0, %v2403_v38, %v6372_v42  ;;  %v6373_v59 = vld [vmem:[#allocation158_spill] sm:$0xff]  ;;  %v6390_v36 = vld [vmem:[#allocation167_spill] sm:$0xff] }
 0x303   :  { %v1886_v14 = vsel %vm1804_vm1, %v1757_v7, %v6373_v59  ;;  %v1885_v21 = vsel %vm1804_vm1, %v1756_v27, %v6374_v20  ;;  %v2412_v59 = vld [vmem:[%s6057_s0 + $0x2d8] sm:$0xff] }
 0x304   :  { %v1438_v3 = vpop.permute.xlu1 %1437  ;;  %v1436_v10 = vpop.permute.xlu0 %1435 }
 0x305   :  { %v2007_v60 = vsel %vm1933_vm2, %v1878_v30, %v1438_v3  ;;  %v2006_v0 = vsel %vm1933_vm2, %v1877_v9, %v1436_v10  ;;  %v6375_v30 = vld [vmem:[#allocation58_spill] sm:$0xff]  ;;  %v2405_v9 = vld [vmem:[%s6057_s0 + $0x290] sm:$0xff]  ;;  %v6376_v3 = vld [vmem:[#allocation59_spill] sm:$0xff] }
 0x306   :  { %2136 = vst.msk [vmem:[%s6058_s2 + $0x248] sm:$0xff] %vm2062_vm3, %v2007_v60  ;;  %2135 = vst.msk [vmem:[%s6058_s2 + $0x240] sm:$0xff] %vm2062_vm3, %v2006_v0  ;;  %v1759_v8 = vsel %vm1675_vm0, %v2404_v63, %v6375_v30  ;;  %v1758_v10 = vsel %vm1675_vm0, %v2405_v9, %v6376_v3  ;;  %v6377_v60 = vld [vmem:[#allocation160_spill] sm:$0xff]  ;;  %v6394_v63 = vld [vmem:[#allocation169_spill] sm:$0xff] }
 0x307   :  { %v1888_v0 = vsel %vm1804_vm1, %v1759_v8, %v6377_v60  ;;  %v1887_v43 = vsel %vm1804_vm1, %v1758_v10, %v6378_v35  ;;  %v2414_v60 = vld [vmem:[%s6057_s0 + $0x2e8] sm:$0xff] }
 0x308   :  { %v1442_v26 = vpop.permute.xlu1 %1441  ;;  %v1440_v58 = vpop.permute.xlu0 %1439 }
 0x309   :  { %v2009_v62 = vsel %vm1933_vm2, %v1880_v25, %v1442_v26  ;;  %v2008_v6 = vsel %vm1933_vm2, %v1879_v2, %v1440_v58  ;;  %v6379_v25 = vld [vmem:[#allocation60_spill] sm:$0xff]  ;;  %v2407_v2 = vld [vmem:[%s6057_s0 + $0x2a0] sm:$0xff]  ;;  %v6380_v26 = vld [vmem:[#allocation61_spill] sm:$0xff] }
 0x30a   :  { %2138 = vst.msk [vmem:[%s6058_s2 + $0x258] sm:$0xff] %vm2062_vm3, %v2009_v62  ;;  %2137 = vst.msk [vmem:[%s6058_s2 + $0x250] sm:$0xff] %vm2062_vm3, %v2008_v6  ;;  %v1761_v31 = vsel %vm1675_vm0, %v2406_v24, %v6379_v25  ;;  %v1760_v58 = vsel %vm1675_vm0, %v2407_v2, %v6380_v26  ;;  %v6381_v62 = vld [vmem:[#allocation162_spill] sm:$0xff]  ;;  %v6398_v24 = vld [vmem:[#allocation171_spill] sm:$0xff] }
 0x30b   :  { %v1890_v6 = vsel %vm1804_vm1, %v1761_v31, %v6381_v62  ;;  %v1889_v13 = vsel %vm1804_vm1, %v1760_v58, %v6382_v12  ;;  %v2416_v62 = vld [vmem:[%s6057_s0 + $0x2f8] sm:$0xff] }
 0x30c   :  { %v1446_v61 = vpop.permute.xlu1 %1445  ;;  %v1444_v1 = vpop.permute.xlu0 %1443 }
 0x30d   :  { %v2011_v4 = vsel %vm1933_vm2, %v1882_v54, %v1446_v61  ;;  %v2010_v5 = vsel %vm1933_vm2, %v1881_v52, %v1444_v1  ;;  %v6383_v54 = vld [vmem:[#allocation62_spill] sm:$0xff]  ;;  %v2409_v52 = vld [vmem:[%s6057_s0 + $0x2b0] sm:$0xff]  ;;  %v6384_v61 = vld [vmem:[#allocation63_spill] sm:$0xff] }
 0x30e   :  { %2140 = vst.msk [vmem:[%s6058_s2 + $0x268] sm:$0xff] %vm2062_vm3, %v2011_v4  ;;  %2139 = vst.msk [vmem:[%s6058_s2 + $0x260] sm:$0xff] %vm2062_vm3, %v2010_v5  ;;  %v1763_v56 = vsel %vm1675_vm0, %v2408_v23, %v6383_v54  ;;  %v1762_v1 = vsel %vm1675_vm0, %v2409_v52, %v6384_v61  ;;  %v6385_v4 = vld [vmem:[#allocation164_spill] sm:$0xff]  ;;  %v6402_v23 = vld [vmem:[#allocation173_spill] sm:$0xff] }
 0x30f   :  { %v1892_v5 = vsel %vm1804_vm1, %v1763_v56, %v6385_v4  ;;  %v1891_v11 = vsel %vm1804_vm1, %v1762_v1, %v6386_v19  ;;  %v2418_v4 = vld [vmem:[%s6057_s0 + $0x308] sm:$0xff] }
 0x310   :  { %v1450_v49 = vpop.permute.xlu1 %1449  ;;  %v1448_v48 = vpop.permute.xlu0 %1447 }
 0x311   :  { %v2013_v53 = vsel %vm1933_vm2, %v1884_v17, %v1450_v49  ;;  %v2012_v51 = vsel %vm1933_vm2, %v1883_v34, %v1448_v48  ;;  %v6387_v17 = vld [vmem:[#allocation64_spill] sm:$0xff]  ;;  %v2411_v34 = vld [vmem:[%s6057_s0 + $0x2c0] sm:$0xff]  ;;  %v6388_v49 = vld [vmem:[#allocation65_spill] sm:$0xff] }
 0x312   :  { %2142 = vst.msk [vmem:[%s6058_s2 + $0x278] sm:$0xff] %vm2062_vm3, %v2013_v53  ;;  %2141 = vst.msk [vmem:[%s6058_s2 + $0x270] sm:$0xff] %vm2062_vm3, %v2012_v51  ;;  %v1765_v47 = vsel %vm1675_vm0, %v2410_v16, %v6387_v17  ;;  %v1764_v48 = vsel %vm1675_vm0, %v2411_v34, %v6388_v49  ;;  %v6389_v53 = vld [vmem:[#allocation166_spill] sm:$0xff]  ;;  %v6406_v16 = vld [vmem:[#allocation175_spill] sm:$0xff] }
 0x313   :  { %v1894_v51 = vsel %vm1804_vm1, %v1765_v47, %v6389_v53  ;;  %v1893_v37 = vsel %vm1804_vm1, %v1764_v48, %v6390_v36  ;;  %v2420_v53 = vld [vmem:[%s6057_s0 + $0x318] sm:$0xff] }
 0x314   :  { %v1454_v39 = vpop.permute.xlu1 %1453  ;;  %v1452_v18 = vpop.permute.xlu0 %1451 }
 0x315   :  { %v2015_v40 = vsel %vm1933_vm2, %v1886_v14, %v1454_v39  ;;  %v2014_v41 = vsel %vm1933_vm2, %v1885_v21, %v1452_v18  ;;  %v6391_v14 = vld [vmem:[#allocation66_spill] sm:$0xff]  ;;  %v2413_v21 = vld [vmem:[%s6057_s0 + $0x2d0] sm:$0xff]  ;;  %v6392_v39 = vld [vmem:[#allocation67_spill] sm:$0xff] }
 0x316   :  { %2144 = vst.msk [vmem:[%s6058_s2 + $0x288] sm:$0xff] %vm2062_vm3, %v2015_v40  ;;  %2143 = vst.msk [vmem:[%s6058_s2 + $0x280] sm:$0xff] %vm2062_vm3, %v2014_v41  ;;  %v1767_v20 = vsel %vm1675_vm0, %v2412_v59, %v6391_v14  ;;  %v1766_v18 = vsel %vm1675_vm0, %v2413_v21, %v6392_v39  ;;  %v6393_v40 = vld [vmem:[#allocation168_spill] sm:$0xff]  ;;  %v6410_v59 = vld [vmem:[#allocation177_spill] sm:$0xff] }
 0x317   :  { %v1896_v41 = vsel %vm1804_vm1, %v1767_v20, %v6393_v40  ;;  %v1895_v30 = vsel %vm1804_vm1, %v1766_v18, %v6394_v63  ;;  %v2422_v40 = vld [vmem:[%s6057_s0 + $0x328] sm:$0xff] }
 0x318   :  { %v1458_v44 = vpop.permute.xlu1 %1457  ;;  %v1456_v45 = vpop.permute.xlu0 %1455 }
 0x319   :  { %v2017_v57 = vsel %vm1933_vm2, %v1888_v0, %v1458_v44  ;;  %v2016_v22 = vsel %vm1933_vm2, %v1887_v43, %v1456_v45  ;;  %v6395_v0 = vld [vmem:[#allocation68_spill] sm:$0xff]  ;;  %v2415_v43 = vld [vmem:[%s6057_s0 + $0x2e0] sm:$0xff]  ;;  %v6396_v44 = vld [vmem:[#allocation69_spill] sm:$0xff] }
 0x31a   :  { %2146 = vst.msk [vmem:[%s6058_s2 + $0x298] sm:$0xff] %vm2062_vm3, %v2017_v57  ;;  %2145 = vst.msk [vmem:[%s6058_s2 + $0x290] sm:$0xff] %vm2062_vm3, %v2016_v22  ;;  %v1769_v35 = vsel %vm1675_vm0, %v2414_v60, %v6395_v0  ;;  %v1768_v45 = vsel %vm1675_vm0, %v2415_v43, %v6396_v44  ;;  %v6397_v57 = vld [vmem:[#allocation170_spill] sm:$0xff]  ;;  %v6414_v60 = vld [vmem:[#allocation179_spill] sm:$0xff] }
 0x31b   :  { %v1898_v22 = vsel %vm1804_vm1, %v1769_v35, %v6397_v57  ;;  %v1897_v25 = vsel %vm1804_vm1, %v1768_v45, %v6398_v24  ;;  %v2424_v57 = vld [vmem:[%s6057_s0 + $0x338] sm:$0xff] }
 0x31c   :  { %v1462_v55 = vpop.permute.xlu1 %1461  ;;  %v1460_v50 = vpop.permute.xlu0 %1459 }
 0x31d   :  { %v2019_v28 = vsel %vm1933_vm2, %v1890_v6, %v1462_v55  ;;  %v2018_v29 = vsel %vm1933_vm2, %v1889_v13, %v1460_v50  ;;  %v6399_v6 = vld [vmem:[#allocation70_spill] sm:$0xff]  ;;  %v2417_v13 = vld [vmem:[%s6057_s0 + $0x2f0] sm:$0xff]  ;;  %v6400_v55 = vld [vmem:[#allocation71_spill] sm:$0xff] }
 0x31e   :  { %2148 = vst.msk [vmem:[%s6058_s2 + $0x2a8] sm:$0xff] %vm2062_vm3, %v2019_v28  ;;  %2147 = vst.msk [vmem:[%s6058_s2 + $0x2a0] sm:$0xff] %vm2062_vm3, %v2018_v29  ;;  %v1771_v12 = vsel %vm1675_vm0, %v2416_v62, %v6399_v6  ;;  %v1770_v50 = vsel %vm1675_vm0, %v2417_v13, %v6400_v55  ;;  %v6401_v28 = vld [vmem:[#allocation172_spill] sm:$0xff]  ;;  %v6418_v62 = vld [vmem:[#allocation181_spill] sm:$0xff] }
 0x31f   :  { %v1900_v29 = vsel %vm1804_vm1, %v1771_v12, %v6401_v28  ;;  %v1899_v54 = vsel %vm1804_vm1, %v1770_v50, %v6402_v23  ;;  %v2426_v28 = vld [vmem:[%s6057_s0 + $0x348] sm:$0xff] }
 0x320   :  { %v1466_v32 = vpop.permute.xlu1 %1465  ;;  %v1464_v33 = vpop.permute.xlu0 %1463 }
 0x321   :  { %v2021_v15 = vsel %vm1933_vm2, %v1892_v5, %v1466_v32  ;;  %v2020_v46 = vsel %vm1933_vm2, %v1891_v11, %v1464_v33  ;;  %v6403_v5 = vld [vmem:[#allocation72_spill] sm:$0xff]  ;;  %v2419_v11 = vld [vmem:[%s6057_s0 + $0x300] sm:$0xff]  ;;  %v6404_v32 = vld [vmem:[#allocation73_spill] sm:$0xff] }
 0x322   :  { %2150 = vst.msk [vmem:[%s6058_s2 + $0x2b8] sm:$0xff] %vm2062_vm3, %v2021_v15  ;;  %2149 = vst.msk [vmem:[%s6058_s2 + $0x2b0] sm:$0xff] %vm2062_vm3, %v2020_v46  ;;  %v1773_v19 = vsel %vm1675_vm0, %v2418_v4, %v6403_v5  ;;  %v1772_v33 = vsel %vm1675_vm0, %v2419_v11, %v6404_v32  ;;  %v6405_v15 = vld [vmem:[#allocation174_spill] sm:$0xff]  ;;  %v6422_v4 = vld [vmem:[#allocation183_spill] sm:$0xff] }
 0x323   :  { %v1902_v46 = vsel %vm1804_vm1, %v1773_v19, %v6405_v15  ;;  %v1901_v17 = vsel %vm1804_vm1, %v1772_v33, %v6406_v16  ;;  %v2428_v15 = vld [vmem:[%s6057_s0 + $0x358] sm:$0xff] }
 0x324   :  { %v1470_v7 = vpop.permute.xlu1 %1469  ;;  %v1468_v38 = vpop.permute.xlu0 %1467 }
 0x325   :  { %v2023_v42 = vsel %vm1933_vm2, %v1894_v51, %v1470_v7  ;;  %v2022_v27 = vsel %vm1933_vm2, %v1893_v37, %v1468_v38  ;;  %v6407_v51 = vld [vmem:[#allocation74_spill] sm:$0xff]  ;;  %v2421_v37 = vld [vmem:[%s6057_s0 + $0x310] sm:$0xff]  ;;  %v6408_v7 = vld [vmem:[#allocation75_spill] sm:$0xff] }
 0x326   :  { %2152 = vst.msk [vmem:[%s6058_s2 + $0x2c8] sm:$0xff] %vm2062_vm3, %v2023_v42  ;;  %2151 = vst.msk [vmem:[%s6058_s2 + $0x2c0] sm:$0xff] %vm2062_vm3, %v2022_v27  ;;  %v1775_v36 = vsel %vm1675_vm0, %v2420_v53, %v6407_v51  ;;  %v1774_v38 = vsel %vm1675_vm0, %v2421_v37, %v6408_v7  ;;  %v6409_v42 = vld [vmem:[#allocation176_spill] sm:$0xff]  ;;  %v6426_v53 = vld [vmem:[#allocation185_spill] sm:$0xff] }
 0x327   :  { %v1904_v27 = vsel %vm1804_vm1, %v1775_v36, %v6409_v42  ;;  %v1903_v14 = vsel %vm1804_vm1, %v1774_v38, %v6410_v59  ;;  %v2430_v42 = vld [vmem:[%s6057_s0 + $0x368] sm:$0xff] }
 0x328   :  { %v1474_v8 = vpop.permute.xlu1 %1473  ;;  %v1472_v9 = vpop.permute.xlu0 %1471 }
 0x329   :  { %v2025_v3 = vsel %vm1933_vm2, %v1896_v41, %v1474_v8  ;;  %v2024_v10 = vsel %vm1933_vm2, %v1895_v30, %v1472_v9  ;;  %v6411_v41 = vld [vmem:[#allocation76_spill] sm:$0xff]  ;;  %v2423_v30 = vld [vmem:[%s6057_s0 + $0x320] sm:$0xff]  ;;  %v6412_v8 = vld [vmem:[#allocation77_spill] sm:$0xff] }
 0x32a   :  { %2154 = vst.msk [vmem:[%s6058_s2 + $0x2d8] sm:$0xff] %vm2062_vm3, %v2025_v3  ;;  %2153 = vst.msk [vmem:[%s6058_s2 + $0x2d0] sm:$0xff] %vm2062_vm3, %v2024_v10  ;;  %v1777_v63 = vsel %vm1675_vm0, %v2422_v40, %v6411_v41  ;;  %v1776_v9 = vsel %vm1675_vm0, %v2423_v30, %v6412_v8  ;;  %v6413_v3 = vld [vmem:[#allocation178_spill] sm:$0xff]  ;;  %v6430_v40 = vld [vmem:[#allocation187_spill] sm:$0xff] }
 0x32b   :  { %v1906_v10 = vsel %vm1804_vm1, %v1777_v63, %v6413_v3  ;;  %v1905_v0 = vsel %vm1804_vm1, %v1776_v9, %v6414_v60  ;;  %v2432_v3 = vld [vmem:[%s6057_s0 + $0x378] sm:$0xff] }
 0x32c   :  { %v1478_v31 = vpop.permute.xlu1 %1477  ;;  %v1476_v2 = vpop.permute.xlu0 %1475 }
 0x32d   :  { %v2027_v26 = vsel %vm1933_vm2, %v1898_v22, %v1478_v31  ;;  %v2026_v58 = vsel %vm1933_vm2, %v1897_v25, %v1476_v2  ;;  %v6415_v22 = vld [vmem:[#allocation78_spill] sm:$0xff]  ;;  %v2425_v25 = vld [vmem:[%s6057_s0 + $0x330] sm:$0xff]  ;;  %v6416_v31 = vld [vmem:[#allocation79_spill] sm:$0xff] }
 0x32e   :  { %2156 = vst.msk [vmem:[%s6058_s2 + $0x2e8] sm:$0xff] %vm2062_vm3, %v2027_v26  ;;  %2155 = vst.msk [vmem:[%s6058_s2 + $0x2e0] sm:$0xff] %vm2062_vm3, %v2026_v58  ;;  %v1779_v24 = vsel %vm1675_vm0, %v2424_v57, %v6415_v22  ;;  %v1778_v2 = vsel %vm1675_vm0, %v2425_v25, %v6416_v31  ;;  %v6417_v26 = vld [vmem:[#allocation180_spill] sm:$0xff]  ;;  %v6434_v57 = vld [vmem:[#allocation189_spill] sm:$0xff] }
 0x32f   :  { %v1908_v58 = vsel %vm1804_vm1, %v1779_v24, %v6417_v26  ;;  %v1907_v6 = vsel %vm1804_vm1, %v1778_v2, %v6418_v62  ;;  %v2434_v26 = vld [vmem:[%s6057_s0 + $0x388] sm:$0xff] }
 0x330   :  { %v1482_v56 = vpop.permute.xlu1 %1481  ;;  %v1480_v52 = vpop.permute.xlu0 %1479 }
 0x331   :  { %v2029_v61 = vsel %vm1933_vm2, %v1900_v29, %v1482_v56  ;;  %v2028_v1 = vsel %vm1933_vm2, %v1899_v54, %v1480_v52  ;;  %v6419_v29 = vld [vmem:[#allocation80_spill] sm:$0xff]  ;;  %v2427_v54 = vld [vmem:[%s6057_s0 + $0x340] sm:$0xff]  ;;  %v6420_v56 = vld [vmem:[#allocation81_spill] sm:$0xff] }
 0x332   :  { %2158 = vst.msk [vmem:[%s6058_s2 + $0x2f8] sm:$0xff] %vm2062_vm3, %v2029_v61  ;;  %2157 = vst.msk [vmem:[%s6058_s2 + $0x2f0] sm:$0xff] %vm2062_vm3, %v2028_v1  ;;  %v1781_v23 = vsel %vm1675_vm0, %v2426_v28, %v6419_v29  ;;  %v1780_v52 = vsel %vm1675_vm0, %v2427_v54, %v6420_v56  ;;  %v6421_v61 = vld [vmem:[#allocation182_spill] sm:$0xff]  ;;  %v6438_v28 = vld [vmem:[#allocation191_spill] sm:$0xff] }
 0x333   :  { %v1910_v1 = vsel %vm1804_vm1, %v1781_v23, %v6421_v61  ;;  %v1909_v5 = vsel %vm1804_vm1, %v1780_v52, %v6422_v4  ;;  %v2436_v61 = vld [vmem:[%s6057_s0 + $0x398] sm:$0xff] }
 0x334   :  { %v1486_v47 = vpop.permute.xlu1 %1485  ;;  %v1484_v34 = vpop.permute.xlu0 %1483 }
 0x335   :  { %v2031_v49 = vsel %vm1933_vm2, %v1902_v46, %v1486_v47  ;;  %v2030_v48 = vsel %vm1933_vm2, %v1901_v17, %v1484_v34  ;;  %v6423_v46 = vld [vmem:[#allocation82_spill] sm:$0xff]  ;;  %v2429_v17 = vld [vmem:[%s6057_s0 + $0x350] sm:$0xff]  ;;  %v6424_v47 = vld [vmem:[#allocation83_spill] sm:$0xff] }
 0x336   :  { %2160 = vst.msk [vmem:[%s6058_s2 + $0x308] sm:$0xff] %vm2062_vm3, %v2031_v49  ;;  %2159 = vst.msk [vmem:[%s6058_s2 + $0x300] sm:$0xff] %vm2062_vm3, %v2030_v48  ;;  %v1783_v16 = vsel %vm1675_vm0, %v2428_v15, %v6423_v46  ;;  %v1782_v34 = vsel %vm1675_vm0, %v2429_v17, %v6424_v47  ;;  %v6425_v49 = vld [vmem:[#allocation184_spill] sm:$0xff]  ;;  %v6442_v15 = vld [vmem:[#allocation193_spill] sm:$0xff] }
 0x337   :  { %v1912_v48 = vsel %vm1804_vm1, %v1783_v16, %v6425_v49  ;;  %v1911_v51 = vsel %vm1804_vm1, %v1782_v34, %v6426_v53  ;;  %v2438_v49 = vld [vmem:[%s6057_s0 + $0x3a8] sm:$0xff] }
 0x338   :  { %v1490_v20 = vpop.permute.xlu1 %1489  ;;  %v1488_v21 = vpop.permute.xlu0 %1487 }
 0x339   :  { %v2033_v39 = vsel %vm1933_vm2, %v1904_v27, %v1490_v20  ;;  %v2032_v18 = vsel %vm1933_vm2, %v1903_v14, %v1488_v21  ;;  %v6427_v27 = vld [vmem:[#allocation84_spill] sm:$0xff]  ;;  %v2431_v14 = vld [vmem:[%s6057_s0 + $0x360] sm:$0xff]  ;;  %v6428_v20 = vld [vmem:[#allocation85_spill] sm:$0xff] }
 0x33a   :  { %2162 = vst.msk [vmem:[%s6058_s2 + $0x318] sm:$0xff] %vm2062_vm3, %v2033_v39  ;;  %2161 = vst.msk [vmem:[%s6058_s2 + $0x310] sm:$0xff] %vm2062_vm3, %v2032_v18  ;;  %v1785_v59 = vsel %vm1675_vm0, %v2430_v42, %v6427_v27  ;;  %v1784_v21 = vsel %vm1675_vm0, %v2431_v14, %v6428_v20  ;;  %v6429_v39 = vld [vmem:[#allocation186_spill] sm:$0xff]  ;;  %v6446_v42 = vld [vmem:[#allocation195_spill] sm:$0xff] }
 0x33b   :  { %v1914_v18 = vsel %vm1804_vm1, %v1785_v59, %v6429_v39  ;;  %v1913_v41 = vsel %vm1804_vm1, %v1784_v21, %v6430_v40  ;;  %v2440_v39 = vld [vmem:[%s6057_s0 + $0x3b8] sm:$0xff] }
 0x33c   :  { %v1494_v35 = vpop.permute.xlu1 %1493  ;;  %v1492_v43 = vpop.permute.xlu0 %1491 }
 0x33d   :  { %v2035_v44 = vsel %vm1933_vm2, %v1906_v10, %v1494_v35  ;;  %v2034_v45 = vsel %vm1933_vm2, %v1905_v0, %v1492_v43  ;;  %v6431_v10 = vld [vmem:[#allocation86_spill] sm:$0xff]  ;;  %v2433_v0 = vld [vmem:[%s6057_s0 + $0x370] sm:$0xff]  ;;  %v6432_v35 = vld [vmem:[#allocation87_spill] sm:$0xff] }
 0x33e   :  { %2164 = vst.msk [vmem:[%s6058_s2 + $0x328] sm:$0xff] %vm2062_vm3, %v2035_v44  ;;  %2163 = vst.msk [vmem:[%s6058_s2 + $0x320] sm:$0xff] %vm2062_vm3, %v2034_v45  ;;  %v1787_v60 = vsel %vm1675_vm0, %v2432_v3, %v6431_v10  ;;  %v1786_v43 = vsel %vm1675_vm0, %v2433_v0, %v6432_v35  ;;  %v6433_v44 = vld [vmem:[#allocation188_spill] sm:$0xff]  ;;  %v6450_v3 = vld [vmem:[#allocation197_spill] sm:$0xff] }
 0x33f   :  { %v1916_v45 = vsel %vm1804_vm1, %v1787_v60, %v6433_v44  ;;  %v1915_v22 = vsel %vm1804_vm1, %v1786_v43, %v6434_v57  ;;  %v2442_v44 = vld [vmem:[%s6057_s0 + $0x3c8] sm:$0xff] }
 0x340   :  { %v1498_v12 = vpop.permute.xlu1 %1497  ;;  %v1496_v13 = vpop.permute.xlu0 %1495 }
 0x341   :  { %v2037_v55 = vsel %vm1933_vm2, %v1908_v58, %v1498_v12  ;;  %v2036_v50 = vsel %vm1933_vm2, %v1907_v6, %v1496_v13  ;;  %v6435_v58 = vld [vmem:[#allocation88_spill] sm:$0xff]  ;;  %v2435_v6 = vld [vmem:[%s6057_s0 + $0x380] sm:$0xff]  ;;  %v6436_v12 = vld [vmem:[#allocation89_spill] sm:$0xff] }
 0x342   :  { %2166 = vst.msk [vmem:[%s6058_s2 + $0x338] sm:$0xff] %vm2062_vm3, %v2037_v55  ;;  %2165 = vst.msk [vmem:[%s6058_s2 + $0x330] sm:$0xff] %vm2062_vm3, %v2036_v50  ;;  %v1789_v62 = vsel %vm1675_vm0, %v2434_v26, %v6435_v58  ;;  %v1788_v13 = vsel %vm1675_vm0, %v2435_v6, %v6436_v12  ;;  %v6437_v55 = vld [vmem:[#allocation190_spill] sm:$0xff]  ;;  %v6454_v26 = vld [vmem:[#allocation199_spill] sm:$0xff] }
 0x343   :  { %v1918_v50 = vsel %vm1804_vm1, %v1789_v62, %v6437_v55  ;;  %v1917_v29 = vsel %vm1804_vm1, %v1788_v13, %v6438_v28  ;;  %v2444_v55 = vld [vmem:[%s6057_s0 + $0x3d8] sm:$0xff] }
 0x344   :  { %v1502_v19 = vpop.permute.xlu1 %1501  ;;  %v1500_v11 = vpop.permute.xlu0 %1499 }
 0x345   :  { %v2039_v32 = vsel %vm1933_vm2, %v1910_v1, %v1502_v19  ;;  %v2038_v33 = vsel %vm1933_vm2, %v1909_v5, %v1500_v11  ;;  %v6439_v1 = vld [vmem:[#allocation90_spill] sm:$0xff]  ;;  %v2437_v5 = vld [vmem:[%s6057_s0 + $0x390] sm:$0xff]  ;;  %v6440_v19 = vld [vmem:[#allocation91_spill] sm:$0xff] }
 0x346   :  { %2168 = vst.msk [vmem:[%s6058_s2 + $0x348] sm:$0xff] %vm2062_vm3, %v2039_v32  ;;  %2167 = vst.msk [vmem:[%s6058_s2 + $0x340] sm:$0xff] %vm2062_vm3, %v2038_v33  ;;  %v1791_v4 = vsel %vm1675_vm0, %v2436_v61, %v6439_v1  ;;  %v1790_v11 = vsel %vm1675_vm0, %v2437_v5, %v6440_v19  ;;  %v6441_v32 = vld [vmem:[#allocation192_spill] sm:$0xff]  ;;  %v6458_v61 = vld [vmem:[#allocation201_spill] sm:$0xff] }
 0x347   :  { %v1920_v33 = vsel %vm1804_vm1, %v1791_v4, %v6441_v32  ;;  %v1919_v46 = vsel %vm1804_vm1, %v1790_v11, %v6442_v15  ;;  %v2446_v32 = vld [vmem:[%s6057_s0 + $0x3e8] sm:$0xff] }
 0x348   :  { %v1506_v36 = vpop.permute.xlu1 %1505  ;;  %v1504_v37 = vpop.permute.xlu0 %1503 }
 0x349   :  { %v2041_v7 = vsel %vm1933_vm2, %v1912_v48, %v1506_v36  ;;  %v2040_v38 = vsel %vm1933_vm2, %v1911_v51, %v1504_v37  ;;  %v6443_v48 = vld [vmem:[#allocation92_spill] sm:$0xff]  ;;  %v2439_v51 = vld [vmem:[%s6057_s0 + $0x3a0] sm:$0xff]  ;;  %v6444_v36 = vld [vmem:[#allocation93_spill] sm:$0xff] }
 0x34a   :  { %2170 = vst.msk [vmem:[%s6058_s2 + $0x358] sm:$0xff] %vm2062_vm3, %v2041_v7  ;;  %2169 = vst.msk [vmem:[%s6058_s2 + $0x350] sm:$0xff] %vm2062_vm3, %v2040_v38  ;;  %v1793_v53 = vsel %vm1675_vm0, %v2438_v49, %v6443_v48  ;;  %v1792_v37 = vsel %vm1675_vm0, %v2439_v51, %v6444_v36  ;;  %v6445_v7 = vld [vmem:[#allocation194_spill] sm:$0xff]  ;;  %v6462_v49 = vld [vmem:[#allocation203_spill] sm:$0xff] }
 0x34b   :  { %v1922_v38 = vsel %vm1804_vm1, %v1793_v53, %v6445_v7  ;;  %v1921_v27 = vsel %vm1804_vm1, %v1792_v37, %v6446_v42  ;;  %v2448_v7 = vld [vmem:[%s6057_s0 + $0x3f8] sm:$0xff] }
 0x34c   :  { %v1510_v63 = vpop.permute.xlu1 %1509  ;;  %v1508_v30 = vpop.permute.xlu0 %1507 }
 0x34d   :  { %v2043_v8 = vsel %vm1933_vm2, %v1914_v18, %v1510_v63  ;;  %v2042_v9 = vsel %vm1933_vm2, %v1913_v41, %v1508_v30  ;;  %v6447_v18 = vld [vmem:[#allocation94_spill] sm:$0xff]  ;;  %v2441_v41 = vld [vmem:[%s6057_s0 + $0x3b0] sm:$0xff]  ;;  %v6448_v63 = vld [vmem:[#allocation95_spill] sm:$0xff] }
 0x34e   :  { %2172 = vst.msk [vmem:[%s6058_s2 + $0x368] sm:$0xff] %vm2062_vm3, %v2043_v8  ;;  %2171 = vst.msk [vmem:[%s6058_s2 + $0x360] sm:$0xff] %vm2062_vm3, %v2042_v9  ;;  %v1795_v40 = vsel %vm1675_vm0, %v2440_v39, %v6447_v18  ;;  %v1794_v30 = vsel %vm1675_vm0, %v2441_v41, %v6448_v63  ;;  %v6449_v8 = vld [vmem:[#allocation196_spill] sm:$0xff]  ;;  %v6466_v39 = vld [vmem:[#allocation205_spill] sm:$0xff] }
 0x34f   :  { %v1924_v9 = vsel %vm1804_vm1, %v1795_v40, %v6449_v8  ;;  %v1923_v10 = vsel %vm1804_vm1, %v1794_v30, %v6450_v3 }
 0x350   :  { %v1514_v24 = vpop.permute.xlu1 %1513  ;;  %v1512_v25 = vpop.permute.xlu0 %1511 }
 0x351   :  { %v2045_v31 = vsel %vm1933_vm2, %v1916_v45, %v1514_v24  ;;  %v2044_v2 = vsel %vm1933_vm2, %v1915_v22, %v1512_v25  ;;  %v6451_v45 = vld [vmem:[#allocation96_spill] sm:$0xff]  ;;  %v2443_v22 = vld [vmem:[%s6057_s0 + $0x3c0] sm:$0xff]  ;;  %v6452_v24 = vld [vmem:[#allocation97_spill] sm:$0xff] }
 0x352   :  { %2174 = vst.msk [vmem:[%s6058_s2 + $0x378] sm:$0xff] %vm2062_vm3, %v2045_v31  ;;  %2173 = vst.msk [vmem:[%s6058_s2 + $0x370] sm:$0xff] %vm2062_vm3, %v2044_v2  ;;  %v1797_v57 = vsel %vm1675_vm0, %v2442_v44, %v6451_v45  ;;  %v1796_v25 = vsel %vm1675_vm0, %v2443_v22, %v6452_v24  ;;  %v6453_v31 = vld [vmem:[#allocation198_spill] sm:$0xff] }
 0x353   :  { %v1926_v2 = vsel %vm1804_vm1, %v1797_v57, %v6453_v31  ;;  %v1925_v58 = vsel %vm1804_vm1, %v1796_v25, %v6454_v26 }
 0x354   :  { %v1518_v23 = vpop.permute.xlu1 %1517  ;;  %v1516_v54 = vpop.permute.xlu0 %1515 }
 0x355   :  { %v2047_v56 = vsel %vm1933_vm2, %v1918_v50, %v1518_v23  ;;  %v2046_v52 = vsel %vm1933_vm2, %v1917_v29, %v1516_v54  ;;  %v6455_v50 = vld [vmem:[#allocation98_spill] sm:$0xff]  ;;  %v2445_v29 = vld [vmem:[%s6057_s0 + $0x3d0] sm:$0xff]  ;;  %v6456_v23 = vld [vmem:[#allocation99_spill] sm:$0xff] }
 0x356   :  { %2176 = vst.msk [vmem:[%s6058_s2 + $0x388] sm:$0xff] %vm2062_vm3, %v2047_v56  ;;  %2175 = vst.msk [vmem:[%s6058_s2 + $0x380] sm:$0xff] %vm2062_vm3, %v2046_v52  ;;  %v1799_v28 = vsel %vm1675_vm0, %v2444_v55, %v6455_v50  ;;  %v1798_v54 = vsel %vm1675_vm0, %v2445_v29, %v6456_v23  ;;  %v6457_v56 = vld [vmem:[#allocation200_spill] sm:$0xff] }
 0x357   :  { %v1928_v52 = vsel %vm1804_vm1, %v1799_v28, %v6457_v56  ;;  %v1927_v1 = vsel %vm1804_vm1, %v1798_v54, %v6458_v61 }
 0x358   :  { %v1522_v16 = vpop.permute.xlu1 %1521  ;;  %v1520_v17 = vpop.permute.xlu0 %1519 }
 0x359   :  { %v2049_v47 = vsel %vm1933_vm2, %v1920_v33, %v1522_v16  ;;  %v2048_v34 = vsel %vm1933_vm2, %v1919_v46, %v1520_v17  ;;  %v6459_v33 = vld [vmem:[#allocation100_spill] sm:$0xff]  ;;  %v2447_v46 = vld [vmem:[%s6057_s0 + $0x3e0] sm:$0xff]  ;;  %v6460_v16 = vld [vmem:[#allocation101_spill] sm:$0xff] }
 0x35a   :  { %2178 = vst.msk [vmem:[%s6058_s2 + $0x398] sm:$0xff] %vm2062_vm3, %v2049_v47  ;;  %2177 = vst.msk [vmem:[%s6058_s2 + $0x390] sm:$0xff] %vm2062_vm3, %v2048_v34  ;;  %v1801_v15 = vsel %vm1675_vm0, %v2446_v32, %v6459_v33  ;;  %v1800_v17 = vsel %vm1675_vm0, %v2447_v46, %v6460_v16  ;;  %v6461_v47 = vld [vmem:[#allocation202_spill] sm:$0xff] }
 0x35b   :  { %v1930_v34 = vsel %vm1804_vm1, %v1801_v15, %v6461_v47  ;;  %v1929_v48 = vsel %vm1804_vm1, %v1800_v17, %v6462_v49 }
 0x35c   :  { %v1526_v59 = vpop.permute.xlu1 %1525  ;;  %v1524_v14 = vpop.permute.xlu0 %1523 }
 0x35d   :  { %v2051_v20 = vsel %vm1933_vm2, %v1922_v38, %v1526_v59  ;;  %v2050_v21 = vsel %vm1933_vm2, %v1921_v27, %v1524_v14  ;;  %v6463_v38 = vld [vmem:[#allocation102_spill] sm:$0xff]  ;;  %v2449_v27 = vld [vmem:[%s6057_s0 + $0x3f0] sm:$0xff]  ;;  %v6464_v59 = vld [vmem:[#allocation103_spill] sm:$0xff] }
 0x35e   :  { %2180 = vst.msk [vmem:[%s6058_s2 + $0x3a8] sm:$0xff] %vm2062_vm3, %v2051_v20  ;;  %2179 = vst.msk [vmem:[%s6058_s2 + $0x3a0] sm:$0xff] %vm2062_vm3, %v2050_v21  ;;  %v1803_v42 = vsel %vm1675_vm0, %v2448_v7, %v6463_v38  ;;  %v1802_v14 = vsel %vm1675_vm0, %v2449_v27, %v6464_v59  ;;  %v6465_v20 = vld [vmem:[#allocation204_spill] sm:$0xff] }
 0x35f   :  { %v1932_v21 = vsel %vm1804_vm1, %v1803_v42, %v6465_v20  ;;  %v1931_v18 = vsel %vm1804_vm1, %v1802_v14, %v6466_v39 }
 0x360   :  { %v1530_v60 = vpop.permute.xlu1 %1529  ;;  %v1528_v0 = vpop.permute.xlu0 %1527 }
 0x361   :  { %v2053_v35 = vsel %vm1933_vm2, %v1924_v9, %v1530_v60  ;;  %v2052_v43 = vsel %vm1933_vm2, %v1923_v10, %v1528_v0 }
 0x362   :  { %2182 = vst.msk [vmem:[%s6058_s2 + $0x3b8] sm:$0xff] %vm2062_vm3, %v2053_v35  ;;  %2181 = vst.msk [vmem:[%s6058_s2 + $0x3b0] sm:$0xff] %vm2062_vm3, %v2052_v43 }
 0x364   :  { %v1534_v62 = vpop.permute.xlu1 %1533  ;;  %v1532_v6 = vpop.permute.xlu0 %1531 }
 0x365   :  { %v2055_v12 = vsel %vm1933_vm2, %v1926_v2, %v1534_v62  ;;  %v2054_v13 = vsel %vm1933_vm2, %v1925_v58, %v1532_v6 }
 0x366   :  { %2184 = vst.msk [vmem:[%s6058_s2 + $0x3c8] sm:$0xff] %vm2062_vm3, %v2055_v12  ;;  %2183 = vst.msk [vmem:[%s6058_s2 + $0x3c0] sm:$0xff] %vm2062_vm3, %v2054_v13 }
 0x368   :  { %v1538_v4 = vpop.permute.xlu1 %1537  ;;  %v1536_v5 = vpop.permute.xlu0 %1535 }
 0x369   :  { %v2057_v19 = vsel %vm1933_vm2, %v1928_v52, %v1538_v4  ;;  %v2056_v11 = vsel %vm1933_vm2, %v1927_v1, %v1536_v5 }
 0x36a   :  { %2186 = vst.msk [vmem:[%s6058_s2 + $0x3d8] sm:$0xff] %vm2062_vm3, %v2057_v19  ;;  %2185 = vst.msk [vmem:[%s6058_s2 + $0x3d0] sm:$0xff] %vm2062_vm3, %v2056_v11 }
 0x36c   :  { %v1542_v53 = vpop.permute.xlu1 %1541  ;;  %v1540_v51 = vpop.permute.xlu0 %1539 }
 0x36d   :  { %v2059_v36 = vsel %vm1933_vm2, %v1930_v34, %v1542_v53  ;;  %v2058_v37 = vsel %vm1933_vm2, %v1929_v48, %v1540_v51 }
 0x36e   :  { %2188 = vst.msk [vmem:[%s6058_s2 + $0x3e8] sm:$0xff] %vm2062_vm3, %v2059_v36  ;;  %2187 = vst.msk [vmem:[%s6058_s2 + $0x3e0] sm:$0xff] %vm2062_vm3, %v2058_v37 }
 0x370   :  { %v1546_v40 = vpop.permute.xlu1 %1545  ;;  %v1544_v41 = vpop.permute.xlu0 %1543 }
 0x371   :  { %v2061_v63 = vsel %vm1933_vm2, %v1932_v21, %v1546_v40  ;;  %v2060_v30 = vsel %vm1933_vm2, %v1931_v18, %v1544_v41 }
 0x372   :  { %2190 = vst.msk [vmem:[%s6058_s2 + $0x3f8] sm:$0xff] %vm2062_vm3, %v2061_v63  ;;  %2189 = vst.msk [vmem:[%s6058_s2 + $0x3f0] sm:$0xff] %vm2062_vm3, %v2060_v30 }

</bundles_post_ra>
